<compile_context>
chip_gen: v5e
topology: v5e:2x2
jax: 0.10.0
libtpu: 0.0.40
codegen_flags: <defaults>
</compile_context>

<pallas_src>
import functools

import jax
import jax.numpy as jnp
from jax.experimental import pallas as pl
from jax.experimental.pallas import tpu as pltpu


_VMEM_LIMIT = 32 * 1024 * 1024   # explicit scoped-VMEM budget, safe on v5e/v6e/v7x


def _round_up(x, m):
    return (x + m - 1) // m * m


def _pick_row_tile(n_rows, bytes_per_row, budget=8 << 20, cap=512):
    """Fixed large row tile (multiple of 8), shrunk only if a tile would blow the budget."""
    t = int(min(cap, max(8, budget // max(bytes_per_row, 1))))
    t = (t // 8) * 8
    if n_rows <= t:
        return _round_up(max(n_rows, 1), 8)
    return t


def _pad_rows(x, n_pad):
    n = x.shape[0]
    if n_pad == n:
        return x
    pad = jnp.zeros((n_pad - n,) + x.shape[1:], x.dtype)
    return jnp.concatenate([x, pad], axis=0)


# ------------- Kernel 1: separation weight + group pooling + layer-0 projection (fused) -------------

def _sep_proj_kernel(feat_ref, wsep_ref, bsep_ref, wx_ref, bsum_ref, out_ref,
                     *, num_mask, training, cast_bf16):
    # TODO(synk): feat's trailing (M, D) tile pads to (8, 128); a lane-dense repack of feat
    # would need segmented-lane reductions and is not worth the complexity at D=32.
    feat = feat_ref[...]                                    # (TILE, M, D)
    w = wsep_ref[...]                                       # (1, D)
    b = bsep_ref[0]                                         # scalar (SMEM)
    # Linear(D -> 1) as broadcast-mul + lane reduce (degenerate matmul avoided).
    logits = jnp.sum(feat * w[None, :, :], axis=-1, keepdims=True) + b      # (TILE, M, 1)
    m = jnp.max(logits, axis=1, keepdims=True)
    e = jnp.exp(logits - m)
    sm = e / jnp.sum(e, axis=1, keepdims=True)              # softmax over masks
    sw = sm - 1.0 / num_mask
    if training:
        sw = jax.nn.sigmoid(10.0 * sw)
    else:
        sw = jnp.where(sw > 0.0, jnp.ones_like(sw), jnp.zeros_like(sw))
    w0 = sw
    w1 = 1.0 - sw
    g0 = jnp.sum(w0 * feat, axis=1) / (jnp.sum(w0, axis=1) + 1e-8)          # (TILE, D)
    g1 = jnp.sum(w1 * feat, axis=1) / (jnp.sum(w1, axis=1) + 1e-8)          # (TILE, D)
    wx = wx_ref[...]                                        # (D, 4H)
    bsum = bsum_ref[...]                                    # (1, 4H) = bx + bh + bhh
    if cast_bf16:
        g0 = g0.astype(jnp.bfloat16)
        g1 = g1.astype(jnp.bfloat16)
        wx = wx.astype(jnp.bfloat16)
    # Fused layer-0 projection: lane-dense (TILE, 4H) full-tile stores per group.
    out_ref[0] = jnp.dot(g0, wx, preferred_element_type=jnp.float32) + bsum
    out_ref[1] = jnp.dot(g1, wx, preferred_element_type=jnp.float32) + bsum


def separation_projection(feat_rows, w_sep, b_sep, wx, bsum, num_mask, training,
                          cast_bf16=False):
    """feat_rows: (N=T*B, M, D) time-major rows. Returns (2, N, 4H) projected group features."""
    n, M, D = feat_rows.shape
    F4 = wx.shape[1]
    bytes_per_row = _round_up(M, 8) * _round_up(D, 128) * 4 + 2 * _round_up(F4, 128) * 4
    tile = _pick_row_tile(n, bytes_per_row)
    n_pad = _round_up(n, tile)
    feat_rows = _pad_rows(feat_rows, n_pad)                 # zero pad rows; sliced off below
    grid = (n_pad // tile,)
    kernel = functools.partial(_sep_proj_kernel, num_mask=num_mask,
                               training=training, cast_bf16=cast_bf16)
    out = pl.pallas_call(
        kernel,
        out_shape=jax.ShapeDtypeStruct((2, n_pad, F4), jnp.float32),
        grid=grid,
        in_specs=[
            pl.BlockSpec((tile, M, D), lambda i: (i, 0, 0)),
            pl.BlockSpec((1, D), lambda i: (0, 0)),
            pl.BlockSpec(memory_space=pltpu.MemorySpace.SMEM),   # scalar bias on the scalar path
            pl.BlockSpec((D, F4), lambda i: (0, 0)),
            pl.BlockSpec((1, F4), lambda i: (0, 0)),
        ],
        out_specs=pl.BlockSpec((2, tile, F4), lambda i: (0, i, 0)),
        compiler_params=pltpu.CompilerParams(dimension_semantics=("parallel",),
                                             vmem_limit_bytes=_VMEM_LIMIT),
    )(feat_rows, w_sep, b_sep, wx, bsum)
    return out[:, :n, :]


# ------------- Kernel 2: row-tiled input projection (x @ Wx + (bx+bh+bhh)) for layers > 0 -------------

def _proj_kernel(x_ref, w_ref, b_ref, o_ref, *, cast_bf16):
    x = x_ref[...]
    w = w_ref[...]
    if cast_bf16:
        x = x.astype(jnp.bfloat16)
        w = w.astype(jnp.bfloat16)
    o_ref[...] = jnp.dot(x, w, preferred_element_type=jnp.float32) + b_ref[...]


def input_projection(x, w, b_sum, cast_bf16=False):
    n, d_in = x.shape
    F4 = w.shape[1]
    bytes_per_row = (_round_up(d_in, 128) + _round_up(F4, 128)) * 4
    tile = _pick_row_tile(n, bytes_per_row)
    n_pad = _round_up(n, tile)
    x = _pad_rows(x, n_pad)
    grid = (n_pad // tile,)
    out = pl.pallas_call(
        functools.partial(_proj_kernel, cast_bf16=cast_bf16),
        out_shape=jax.ShapeDtypeStruct((n_pad, F4), jnp.float32),
        grid=grid,
        in_specs=[
            pl.BlockSpec((tile, d_in), lambda i: (i, 0)),
            pl.BlockSpec((d_in, F4), lambda i: (0, 0)),
            pl.BlockSpec((1, F4), lambda i: (0, 0)),
        ],
        out_specs=pl.BlockSpec((tile, F4), lambda i: (i, 0)),
        compiler_params=pltpu.CompilerParams(dimension_semantics=("parallel",),
                                             vmem_limit_bytes=_VMEM_LIMIT),
    )(x, w, b_sum)
    return out[:n]


# ------------- Kernel 3: interactive-LSTM recurrence, one timestep per grid step -------------

def _lstm_step_kernel(xproj_ref, wcomb_ref, hout_ref, h_ref, c_ref, *, B, H):
    t = pl.program_id(0)

    @pl.when(t == 0)
    def _():
        h_ref[...] = jnp.zeros_like(h_ref)
        c_ref[...] = jnp.zeros_like(c_ref)

    h = h_ref[...]                                          # (2B, H), group-major rows r = j*B + b
    c = c_ref[...]
    xp = xproj_ref[0]                                       # (2B, 4H) slab for this timestep

    # Partner-group hidden: swap the two B-row halves.
    if (2 * B) % 8 == 0:
        h_partner = pltpu.roll(h, shift=B, axis=0)          # XLU sublane rotate (off the VPU path)
    else:
        # sublane-unaligned batch: static slice + concat fallback
        h_partner = jnp.concatenate([h[B:, :], h[:B, :]], axis=0)

    hh = jnp.concatenate([h, h_partner], axis=1)            # (2B, 2H)
    gates = xp + jnp.dot(hh, wcomb_ref[...], preferred_element_type=jnp.float32)   # (2B, 4H)
    # torch.chunk order: input, output, forget, cell_candidate
    i_g = gates[:, 0 * H:1 * H]
    o_g = gates[:, 1 * H:2 * H]
    f_g = gates[:, 2 * H:3 * H]
    g_g = gates[:, 3 * H:4 * H]
    c_new = jax.nn.sigmoid(f_g) * c + jax.nn.sigmoid(i_g) * jnp.tanh(g_g)
    h_new = jax.nn.sigmoid(o_g) * jnp.tanh(c_new)
    h_ref[...] = h_new
    c_ref[...] = c_new

    @pl.when(t == pl.num_programs(0) - 1)
    def _():
        hout_ref[...] = h_new                               # single final store (resident out block)


def lstm_recurrence(xproj, wcomb, *, T, B, H, per_timestep_x):
    # TODO(synk): on v7x, add a leading "parallel" batch-split grid axis to occupy both TensorCores.
    F4 = 4 * H
    if per_timestep_x:
        x_map = lambda t: (t, 0, 0)          # stream one timestep slab per grid step
    else:
        x_map = lambda t: (0, 0, 0)          # constant (view-aliased layer): block stays resident
    return pl.pallas_call(
        functools.partial(_lstm_step_kernel, B=B, H=H),
        out_shape=jax.ShapeDtypeStruct((2 * B, H), jnp.float32),
        grid=(T,),
        in_specs=[
            pl.BlockSpec((1, 2 * B, F4), x_map),
            pl.BlockSpec((2 * H, F4), lambda t: (0, 0)),     # [Wh; Whh] resident across all steps
        ],
        out_specs=pl.BlockSpec((2 * B, H), lambda t: (0, 0)),
        scratch_shapes=[pltpu.VMEM((2 * B, H), jnp.float32),   # h carry
                        pltpu.VMEM((2 * B, H), jnp.float32)],  # c carry
        compiler_params=pltpu.CompilerParams(dimension_semantics=("arbitrary",),
                                             vmem_limit_bytes=_VMEM_LIMIT),
    )(xproj, wcomb)


# --------------------- Parameters & full forward (glue) ---------------------

def init_params(key, input_size, hidden_size, n_layer):
    def kaiming(k, out_f, in_f):
        std = (2.0 / in_f) ** 0.5
        return std * jax.random.normal(k, (out_f, in_f), jnp.float32)

    keys = jax.random.split(key, 2 + 6 * n_layer)
    params = {
        "hidden_size": hidden_size,
        "n_layer": n_layer,
        "w_sep": kaiming(keys[0], 1, input_size),            # Linear(D, 1) weight as (1, D)
        "b_sep": 0.1 * jax.random.normal(keys[1], (1,), jnp.float32),
        "layers": [],
    }
    for l in range(n_layer):
        d_in = input_size if l == 0 else hidden_size
        k = keys[2 + 6 * l: 2 + 6 * (l + 1)]
        wx = kaiming(k[0], 4 * hidden_size, d_in).T           # (Din, 4H)
        wh = kaiming(k[1], 4 * hidden_size, hidden_size).T    # (H, 4H)
        whh = kaiming(k[2], 4 * hidden_size, hidden_size).T   # (H, 4H)
        bx = 0.1 * jax.random.normal(k[3], (1, 4 * hidden_size), jnp.float32)
        bh = 0.1 * jax.random.normal(k[4], (1, 4 * hidden_size), jnp.float32)
        bhh = 0.1 * jax.random.normal(k[5], (1, 4 * hidden_size), jnp.float32)
        params["layers"].append({
            "wx": wx, "bx": bx, "wh": wh, "bh": bh, "whh": whh, "bhh": bhh,
            "wcomb": jnp.concatenate([wh, whh], axis=0),      # (2H, 4H) = [Wh; Whh]
            "bsum": bx + bh + bhh,                            # (1, 4H) pre-summed bias
        })
    return params


def interactive_lstm_forward(params, feat, training, dropout, drop_key=None,
                             cast_bf16=False):
    B, T, M, D = feat.shape
    H = params["hidden_size"]
    F4 = 4 * H
    p0 = params["layers"][0]

    # Fused separation + layer-0 projection over time-major rows (row = t*B + b).
    feat_rows = jnp.transpose(feat, (1, 0, 2, 3)).reshape(T * B, M, D)
    proj2 = separation_projection(feat_rows, params["w_sep"], params["b_sep"],
                                  p0["wx"], p0["bsum"], M, training, cast_bf16)  # (2, T*B, 4H)
    # -> (T, 2B, 4H) group-major rows (r = j*B + b) consumed by the recurrence.
    xproj0 = jnp.transpose(proj2.reshape(2, T, B, F4), (1, 0, 2, 3)).reshape(T, 2 * B, F4)

    h_final = None
    for l in range(params["n_layer"]):
        p = params["layers"][l]
        if l == 0:
            xproj = xproj0
            per_t = True
        else:
            use_dropout = training and dropout > 0.0
            if use_dropout:
                # TODO(synk): dropout RNG cannot match torch's; implemented with JAX RNG in glue.
                drop_key, sub = jax.random.split(drop_key)
                keep = 1.0 - dropout
                x_bt = jnp.broadcast_to(h_final.reshape(1, 2 * B, H), (T, 2 * B, H))
                mask = jax.random.bernoulli(sub, keep, x_bt.shape).astype(jnp.float32)
                x_bt = x_bt * mask / keep
                xproj = input_projection(x_bt.reshape(T * 2 * B, H), p["wx"], p["bsum"],
                                         cast_bf16).reshape(T, 2 * B, F4)
                per_t = True
            else:
                # torch view-aliasing: every timestep equals the previous layer's final state,
                # so project ONCE and reuse the same (2B, 4H) slab every timestep.
                xproj = input_projection(h_final, p["wx"], p["bsum"],
                                         cast_bf16).reshape(1, 2 * B, F4)
                per_t = False
        h_final = lstm_recurrence(xproj, p["wcomb"], T=T, B=B, H=H, per_timestep_x=per_t)

    h_bg = jnp.transpose(h_final.reshape(2, B, H), (1, 0, 2))          # (B, 2, H)
    out = jnp.broadcast_to(h_bg[:, None], (B, T, 2, H)).reshape(B, T, 2 * H)
    return out


# --------------------- pure-JAX reference for sanity checking ---------------------

def reference_forward(params, feat, training):
    B, T, M, D = feat.shape
    H = params["hidden_size"]
    logits = jnp.einsum("btmd,d->btm", feat, params["w_sep"][0]) + params["b_sep"][0]
    sw = jax.nn.softmax(logits, axis=2)[..., None] - 1.0 / M
    sw = jax.nn.sigmoid(10.0 * sw) if training else jnp.where(sw > 0, 1.0, 0.0)
    w0, w1 = sw, 1.0 - sw
    g0 = (w0 * feat).sum(2) / (w0.sum(2) + 1e-8)
    g1 = (w1 * feat).sum(2) / (w1.sum(2) + 1e-8)
    hidden = jnp.stack([g0, g1], axis=2)
    for l in range(params["n_layer"]):
        p = params["layers"][l]
        h = jnp.zeros((B, 2, H), jnp.float32)
        c = jnp.zeros((B, 2, H), jnp.float32)
        for t in range(T):
            h_prev, c_prev = h, c
            hs, cs = [], []
            for j in range(2):
                gates = (hidden[:, t, j] @ p["wx"] + p["bx"]
                         + h_prev[:, j] @ p["wh"] + p["bh"]
                         + h_prev[:, 1 - j] @ p["whh"] + p["bhh"])
                i_g, o_g, f_g, g_g = jnp.split(gates, 4, axis=-1)
                cj = jax.nn.sigmoid(f_g) * c_prev[:, j] + jax.nn.sigmoid(i_g) * jnp.tanh(g_g)
                hj = jax.nn.sigmoid(o_g) * jnp.tanh(cj)
                cs.append(cj)
                hs.append(hj)
            h = jnp.stack(hs, 1)
            c = jnp.stack(cs, 1)
        hidden = jnp.broadcast_to(h[:, None], (B, T, 2, H))
    return hidden.reshape(B, T, 2 * H)


if __name__ == "__main__":
    B, T, M, D, H, n_layer = 2, 8, 4, 32, 32, 2
    dropout = 0.0

    key = jax.random.PRNGKey(0)
    pkey, xkey = jax.random.split(key)
    params = init_params(pkey, input_size=D, hidden_size=H, n_layer=n_layer)
    feat = jax.random.normal(xkey, (B, T, M, D), jnp.float32)

    for training in (True, False):
        out = interactive_lstm_forward(params, feat, training=training, dropout=dropout)
        out = jax.block_until_ready(out)
        ref = jax.block_until_ready(reference_forward(params, feat, training=training))
        assert out.shape == (B, T, 2 * H), out.shape
        err = float(jnp.max(jnp.abs(out - ref)))
        assert err < 1e-3, f"training={training} mismatch vs reference: {err}"

    print("KERNEL_OK")
</pallas_src>

<mosaic_0001>
module attributes {stable_mosaic.version = 11 : i64} {
  func.func @_sep_proj_kernel(%arg0: i32, %arg1: memref<16x4x32xf32, #tpu.memory_space<vmem>>, %arg2: memref<1x32xf32, #tpu.memory_space<vmem>>, %arg3: memref<1xf32, #tpu.memory_space<smem>>, %arg4: memref<32x128xf32, #tpu.memory_space<vmem>>, %arg5: memref<1x128xf32, #tpu.memory_space<vmem>>, %arg6: memref<2x16x128xf32, #tpu.memory_space<vmem>>) attributes {dimension_semantics = [#tpu.dimension_semantics<parallel>], iteration_bounds = array<i64: 1>, scalar_prefetch = 0 : i64, scratch_operands = 0 : i64, tpu.core_type = #tpu.core_type<tc>, window_params = [{transform_indices = @transform_0, window_bounds = array<i64: 16, 4, 32>}, {pipeline_mode = #tpu.pipeline_mode<synchronous>, transform_indices = @transform_1, window_bounds = array<i64: 1, 32>}, {transform_indices = @transform_2, window_bounds = array<i64: 1>}, {pipeline_mode = #tpu.pipeline_mode<synchronous>, transform_indices = @transform_3, window_bounds = array<i64: 32, 128>}, {pipeline_mode = #tpu.pipeline_mode<synchronous>, transform_indices = @transform_4, window_bounds = array<i64: 1, 128>}, {transform_indices = @transform_5, window_bounds = array<i64: 2, 16, 128>}]} {
    %c0 = arith.constant 0 : index
    %c0_0 = arith.constant 0 : index
    %c0_1 = arith.constant 0 : index
    %0 = vector.load %arg1[%c0, %c0_0, %c0_1] : memref<16x4x32xf32, #tpu.memory_space<vmem>>, vector<16x4x32xf32>
    %c0_2 = arith.constant 0 : index
    %c0_3 = arith.constant 0 : index
    %1 = vector.load %arg2[%c0_2, %c0_3] : memref<1x32xf32, #tpu.memory_space<vmem>>, vector<1x32xf32>
    %c0_4 = arith.constant 0 : index
    %2 = memref.load %arg3[%c0_4] : memref<1xf32, #tpu.memory_space<smem>>
    %3 = vector.shape_cast %1 : vector<1x32xf32> to vector<1x1x32xf32>
    %4 = vector.broadcast %3 : vector<1x1x32xf32> to vector<16x4x32xf32>
    %5 = arith.mulf %0, %4 : vector<16x4x32xf32>
    %cst = arith.constant dense<0.000000e+00> : vector<16x4xf32>
    %6 = vector.multi_reduction <add>, %5, %cst [2] : vector<16x4x32xf32> to vector<16x4xf32>
    %7 = vector.shape_cast %6 : vector<16x4xf32> to vector<16x4x1xf32>
    %8 = vector.broadcast %2 : f32 to vector<16x4x1xf32>
    %9 = arith.addf %7, %8 : vector<16x4x1xf32>
    %cst_5 = arith.constant dense<0xFF800000> : vector<16x1xf32>
    %10 = vector.multi_reduction <maximumf>, %9, %cst_5 [1] : vector<16x4x1xf32> to vector<16x1xf32>
    %11 = vector.shape_cast %10 : vector<16x1xf32> to vector<16x1x1xf32>
    %12 = vector.broadcast %11 : vector<16x1x1xf32> to vector<16x4x1xf32>
    %13 = arith.subf %9, %12 : vector<16x4x1xf32>
    %14 = math.exp %13 : vector<16x4x1xf32>
    %cst_6 = arith.constant dense<0.000000e+00> : vector<16x1xf32>
    %15 = vector.multi_reduction <add>, %14, %cst_6 [1] : vector<16x4x1xf32> to vector<16x1xf32>
    %16 = vector.shape_cast %15 : vector<16x1xf32> to vector<16x1x1xf32>
    %17 = vector.broadcast %16 : vector<16x1x1xf32> to vector<16x4x1xf32>
    %18 = arith.divf %14, %17 : vector<16x4x1xf32>
    %cst_7 = arith.constant 2.500000e-01 : f32
    %19 = vector.broadcast %cst_7 : f32 to vector<16x4x1xf32>
    %20 = arith.subf %18, %19 : vector<16x4x1xf32>
    %cst_8 = arith.constant 1.000000e+01 : f32
    %21 = vector.broadcast %cst_8 : f32 to vector<16x4x1xf32>
    %22 = arith.mulf %21, %20 : vector<16x4x1xf32>
    %23 = arith.negf %22 : vector<16x4x1xf32>
    %24 = math.exp %23 : vector<16x4x1xf32>
    %cst_9 = arith.constant 1.000000e+00 : f32
    %25 = vector.broadcast %cst_9 : f32 to vector<16x4x1xf32>
    %26 = arith.addf %25, %24 : vector<16x4x1xf32>
    %27 = arith.divf %25, %26 : vector<16x4x1xf32>
    %cst_10 = arith.constant 1.000000e+00 : f32
    %28 = vector.broadcast %cst_10 : f32 to vector<16x4x1xf32>
    %29 = arith.subf %28, %27 : vector<16x4x1xf32>
    %30 = vector.broadcast %27 : vector<16x4x1xf32> to vector<16x4x32xf32>
    %31 = arith.mulf %30, %0 : vector<16x4x32xf32>
    %cst_11 = arith.constant dense<0.000000e+00> : vector<16x32xf32>
    %32 = vector.multi_reduction <add>, %31, %cst_11 [1] : vector<16x4x32xf32> to vector<16x32xf32>
    %cst_12 = arith.constant dense<0.000000e+00> : vector<16x1xf32>
    %33 = vector.multi_reduction <add>, %27, %cst_12 [1] : vector<16x4x1xf32> to vector<16x1xf32>
    %cst_13 = arith.constant 9.99999993E-9 : f32
    %34 = vector.broadcast %cst_13 : f32 to vector<16x1xf32>
    %35 = arith.addf %33, %34 : vector<16x1xf32>
    %36 = vector.broadcast %35 : vector<16x1xf32> to vector<16x32xf32>
    %37 = arith.divf %32, %36 : vector<16x32xf32>
    %38 = vector.broadcast %29 : vector<16x4x1xf32> to vector<16x4x32xf32>
    %39 = arith.mulf %38, %0 : vector<16x4x32xf32>
    %cst_14 = arith.constant dense<0.000000e+00> : vector<16x32xf32>
    %40 = vector.multi_reduction <add>, %39, %cst_14 [1] : vector<16x4x32xf32> to vector<16x32xf32>
    %cst_15 = arith.constant dense<0.000000e+00> : vector<16x1xf32>
    %41 = vector.multi_reduction <add>, %29, %cst_15 [1] : vector<16x4x1xf32> to vector<16x1xf32>
    %cst_16 = arith.constant 9.99999993E-9 : f32
    %42 = vector.broadcast %cst_16 : f32 to vector<16x1xf32>
    %43 = arith.addf %41, %42 : vector<16x1xf32>
    %44 = vector.broadcast %43 : vector<16x1xf32> to vector<16x32xf32>
    %45 = arith.divf %40, %44 : vector<16x32xf32>
    %c0_17 = arith.constant 0 : index
    %c0_18 = arith.constant 0 : index
    %46 = vector.load %arg4[%c0_17, %c0_18] : memref<32x128xf32, #tpu.memory_space<vmem>>, vector<32x128xf32>
    %c0_19 = arith.constant 0 : index
    %c0_20 = arith.constant 0 : index
    %47 = vector.load %arg5[%c0_19, %c0_20] : memref<1x128xf32, #tpu.memory_space<vmem>>, vector<1x128xf32>
    %cst_21 = arith.constant dense<0.000000e+00> : vector<16x128xf32>
    %48 = tpu.matmul %37, %46, %cst_21 {dimension_numbers = #tpu.dot_dimension_numbers<[1], [0], [0], [1], [0, 0, 1, 1], [], []>} : vector<16x32xf32>, vector<32x128xf32>, vector<16x128xf32> -> vector<16x128xf32>
    %49 = vector.broadcast %47 : vector<1x128xf32> to vector<16x128xf32>
    %50 = arith.addf %48, %49 : vector<16x128xf32>
    %c0_22 = arith.constant 0 : index
    %c0_23 = arith.constant 0 : index
    %c0_24 = arith.constant 0 : index
    %51 = vector.load %arg6[%c0_22, %c0_23, %c0_24] : memref<2x16x128xf32, #tpu.memory_space<vmem>>, vector<1x16x128xf32>
    %52 = vector.shape_cast %51 : vector<1x16x128xf32> to vector<16x128xf32>
    %53 = vector.shape_cast %50 : vector<16x128xf32> to vector<1x16x128xf32>
    tpu.vector_store %arg6[%c0_22, %c0_23, %c0_24], %53 {strides = array<i32>} : memref<2x16x128xf32, #tpu.memory_space<vmem>>, vector<1x16x128xf32>,
    %cst_25 = arith.constant dense<0.000000e+00> : vector<16x128xf32>
    %54 = tpu.matmul %45, %46, %cst_25 {dimension_numbers = #tpu.dot_dimension_numbers<[1], [0], [0], [1], [0, 0, 1, 1], [], []>} : vector<16x32xf32>, vector<32x128xf32>, vector<16x128xf32> -> vector<16x128xf32>
    %55 = vector.broadcast %47 : vector<1x128xf32> to vector<16x128xf32>
    %56 = arith.addf %54, %55 : vector<16x128xf32>
    %c1 = arith.constant 1 : index
    %c0_26 = arith.constant 0 : index
    %c0_27 = arith.constant 0 : index
    %57 = vector.load %arg6[%c1, %c0_26, %c0_27] : memref<2x16x128xf32, #tpu.memory_space<vmem>>, vector<1x16x128xf32>
    %58 = vector.shape_cast %57 : vector<1x16x128xf32> to vector<16x128xf32>
    %59 = vector.shape_cast %56 : vector<16x128xf32> to vector<1x16x128xf32>
    tpu.vector_store %arg6[%c1, %c0_26, %c0_27], %59 {strides = array<i32>} : memref<2x16x128xf32, #tpu.memory_space<vmem>>, vector<1x16x128xf32>,
    return
  }
  func.func @transform_0(%arg0: i32) -> (i32, i32, i32) {
    %c0_i32 = arith.constant 0 : i32
    %c0_i32_0 = arith.constant 0 : i32
    %c0_i32_1 = arith.constant 0 : i32
    return %arg0, %c0_i32, %c0_i32_0 : i32, i32, i32
  }
  func.func @transform_1(%arg0: i32) -> (i32, i32) {
    %c0_i32 = arith.constant 0 : i32
    %c0_i32_0 = arith.constant 0 : i32
    %c0_i32_1 = arith.constant 0 : i32
    return %c0_i32, %c0_i32_0 : i32, i32
  }
  func.func @transform_2(%arg0: i32) -> i32 {
    %c0_i32 = arith.constant 0 : i32
    %c0_i32_0 = arith.constant 0 : i32
    return %c0_i32 : i32
  }
  func.func @transform_3(%arg0: i32) -> (i32, i32) {
    %c0_i32 = arith.constant 0 : i32
    %c0_i32_0 = arith.constant 0 : i32
    %c0_i32_1 = arith.constant 0 : i32
    return %c0_i32, %c0_i32_0 : i32, i32
  }
  func.func @transform_4(%arg0: i32) -> (i32, i32) {
    %c0_i32 = arith.constant 0 : i32
    %c0_i32_0 = arith.constant 0 : i32
    %c0_i32_1 = arith.constant 0 : i32
    return %c0_i32, %c0_i32_0 : i32, i32
  }
  func.func @transform_5(%arg0: i32) -> (i32, i32, i32) {
    %c0_i32 = arith.constant 0 : i32
    %c0_i32_0 = arith.constant 0 : i32
    %c0_i32_1 = arith.constant 0 : i32
    return %c0_i32, %arg0, %c0_i32_0 : i32, i32, i32
  }
}

</mosaic_0001>

<bundles_post_ra>
// kernel: tpu_custom_call.1
= control target key start
LH: loop header
LB: loop body
LE: loop exit
PB: predicated region body
PF: predicated region fallthrough
CT: control target
= control target key end

     0   :  { %11 = vsyncpa [#allocation4], 0  ;;  %s4552_s0 = inlined_call_operand.hbm [shape: f32[16,4,32], index: 0, kind: input, shape index: {}]   ;;  %s4553_s1 = inlined_call_operand.vmem [shape: f32[1,32], index: 1, kind: input, shape index: {}]   ;;  %s4554_s2 = inlined_call_operand.<no memory space> [shape: f32[1], index: 2, kind: input, shape index: {}]   ;;  %s4555_s3 = inlined_call_operand.hbm [shape: f32[32,128], index: 3, kind: input, shape index: {}]   ;;  %s4556_s4 = inlined_call_operand.vmem [shape: f32[1,128], index: 4, kind: input, shape index: {}]   ;;  %s4557_s5 = inlined_call_operand.hbm [shape: f32[2,16,128], index: 5, kind: output, shape index: {}]  }
   0x1   :  { %12 = vsyncpa [#allocation7], 0 }
   0x2   :  { %13 = vsyncpa [#allocation5], 0  ;;  %s18_s20 = sshll.u32 %s4552_s0, 4  ;;  %s2508_s21 = smov [#allocation3]   ;;  %s19_s20 = int_to_ptr.hbm [resolvable:$true] %s18_s20 }
   0x3   :  { %s20_s22 = sshll.u32 %s2508_s21, 4  ;;  %s35_s25 = sshll.u32 %s4555_s3, 4  ;;  %s21_s22 = int_to_ptr.vmem [resolvable:$true] %s20_s22  ;;  %s36_s25 = int_to_ptr.hbm [resolvable:$true] %s35_s25 }
   0x4   :  { %s2509_s26 = smov 64   ;;  %s2510_s27 = smov 4  }
   0x5   :  { %26 = dma.hbm_to_vmem [thread:$0]  %s19_s20, 1024, %s21_s22, [#allocation4], %s2509_s26, %s2509_s26, %s2510_s27  }
   0x6   :  { %s2511_s28 = smov [#allocation6]   ;;  %s2512_s30 = smov 128  }
   0x7   :  { %s37_s29 = sshll.u32 %s2511_s28, 4  ;;  %s2513_s6 = smov 8   ;;  %s38_s29 = int_to_ptr.vmem [resolvable:$true] %s37_s29 }
   0x8   :  { %43 = dma.hbm_to_vmem [thread:$0]  %s36_s25, 512, %s38_s29, [#allocation7], %s2512_s30, %s2512_s30, %s2513_s6  }
   0x9   :  { %2502 = dma.done.wait [#allocation4], 1024  }
   0xa   :  { %2503 = vsyncadd [#allocation4], 4294966272 }
   0xb   :  { %2504 = dma.done.wait [#allocation7], 512  }
   0xc   :  { %2505 = vsyncadd [#allocation7], 4294966784  ;;  %v66_v0 = vld [vmem:[#allocation3 + $0x30] sm:$0xf]  ;;  %v2220_v1 = vld [vmem:[%s4553_s1] ss:$0 sm:$0xff]  ;;  %v2576_v49 = vstv %s4554_s2 }
   0xd   :  { %vm4586_vm0 = vcmask 257024   ;;  %v64_v2 = vld [vmem:[#allocation3 + $0x28] sm:$0xf]  ;;  %v62_v3 = vld [vmem:[#allocation3 + $0x20] sm:$0xf]  ;;  %v87_v4 = vmul.f32 %v2220_v1, %v66_v0  ;;  %vm4583_vm1 = vcmask 1043456  }
   0xe   :  { %v85_v5 = vmul.f32 %v2220_v1, %v64_v2  ;;  %v83_v6 = vmul.f32 %v2220_v1, %v62_v3  ;;  %v67_v7 = vld [vmem:[#allocation3 + $0x34] sm:$0xf]  ;;  %v65_v8 = vld [vmem:[#allocation3 + $0x2c] sm:$0xf]  ;;  %v63_v12 = vld [vmem:[#allocation3 + $0x24] sm:$0xf] }
   0xf   :  { %v128_v9 = vsel %vm4586_vm0, %v87_v4, 0.0  ;;  %v88_v13 = vmul.f32 %v2220_v1, %v67_v7  ;;  %v86_v14 = vmul.f32 %v2220_v1, %v65_v8  ;;  %v84_v15 = vmul.f32 %v2220_v1, %v63_v12  ;;  %v55_v19 = vld [vmem:[#allocation3 + $0x4] sm:$0xf]  ;;  %v54_v20 = vld [vmem:[#allocation3] sm:$0xf]  ;;  %s2155_s12 = sshll.u32 %s4557_s5, 4  ;;  %s2156_s12 = int_to_ptr.hbm [resolvable:$true] %s2155_s12 }
  0x10   :  { %v122_v10 = vsel %vm4586_vm0, %v85_v5, 0.0  ;;  %v116_v11 = vsel %vm4586_vm0, %v83_v6, 0.0  ;;  %129 = vadd.xlane.f32.xlu2 %v128_v9  ;;  %v68_v21 = vld [vmem:[#allocation3 + $0x38] sm:$0xf]  ;;  %v76_v22 = vmul.f32 %v2220_v1, %v55_v19  ;;  %v75_v23 = vmul.f32 %v2220_v1, %v54_v20  ;;  %v57_v28 = vld [vmem:[#allocation3 + $0xc] sm:$0xf] }
  0x11   :  { %123 = vadd.xlane.f32.xlu1 %v122_v10  ;;  %117 = vadd.xlane.f32.xlu0 %v116_v11  ;;  %v131_v16 = vsel %vm4586_vm0, %v88_v13, 0.0  ;;  %v125_v17 = vsel %vm4586_vm0, %v86_v14, 0.0  ;;  %v119_v18 = vsel %vm4586_vm0, %v84_v15, 0.0  ;;  %v89_v24 = vmul.f32 %v2220_v1, %v68_v21  ;;  %v56_v29 = vld [vmem:[#allocation3 + $0x8] sm:$0xf] }
  0x12   :  { %v95_v25 = vsel %vm4586_vm0, %v76_v22, 0.0  ;;  %v92_v26 = vsel %vm4586_vm0, %v75_v23, 0.0  ;;  %v69_v30 = vld [vmem:[#allocation3 + $0x3c] sm:$0xf]  ;;  %v78_v31 = vmul.f32 %v2220_v1, %v57_v28  ;;  %v77_v32 = vmul.f32 %v2220_v1, %v56_v29  ;;  %v60_v37 = vld [vmem:[#allocation3 + $0x18] sm:$0xf] }
  0x13   :  { %v134_v27 = vsel %vm4586_vm0, %v89_v24, 0.0  ;;  %v90_v33 = vmul.f32 %v2220_v1, %v69_v30  ;;  %v59_v38 = vld [vmem:[#allocation3 + $0x14] sm:$0xf]  ;;  %v58_v39 = vld [vmem:[#allocation3 + $0x10] sm:$0xf]  ;;  %v81_v40 = vmul.f32 %v2220_v1, %v60_v37 }
  0x14   :  { %v101_v34 = vsel %vm4586_vm0, %v78_v31, 0.0  ;;  %v98_v35 = vsel %vm4586_vm0, %v77_v32, 0.0  ;;  %v80_v41 = vmul.f32 %v2220_v1, %v59_v38  ;;  %v79_v42 = vmul.f32 %v2220_v1, %v58_v39  ;;  %v61_v46 = vld [vmem:[#allocation3 + $0x1c] sm:$0xf] }
  0x15   :  { %v137_v36 = vsel %vm4586_vm0, %v90_v33, 0.0  ;;  %v110_v43 = vsel %vm4586_vm0, %v81_v40, 0.0  ;;  %v82_v47 = vmul.f32 %v2220_v1, %v61_v46 }
  0x16   :  { %v107_v44 = vsel %vm4586_vm0, %v80_v41, 0.0  ;;  %v104_v45 = vsel %vm4586_vm0, %v79_v42, 0.0 }
  0x17   :  { %v113_v48 = vsel %vm4586_vm0, %v82_v47, 0.0 }
  0x18   :  { %132 = vadd.xlane.f32.xlu2 %v131_v16 }
  0x19   :  { %126 = vadd.xlane.f32.xlu1 %v125_v17  ;;  %120 = vadd.xlane.f32.xlu0 %v119_v18 }
  0x20   :  { %96 = vadd.xlane.f32.xlu2 %v95_v25 }
  0x21   :  { %93 = vadd.xlane.f32.xlu1 %v92_v26  ;;  %135 = vadd.xlane.f32.xlu0 %v134_v27 }
  0x28   :  { %102 = vadd.xlane.f32.xlu2 %v101_v34 }
  0x29   :  { %99 = vadd.xlane.f32.xlu1 %v98_v35  ;;  %138 = vadd.xlane.f32.xlu0 %v137_v36 }
  0x30   :  { %111 = vadd.xlane.f32.xlu2 %v110_v43 }
  0x31   :  { %108 = vadd.xlane.f32.xlu1 %v107_v44  ;;  %105 = vadd.xlane.f32.xlu0 %v104_v45 }
  0x39   :  { %114 = vadd.xlane.f32.xlu0 %v113_v48 }
  0x83   :  { %v130_v50 = vpop.xlane.xlu2 %129 }
  0x84   :  { %v124_v51 = vpop.xlane.xlu1 %123  ;;  %v153_v52 = vadd.f32 %v2576_v49, %v130_v50  ;;  %v118_v54 = vpop.xlane.xlu0 %117 }
  0x85   :  { %v151_v53 = vadd.f32 %v2576_v49, %v124_v51  ;;  %v149_v55 = vadd.f32 %v2576_v49, %v118_v54 }
  0x86   :  { %v242_v56 = vsel %vm4583_vm1, %v153_v52, -inf }
  0x87   :  { %v228_v57 = vsel %vm4583_vm1, %v151_v53, -inf  ;;  %v243_v58 = vrot.slane %v242_v56, 4  ;;  %v214_v60 = vsel %vm4583_vm1, %v149_v55, -inf }
  0x88   :  { %v229_v59 = vrot.slane %v228_v57, 4  ;;  %v215_v61 = vrot.slane %v214_v60, 4 }
  0x89   :  { %v244_v62 = vmax.f32 %v242_v56, %v243_v58 }
  0x8a   :  { %v230_v63 = vmax.f32 %v228_v57, %v229_v59  ;;  %v216_v0 = vmax.f32 %v214_v60, %v215_v61 }
  0x8b   :  { %v245_v1 = vrot.slane %v244_v62, 2  ;;  %v133_v3 = vpop.xlane.xlu2 %132 }
  0x8c   :  { %v231_v2 = vrot.slane %v230_v63, 2  ;;  %v127_v4 = vpop.xlane.xlu1 %126  ;;  %v217_v5 = vrot.slane %v216_v0, 2  ;;  %v154_v6 = vadd.f32 %v2576_v49, %v133_v3  ;;  %v121_v8 = vpop.xlane.xlu0 %120 }
  0x8d   :  { %v152_v7 = vadd.f32 %v2576_v49, %v127_v4  ;;  %v246_v9 = vmax.f32 %v244_v62, %v245_v1  ;;  %v2587_v11 = vadd.f32 %v2576_v49, %v121_v8 }
  0x8e   :  { %v232_v10 = vmax.f32 %v230_v63, %v231_v2  ;;  %v218_v12 = vmax.f32 %v216_v0, %v217_v5  ;;  %v249_v13 = vsel %vm4583_vm1, %v154_v6, -inf }
  0x8f   :  { %v235_v14 = vsel %vm4583_vm1, %v152_v7, -inf  ;;  %v247_v15 = vrot.slane %v246_v9, 1  ;;  %v250_v17 = vrot.slane %v249_v13, 4  ;;  %v221_v20 = vsel %vm4583_vm1, %v2587_v11, -inf }
  0x90   :  { %v233_v16 = vrot.slane %v232_v10, 1  ;;  %v236_v18 = vrot.slane %v235_v14, 4  ;;  %v219_v19 = vrot.slane %v218_v12, 1  ;;  %v222_v26 = vrot.slane %v221_v20, 4 }
  0x91   :  { %v248_v21 = vmax.f32 %v246_v9, %v247_v15  ;;  %v251_v23 = vmax.f32 %v249_v13, %v250_v17 }
  0x92   :  { %v234_v22 = vmax.f32 %v232_v10, %v233_v16  ;;  %v237_v24 = vmax.f32 %v235_v14, %v236_v18  ;;  %v220_v25 = vmax.f32 %v218_v12, %v219_v19  ;;  %v223_v33 = vmax.f32 %v221_v20, %v222_v26 }
  0x93   :  { %v282_v27 = vsub.f32 %v153_v52, %v248_v21  ;;  %v252_v29 = vrot.slane %v251_v23, 2  ;;  %v97_v31 = vpop.xlane.xlu2 %96 }
  0x94   :  { %v280_v28 = vsub.f32 %v151_v53, %v234_v22  ;;  %v238_v30 = vrot.slane %v237_v24, 2  ;;  %v278_v32 = vsub.f32 %v149_v55, %v220_v25  ;;  %v136_v34 = vpop.xlane.xlu0 %135  ;;  %v2594_v35 = vadd.f32 %v2576_v49, %v97_v31  ;;  %v94_v47 = vpop.xlane.xlu1 %93 }
  0x95   :  { %v310_v36 = vmul.f32 1.442695, %v282_v27  ;;  %v253_v38 = vmax.f32 %v251_v23, %v252_v29  ;;  %v224_v41 = vrot.slane %v223_v33, 2  ;;  %v2597_v42 = vadd.f32 %v2576_v49, %v136_v34 }
  0x96   :  { %v306_v37 = vmul.f32 1.442695, %v280_v28  ;;  %v239_v39 = vmax.f32 %v237_v24, %v238_v30  ;;  %v302_v40 = vmul.f32 1.442695, %v278_v32  ;;  %v165_v43 = vsel %vm4583_vm1, %v2594_v35, -inf }
  0x97   :  { %2222 = vpow2.f32 %v310_v36  ;;  %v254_v44 = vrot.slane %v253_v38, 1  ;;  %v166_v46 = vrot.slane %v165_v43, 4  ;;  %v225_v48 = vmax.f32 %v223_v33, %v224_v41 }
  0x98   :  { %v240_v45 = vrot.slane %v239_v39, 1  ;;  %2224 = vpow2.f32 %v306_v37  ;;  %v256_v50 = vsel %vm4583_vm1, %v2597_v42, -inf  ;;  %v2604_v56 = vadd.f32 %v2576_v49, %v94_v47 }
  0x99   :  { %2226 = vpow2.f32 %v302_v40  ;;  %v255_v51 = vmax.f32 %v253_v38, %v254_v44  ;;  %v257_v53 = vrot.slane %v256_v50, 4  ;;  %v226_v54 = vrot.slane %v225_v48, 1 }
  0x9a   :  { %v241_v52 = vmax.f32 %v239_v39, %v240_v45  ;;  %v167_v55 = vmax.f32 %v165_v43, %v166_v46 }
  0x9b   :  { %v283_v57 = vsub.f32 %v154_v6, %v255_v51  ;;  %v258_v59 = vmax.f32 %v256_v50, %v257_v53  ;;  %v227_v60 = vmax.f32 %v225_v48, %v226_v54  ;;  %v158_v6 = vsel %vm4583_vm1, %v2604_v56, -inf }
  0x9c   :  { %v281_v58 = vsub.f32 %v152_v7, %v241_v52  ;;  %v168_v61 = vrot.slane %v167_v55, 2  ;;  %v159_v18 = vrot.slane %v158_v6, 4 }
  0x9d   :  { %v2606_v62 = vpop.eup %2222  ;;  %v312_v63 = vmul.f32 1.442695, %v283_v57  ;;  %v259_v1 = vrot.slane %v258_v59, 2  ;;  %v279_v4 = vsub.f32 %v2587_v11, %v227_v60 }
  0x9e   :  { %v308_v0 = vmul.f32 1.442695, %v281_v58  ;;  %v2608_v2 = vpop.eup %2224  ;;  %v402_v3 = vsel %vm4583_vm1, %v2606_v62, 0.0  ;;  %v169_v5 = vmax.f32 %v167_v55, %v168_v61  ;;  %v160_v31 = vmax.f32 %v158_v6, %v159_v18 }
  0x9f   :  { %v2615_v7 = vpop.eup %2226  ;;  %v403_v8 = vrot.slane %v402_v3, 4  ;;  %v388_v9 = vsel %vm4583_vm1, %v2608_v2, 0.0  ;;  %2228 = vpow2.f32 %v312_v63  ;;  %v260_v10 = vmax.f32 %v258_v59, %v259_v1 }
  0xa0   :  { %v389_v12 = vrot.slane %v388_v9, 4  ;;  %v374_v13 = vsel %vm4583_vm1, %v2615_v7, 0.0  ;;  %2230 = vpow2.f32 %v308_v0  ;;  %v304_v14 = vmul.f32 1.442695, %v279_v4 }
  0xa1   :  { %v404_v15 = vadd.f32 %v403_v8, %v402_v3  ;;  %v375_v11 = vrot.slane %v374_v13, 4  ;;  %v261_v16 = vrot.slane %v260_v10, 1  ;;  %v170_v23 = vrot.slane %v169_v5, 1 }
  0xa2   :  { %v390_v17 = vadd.f32 %v389_v12, %v388_v9  ;;  %2232 = vpow2.f32 %v304_v14  ;;  %v161_v53 = vrot.slane %v160_v31, 2 }
  0xa3   :  { %v405_v19 = vrot.slane %v404_v15, 2  ;;  %v376_v20 = vadd.f32 %v375_v11, %v374_v13  ;;  %v262_v21 = vmax.f32 %v260_v10, %v261_v16  ;;  %v171_v41 = vmax.f32 %v169_v5, %v170_v23 }
  0xa4   :  { %v391_v22 = vrot.slane %v390_v17, 2  ;;  %v2643_v1 = vmax.f32 %v160_v31, %v161_v53 }
  0xa5   :  { %v2621_v24 = vpop.eup %2228  ;;  %v406_v25 = vadd.f32 %v405_v19, %v404_v15  ;;  %v377_v26 = vrot.slane %v376_v20, 2  ;;  %v284_v27 = vsub.f32 %v2597_v42, %v262_v21  ;;  %v271_v52 = vsub.f32 %v2594_v35, %v171_v41 }
  0xa6   :  { %v2624_v28 = vpop.eup %2230  ;;  %v392_v29 = vadd.f32 %v391_v22, %v390_v17  ;;  %v409_v30 = vsel %vm4583_vm1, %v2621_v24, 0.0 }
  0xa7   :  { %v407_v32 = vrot.slane %v406_v25, 1  ;;  %v378_v33 = vadd.f32 %v377_v26, %v376_v20  ;;  %v410_v34 = vrot.slane %v409_v30, 4  ;;  %v395_v36 = vsel %vm4583_vm1, %v2624_v28, 0.0 }
  0xa8   :  { %v2630_v37 = vpop.eup %2232  ;;  %v393_v38 = vrot.slane %v392_v29, 1  ;;  %v396_v39 = vrot.slane %v395_v36, 4  ;;  %v314_v40 = vmul.f32 1.442695, %v284_v27  ;;  %v288_v0 = vmul.f32 1.442695, %v271_v52 }
  0xa9   :  { %v408_v42 = vadd.f32 %v407_v32, %v406_v25  ;;  %v379_v43 = vrot.slane %v378_v33, 1  ;;  %v411_v44 = vadd.f32 %v410_v34, %v409_v30  ;;  %v381_v45 = vsel %vm4583_vm1, %v2630_v37, 0.0 }
  0xaa   :  { %v2634_v46 = vadd.f32 %v393_v38, %v392_v29  ;;  %v397_v47 = vadd.f32 %v396_v39, %v395_v36  ;;  %v382_v48 = vrot.slane %v381_v45, 4  ;;  %2234 = vpow2.f32 %v314_v40 }
  0xab   :  { %2236 = vrcp.f32 %v408_v42  ;;  %v2637_v50 = vadd.f32 %v379_v43, %v378_v33  ;;  %v412_v51 = vrot.slane %v411_v44, 2  ;;  %vm615_vm2 = vweird.f32 %v408_v42 }
  0xac   :  { %2238 = vrcp.f32 %v2634_v46  ;;  %v398_v54 = vrot.slane %v397_v47, 2  ;;  %v383_v55 = vadd.f32 %v382_v48, %v381_v45  ;;  %v619_v63 = vand.u32 2147483647, %v408_v42 }
  0xad   :  { %2240 = vrcp.f32 %v2637_v50  ;;  %v413_v58 = vadd.f32 %v412_v51, %v411_v44  ;;  %v621_v8 = vand.u32 2147483648, %v408_v42  ;;  %vm585_vm3 = vweird.f32 %v2634_v46 }
  0xae   :  { %v399_v59 = vadd.f32 %v398_v54, %v397_v47  ;;  %v384_v60 = vrot.slane %v383_v55, 2  ;;  %v591_v13 = vand.u32 2147483648, %v2634_v46  ;;  %v589_v17 = vand.u32 2147483647, %v2634_v46 }
  0xaf   :  { %v414_v5 = vrot.slane %v413_v58, 1  ;;  %vm2657_vm5 = vcmp.eq.f32.partialorder %v619_v63, 8.507059e+37  ;;  %v622_v23 = vor.u32 1.1754944e-38, %v621_v8  ;;  %v559_v31 = vand.u32 2147483647, %v2637_v50 }
  0xb0   :  { %v2641_v57 = vpop.eup %2234  ;;  %v400_v35 = vrot.slane %v399_v59, 1  ;;  %v385_v10 = vadd.f32 %v384_v60, %v383_v55  ;;  %v592_v27 = vor.u32 1.1754944e-38, %v591_v13  ;;  %v561_v32 = vand.u32 2147483648, %v2637_v50 }
  0xb1   :  { %v2237_v61 = vpop.eup %2236  ;;  %v416_v6 = vsel %vm4583_vm1, %v2641_v57, 0.0  ;;  %v2650_v14 = vadd.f32 %v414_v5, %v413_v58  ;;  %vm590_vm10 = vcmp.eq.f32.partialorder %v589_v17, 8.507059e+37  ;;  %vm555_vm11 = vweird.f32 %v2637_v50 }
  0xb2   :  { %v2239_v3 = vpop.eup %2238  ;;  %v611_v4 = vmul.f32 %v2237_v61, %v408_v42  ;;  %v2652_v15 = vadd.f32 %v400_v35, %v399_v59  ;;  %vm616_vm4 = vweird.f32 %v2237_v61  ;;  %v417_v18 = vrot.slane %v416_v6, 4 }
  0xb3   :  { %v581_v9 = vmul.f32 %v2239_v3, %v2634_v46  ;;  %v2241_v11 = vpop.eup %2240  ;;  %2242 = vrcp.f32 %v2650_v14  ;;  %v386_v21 = vrot.slane %v385_v10, 1  ;;  %vm586_vm6 = vweird.f32 %v2239_v3  ;;  %vm617_vm7 = vmor %vm615_vm2, %vm616_vm4 }
  0xb4   :  { %v612_v12 = vsub.f32 1.0, %v611_v4  ;;  %v551_v20 = vmul.f32 %v2241_v11, %v2637_v50  ;;  %2244 = vrcp.f32 %v2652_v15  ;;  %v418_v33 = vadd.f32 %v417_v18, %v416_v6  ;;  %vm587_vm8 = vmor %vm585_vm3, %vm586_vm6 }
  0xb5   :  { %v582_v16 = vsub.f32 1.0, %v581_v9  ;;  %vm556_vm9 = vweird.f32 %v2241_v11  ;;  %v2668_v38 = vadd.f32 %v386_v21, %v385_v10  ;;  %2246 = vpow2.f32 %v288_v0 }
  0xb6   :  { %v613_v19 = vmul.f32 %v2237_v61, %v612_v12  ;;  %v552_v29 = vsub.f32 1.0, %v551_v20  ;;  %vm557_vm12 = vmor %vm555_vm11, %vm556_vm9  ;;  %v562_v44 = vor.u32 1.1754944e-38, %v561_v32  ;;  %v163_v46 = vrot.slane %v2643_v1, 1 }
  0xb7   :  { %v583_v25 = vmul.f32 %v2239_v3, %v582_v16  ;;  %2248 = vrcp.f32 %v2668_v38  ;;  %vm560_vm13 = vcmp.eq.f32.partialorder %v559_v31, 8.507059e+37  ;;  %v419_v52 = vrot.slane %v418_v33, 2 }
  0xb8   :  { %v614_v26 = vadd.f32 %v2237_v61, %v613_v19  ;;  %v553_v36 = vmul.f32 %v2241_v11, %v552_v29  ;;  %v164_v0 = vmax.f32 %v2643_v1, %v163_v46  ;;  %v636_v6 = vand.u32 2147483648, %v2650_v14 }
  0xb9   :  { %v584_v30 = vadd.f32 %v2239_v3, %v583_v25  ;;  %v2672_v41 = vpop.eup %2242  ;;  %v420_v63 = vadd.f32 %v419_v52, %v418_v33  ;;  %vm630_vm15 = vweird.f32 %v2650_v14  ;;  %v634_v20 = vand.u32 2147483647, %v2650_v14 }
  0xba   :  { %v618_v34 = vsel %vm617_vm7, %v2237_v61, %v614_v26  ;;  %v554_v43 = vadd.f32 %v2241_v11, %v553_v36  ;;  %v626_v45 = vmul.f32 %v2672_v41, %v2650_v14  ;;  %v2679_v47 = vpop.eup %2244  ;;  %v270_v13 = vsub.f32 %v2604_v56, %v164_v0 }
  0xbb   :  { %v623_v39 = vsel %vm2657_vm5, %v622_v23, %v618_v34  ;;  %v588_v40 = vsel %vm587_vm8, %v2239_v3, %v584_v30  ;;  %v596_v58 = vmul.f32 %v2679_v47, %v2652_v15  ;;  %v2686_v59 = vpop.eup %2246  ;;  %v421_v8 = vrot.slane %v420_v63, 1 }
  0xbc   :  { %v593_v42 = vsel %vm590_vm10, %v592_v27, %v588_v40  ;;  %v624_v48 = vmul.f32 %v2606_v62, %v623_v39  ;;  %v558_v51 = vsel %vm557_vm12, %v2241_v11, %v554_v43  ;;  %v627_v50 = vsub.f32 1.0, %v626_v45 }
  0xbd   :  { %v594_v53 = vmul.f32 %v2608_v2, %v593_v42  ;;  %v563_v54 = vsel %vm560_vm13, %v562_v44, %v558_v51  ;;  %v2249_v62 = vpop.eup %2248  ;;  %v597_v2 = vsub.f32 1.0, %v596_v58  ;;  %vm631_vm14 = vweird.f32 %v2672_v41 }
  0xbe   :  { %v564_v55 = vmul.f32 %v2615_v7, %v563_v54  ;;  %v2181_v60 = vadd.f32 -0.25, %v624_v48  ;;  %v628_v4 = vmul.f32 %v2672_v41, %v627_v50  ;;  %v566_v35 = vmul.f32 %v2249_v62, %v2668_v38  ;;  %vm2702_vm3 = vmor %vm630_vm15, %vm631_vm14 }
  0xbf   :  { %v2179_v3 = vadd.f32 -0.25, %v594_v53  ;;  %v325_v7 = vsel %vm4583_vm1, %v2686_v59, 0.0  ;;  %v598_v17 = vmul.f32 %v2679_v47, %v597_v2  ;;  %v2698_v19 = vadd.f32 %v421_v8, %v420_v63  ;;  %v139_v2 = vpop.xlane.xlu0 %138 }
  0xc0   :  { %v2177_v61 = vadd.f32 -0.25, %v564_v55  ;;  %v2197_v9 = vmul.f32 -10.0, %v2181_v60  ;;  %v567_v12 = vsub.f32 1.0, %v566_v35  ;;  %v629_v11 = vadd.f32 %v2672_v41, %v628_v4 }
  0xc1   :  { %v2195_v1 = vmul.f32 -10.0, %v2179_v3  ;;  %v326_v16 = vrot.slane %v325_v7, 4  ;;  %v637_v21 = vor.u32 1.1754944e-38, %v636_v6  ;;  %vm571_vm2 = vweird.f32 %v2249_v62 }
  0xc2   :  { %v2193_v5 = vmul.f32 -10.0, %v2177_v61  ;;  %v568_v18 = vmul.f32 %v2249_v62, %v567_v12  ;;  %v742_v22 = vmul.f32 1.442695, %v2197_v9  ;;  %vm570_vm4 = vweird.f32 %v2668_v38 }
  0xc3   :  { %v576_v25 = vand.u32 2147483648, %v2668_v38  ;;  %v633_v26 = vsel %vm2702_vm3, %v2672_v41, %v629_v11  ;;  %v574_v27 = vand.u32 2147483647, %v2668_v38  ;;  %v327_v29 = vadd.f32 %v326_v16, %v325_v7  ;;  %vm2714_vm6 = vmor %vm570_vm4, %vm571_vm2 }
  0xc4   :  { %v734_v10 = vmul.f32 1.442695, %v2193_v5  ;;  %v569_v23 = vadd.f32 %v2249_v62, %v568_v18  ;;  %v286_v14 = vmul.f32 1.442695, %v270_v13  ;;  %v738_v30 = vmul.f32 1.442695, %v2195_v1 }
  0xc5   :  { %v599_v31 = vadd.f32 %v2679_v47, %v598_v17  ;;  %vm601_vm5 = vweird.f32 %v2679_v47  ;;  %vm635_vm7 = vcmp.eq.f32.partialorder %v634_v20, 8.507059e+37  ;;  %vm600_vm8 = vweird.f32 %v2652_v15 }
  0xc6   :  { %2250 = vpow2.f32 %v734_v10  ;;  %v606_v33 = vand.u32 2147483648, %v2652_v15  ;;  %v573_v34 = vsel %vm2714_vm6, %v2249_v62, %v569_v23  ;;  %v638_v38 = vsel %vm635_vm7, %v637_v21, %v633_v26  ;;  %vm602_vm9 = vmor %vm600_vm8, %vm601_vm5 }
  0xc7   :  { %2252 = vrcp.f32 %v2698_v19  ;;  %v604_v39 = vand.u32 2147483647, %v2652_v15  ;;  %v577_v40 = vor.u32 1.1754944e-38, %v576_v25  ;;  %vm575_vm10 = vcmp.eq.f32.partialorder %v574_v27, 8.507059e+37 }
  0xc8   :  { %2254 = vpow2.f32 %v742_v22  ;;  %v328_v41 = vrot.slane %v327_v29, 2  ;;  %v603_v43 = vsel %vm602_vm9, %v2679_v47, %v599_v31  ;;  %v639_v45 = vmul.f32 %v2621_v24, %v638_v38 }
  0xc9   :  { %2256 = vpow2.f32 %v286_v14  ;;  %v578_v44 = vsel %vm575_vm10, %v577_v40, %v573_v34  ;;  %v607_v46 = vor.u32 1.1754944e-38, %v606_v33  ;;  %vm605_vm11 = vcmp.eq.f32.partialorder %v604_v39, 8.507059e+37 }
  0xca   :  { %2258 = vpow2.f32 %v738_v30  ;;  %v579_v51 = vmul.f32 %v2630_v37, %v578_v44  ;;  %v329_v52 = vadd.f32 %v328_v41, %v327_v29  ;;  %v2182_v55 = vadd.f32 -0.25, %v639_v45 }
  0xcb   :  { %v608_v15 = vsel %vm605_vm11, %v607_v46, %v603_v43  ;;  %v651_v6 = vand.u32 2147483648, %v2698_v19  ;;  %v2753_v10 = vadd.f32 %v2576_v49, %v139_v2  ;;  %vm645_vm12 = vweird.f32 %v2698_v19  ;;  %v103_v46 = vpop.xlane.xlu2 %102 }
  0xcc   :  { %v2251_v36 = vpop.eup %2250  ;;  %v2178_v54 = vadd.f32 -0.25, %v579_v51  ;;  %v330_v58 = vrot.slane %v329_v52, 1  ;;  %v609_v60 = vmul.f32 %v2624_v28, %v608_v15  ;;  %v2198_v4 = vmul.f32 -10.0, %v2182_v55 }
  0xcd   :  { %v2724_v42 = vadd.f32 1.0, %v2251_v36  ;;  %v2728_v48 = vpop.eup %2252  ;;  %v649_v28 = vand.u32 2147483647, %v2698_v19  ;;  %v652_v21 = vor.u32 1.1754944e-38, %v651_v6  ;;  %v263_v27 = vsel %vm4583_vm1, %v2753_v10, -inf }
  0xce   :  { %v2255_v53 = vpop.eup %2254  ;;  %v641_v47 = vmul.f32 %v2728_v48, %v2698_v19  ;;  %v2194_v61 = vmul.f32 -10.0, %v2178_v54  ;;  %v2737_v63 = vadd.f32 %v330_v58, %v329_v52  ;;  %v2180_v7 = vadd.f32 -0.25, %v609_v60 }
  0xcf   :  { %2260 = vrcp.f32 %v2724_v42  ;;  %v2732_v50 = vpop.eup %2256  ;;  %v2739_v37 = vadd.f32 1.0, %v2255_v53  ;;  %v744_v13 = vmul.f32 1.442695, %v2198_v4  ;;  %vm2762_vm13 = vcmp.eq.f32.partialorder %v649_v28, 8.507059e+37 }
  0xd0   :  { %v2259_v24 = vpop.eup %2258  ;;  %v736_v0 = vmul.f32 1.442695, %v2194_v61  ;;  %v318_v62 = vsel %vm4583_vm1, %v2732_v50, 0.0  ;;  %v642_v5 = vsub.f32 1.0, %v641_v47  ;;  %2262 = vrcp.f32 %v2737_v63 }
  0xd1   :  { %v2743_v3 = vadd.f32 1.0, %v2259_v24  ;;  %v319_v8 = vrot.slane %v318_v62, 4  ;;  %v957_v9 = vand.u32 2147483648, %v2739_v37  ;;  %v2196_v16 = vmul.f32 -10.0, %v2180_v7 }
  0xd2   :  { %2264 = vpow2.f32 %v736_v0  ;;  %v643_v1 = vmul.f32 %v2728_v48, %v642_v5  ;;  %vm646_vm14 = vweird.f32 %v2728_v48  ;;  %v895_v32 = vand.u32 2147483647, %v2724_v42 }
  0xd3   :  { %2266 = vrcp.f32 %v2739_v37  ;;  %v927_v11 = vand.u32 2147483648, %v2743_v3  ;;  %v320_v22 = vadd.f32 %v319_v8, %v318_v62  ;;  %v2766_v23 = vor.u32 1.1754944e-38, %v957_v9  ;;  %vm2787_vm2 = vmor %vm645_vm12, %vm646_vm14  ;;  %v106_v8 = vpop.xlane.xlu0 %105 }
  0xd4   :  { %2268 = vrcp.f32 %v2743_v3  ;;  %v644_v14 = vadd.f32 %v2728_v48, %v643_v1  ;;  %v740_v33 = vmul.f32 1.442695, %v2196_v16  ;;  %v456_v39 = vand.u32 2147483648, %v2737_v63 }
  0xd5   :  { %v2746_v35 = vpop.eup %2260  ;;  %2270 = vpow2.f32 %v744_v13  ;;  %v2776_v31 = vor.u32 1.1754944e-38, %v927_v11  ;;  %v321_v40 = vrot.slane %v320_v22, 2  ;;  %v264_v41 = vrot.slane %v263_v27, 4 }
  0xd6   :  { %v887_v12 = vmul.f32 %v2746_v35, %v2724_v42  ;;  %v2263_v17 = vpop.eup %2262  ;;  %vm891_vm15 = vweird.f32 %v2724_v42  ;;  %v454_v45 = vand.u32 2147483647, %v2737_v63  ;;  %v897_v52 = vand.u32 2147483648, %v2724_v42 }
  0xd7   :  { %v446_v26 = vmul.f32 %v2263_v17, %v2737_v63  ;;  %vm451_vm3 = vweird.f32 %v2263_v17  ;;  %v648_v19 = vsel %vm2787_vm2, %v2728_v48, %v644_v14  ;;  %2272 = vpow2.f32 %v740_v33  ;;  %v112_v14 = vpop.xlane.xlu2 %111 }
  0xd8   :  { %v2265_v56 = vpop.eup %2264  ;;  %v888_v29 = vsub.f32 1.0, %v887_v12  ;;  %vm450_vm4 = vweird.f32 %v2737_v63  ;;  %vm2804_vm5 = vcmp.eq.f32.partialorder %v895_v32, 8.507059e+37  ;;  %v457_v58 = vor.u32 1.1754944e-38, %v456_v39  ;;  %v100_v63 = vpop.xlane.xlu1 %99 }
  0xd9   :  { %v2774_v30 = vpop.eup %2266  ;;  %v447_v34 = vsub.f32 1.0, %v446_v26  ;;  %v2781_v38 = vadd.f32 1.0, %v2265_v56  ;;  %vm452_vm6 = vmor %vm450_vm4, %vm451_vm3  ;;  %v322_v24 = vadd.f32 %v321_v40, %v320_v22  ;;  %v265_v60 = vmax.f32 %v263_v27, %v264_v41 }
  0xda   :  { %v2779_v36 = vpop.eup %2268  ;;  %v2794_v51 = vmul.f32 %v2774_v30, %v2739_v37  ;;  %v889_v15 = vmul.f32 %v2746_v35, %v888_v29  ;;  %v653_v48 = vsel %vm2762_vm13, %v652_v21, %v648_v19  ;;  %vm455_vm7 = vcmp.eq.f32.partialorder %v454_v45, 8.507059e+37 }
  0xdb   :  { %v448_v44 = vmul.f32 %v2263_v17, %v447_v34  ;;  %v917_v53 = vmul.f32 %v2779_v36, %v2743_v3  ;;  %v2271_v55 = vpop.eup %2270  ;;  %2274 = vrcp.f32 %v2781_v38  ;;  %v2812_v0 = vadd.f32 %v2576_v49, %v103_v46 }
  0xdc   :  { %v890_v62 = vadd.f32 %v2746_v35, %v889_v15  ;;  %vm892_vm8 = vweird.f32 %v2746_v35  ;;  %v323_v5 = vrot.slane %v322_v24, 1  ;;  %v2816_v7 = vadd.f32 1.0, %v2271_v55 }
  0xdd   :  { %v449_v54 = vadd.f32 %v2263_v17, %v448_v44  ;;  %v918_v2 = vsub.f32 1.0, %v917_v53  ;;  %v266_v6 = vrot.slane %v265_v60, 2  ;;  %v654_v9 = vmul.f32 %v2641_v57, %v653_v48  ;;  %v2273_v11 = vpop.eup %2272  ;;  %vm2829_vm9 = vmor %vm891_vm15, %vm892_vm8 }
  0xde   :  { %v2820_v12 = vadd.f32 %v323_v5, %v322_v24  ;;  %v179_v13 = vsel %vm4583_vm1, %v2812_v0, -inf  ;;  %v2825_v1 = vadd.f32 %v2576_v49, %v100_v63  ;;  %v948_v22 = vsub.f32 1.0, %v2794_v51 }
  0xdf   :  { %v453_v61 = vsel %vm452_vm6, %v2263_v17, %v449_v54  ;;  %v267_v20 = vmax.f32 %v265_v60, %v266_v6  ;;  %v180_v21 = vrot.slane %v179_v13, 4  ;;  %v894_v56 = vsel %vm2829_vm9, %v2746_v35, %v890_v62 }
  0xe0   :  { %v458_v4 = vsel %vm455_vm7, %v457_v58, %v453_v61  ;;  %2276 = vrcp.f32 %v2820_v12  ;;  %v2841_v42 = vadd.f32 %v2576_v49, %v106_v8  ;;  %v919_v26 = vmul.f32 %v2779_v36, %v918_v2  ;;  %v109_v2 = vpop.xlane.xlu1 %108 }
  0xe1   :  { %v459_v28 = vmul.f32 %v2686_v59, %v458_v4  ;;  %v898_v59 = vor.u32 1.1754944e-38, %v897_v52  ;;  %v2833_v57 = vpop.eup %2274  ;;  %2278 = vrcp.f32 %v2816_v7  ;;  %v268_v29 = vrot.slane %v267_v20, 1 }
  0xe2   :  { %v2845_v32 = vadd.f32 1.0, %v2273_v11  ;;  %v2183_v33 = vadd.f32 -0.25, %v654_v9  ;;  %v181_v34 = vmax.f32 %v179_v13, %v180_v21  ;;  %v172_v39 = vsel %vm4583_vm1, %v2825_v1, -inf }
  0xe3   :  { %v2170_v17 = vadd.f32 -0.25, %v459_v28  ;;  %v2851_v35 = vsel %vm2804_vm5, %v898_v59, %v894_v56  ;;  %v902_v40 = vmul.f32 %v2833_v57, %v2781_v38  ;;  %v269_v43 = vmax.f32 %v267_v20, %v268_v29 }
  0xe4   :  { %v182_v44 = vrot.slane %v181_v34, 2  ;;  %v173_v45 = vrot.slane %v172_v39, 4  ;;  %v186_v46 = vsel %vm4583_vm1, %v2841_v42, -inf  ;;  %v2858_v15 = vadd.f32 %v2576_v49, %v112_v14 }
  0xe5   :  { %v2186_v27 = vmul.f32 -10.0, %v2170_v17  ;;  %v2861_v52 = vadd.f32 %v2779_v36, %v919_v26  ;;  %v285_v19 = vsub.f32 %v2753_v10, %v269_v43  ;;  %v187_v53 = vrot.slane %v186_v46, 4 }
  0xe6   :  { %v2277_v54 = vpop.eup %2276  ;;  %v183_v55 = vmax.f32 %v181_v34, %v182_v44  ;;  %v174_v47 = vmax.f32 %v172_v39, %v173_v45  ;;  %v200_v58 = vsel %vm4583_vm1, %v2858_v15, -inf  ;;  %v2871_v60 = vsel %vm4583_vm1, %v2851_v35, 0.0 }
  0xe7   :  { %v720_v41 = vmul.f32 1.442695, %v2186_v27  ;;  %v2867_v24 = vpop.eup %2278  ;;  %v2199_v48 = vmul.f32 -10.0, %v2183_v33  ;;  %v431_v61 = vmul.f32 %v2277_v54, %v2820_v12  ;;  %v316_v63 = vmul.f32 1.442695, %v285_v19 }
  0xe8   :  { %v903_v10 = vsub.f32 1.0, %v902_v40  ;;  %v184_v62 = vrot.slane %v183_v55, 1  ;;  %v175_v4 = vrot.slane %v174_v47, 2  ;;  %v188_v5 = vmax.f32 %v186_v46, %v187_v53 }
  0xe9   :  { %2280 = vpow2.f32 %v720_v41  ;;  %v432_v28 = vsub.f32 1.0, %v431_v61  ;;  %v439_v6 = vand.u32 2147483647, %v2820_v12  ;;  %v201_v8 = vrot.slane %v200_v58, 4 }
  0xea   :  { %2282 = vrcp.f32 %v2845_v32  ;;  %v441_v9 = vand.u32 2147483648, %v2820_v12  ;;  %v185_v13 = vmax.f32 %v183_v55, %v184_v62  ;;  %v176_v11 = vmax.f32 %v174_v47, %v175_v4 }
  0xeb   :  { %2284 = vpow2.f32 %v316_v63  ;;  %v189_v16 = vrot.slane %v188_v5, 2  ;;  %v433_v17 = vmul.f32 %v2277_v54, %v432_v28  ;;  %vm436_vm10 = vweird.f32 %v2277_v54 }
  0xec   :  { %v202_v20 = vmax.f32 %v200_v58, %v201_v8  ;;  %v2877_v21 = vadd.f32 %v2576_v49, %v109_v2  ;;  %v1207_v26 = vrot.slane %v2871_v60, 4  ;;  %v273_v29 = vsub.f32 %v2812_v0, %v185_v13 }
  0xed   :  { %v177_v14 = vrot.slane %v176_v11, 1  ;;  %v904_v33 = vmul.f32 %v2833_v57, %v903_v10  ;;  %vm906_vm11 = vweird.f32 %v2781_v38  ;;  %v434_v34 = vadd.f32 %v2277_v54, %v433_v17 }
  0xee   :  { %vm435_vm12 = vweird.f32 %v2820_v12  ;;  %vm440_vm13 = vcmp.eq.f32.partialorder %v439_v6, 8.507059e+37  ;;  %v442_v39 = vor.u32 1.1754944e-38, %v441_v9  ;;  %v190_v40 = vmax.f32 %v188_v5, %v189_v16  ;;  %v115_v16 = vpop.xlane.xlu0 %114 }
  0xef   :  { %v2281_v59 = vpop.eup %2280  ;;  %vm437_vm14 = vmor %vm435_vm12, %vm436_vm10  ;;  %v203_v41 = vrot.slane %v202_v20, 2  ;;  %v292_v45 = vmul.f32 1.442695, %v273_v29  ;;  %v178_v0 = vmax.f32 %v176_v11, %v177_v14  ;;  %v193_v46 = vsel %vm4583_vm1, %v2877_v21, -inf }
  0xf0   :  { %v2879_v56 = vpop.eup %2282  ;;  %v2882_v27 = vadd.f32 1.0, %v2281_v59  ;;  %v438_v44 = vsel %vm437_vm14, %v2277_v54, %v434_v34  ;;  %vm922_vm15 = vweird.f32 %v2779_v36  ;;  %v910_v19 = vand.u32 2147483647, %v2781_v38 }
  0xf1   :  { %v2889_v43 = vpop.eup %2284  ;;  %v912_v12 = vand.u32 2147483648, %v2781_v38  ;;  %v443_v53 = vsel %vm440_vm13, %v442_v39, %v438_v44  ;;  %v746_v47 = vmul.f32 1.442695, %v2199_v48  ;;  %vm921_vm2 = vweird.f32 %v2743_v3 }
  0xf2   :  { %2286 = vrcp.f32 %v2882_v27  ;;  %v423_v55 = vsel %vm4583_vm1, %v2889_v43, 0.0  ;;  %v444_v58 = vmul.f32 %v2732_v50, %v443_v53  ;;  %v272_v54 = vsub.f32 %v2825_v1, %v178_v0  ;;  %vm2936_vm6 = vmor %vm921_vm2, %vm922_vm15 }
  0xf3   :  { %v424_v61 = vrot.slane %v423_v55, 4  ;;  %2288 = vpow2.f32 %v292_v45  ;;  %v191_v63 = vrot.slane %v190_v40, 1  ;;  %v204_v10 = vmax.f32 %v202_v20, %v203_v41 }
  0xf4   :  { %v194_v62 = vrot.slane %v193_v46, 4  ;;  %v905_v4 = vadd.f32 %v2833_v57, %v904_v33  ;;  %vm907_vm3 = vweird.f32 %v2833_v57  ;;  %v2169_v5 = vadd.f32 -0.25, %v444_v58 }
  0xf5   :  { %v425_v2 = vadd.f32 %v424_v61, %v423_v55  ;;  %v290_v48 = vmul.f32 1.442695, %v272_v54  ;;  %v192_v6 = vmax.f32 %v190_v40, %v191_v63  ;;  %v205_v50 = vrot.slane %v204_v10, 1  ;;  %vm2914_vm4 = vmor %vm906_vm11, %vm907_vm3 }
  0xf6   :  { %v195_v8 = vmax.f32 %v193_v46, %v194_v62  ;;  %v2906_v9 = vadd.f32 %v1207_v26, %v2871_v60  ;;  %v2910_v1 = vmul.f32 %v2879_v56, %v2845_v32  ;;  %v2185_v13 = vmul.f32 -10.0, %v2169_v5 }
  0xf7   :  { %v426_v11 = vrot.slane %v425_v2, 2  ;;  %2290 = vpow2.f32 %v290_v48  ;;  %v274_v17 = vsub.f32 %v2841_v42, %v192_v6  ;;  %v206_v20 = vmax.f32 %v204_v10, %v205_v50 }
  0xf8   :  { %v2903_v28 = vpop.eup %2286  ;;  %v196_v29 = vrot.slane %v195_v8, 2  ;;  %v909_v26 = vsel %vm2914_vm4, %v2833_v57, %v905_v4  ;;  %v718_v33 = vmul.f32 1.442695, %v2185_v13  ;;  %v2929_v42 = vadd.f32 %v2576_v49, %v115_v16 }
  0xf9   :  { %v2919_v60 = vpop.eup %2288  ;;  %v782_v14 = vmul.f32 %v2903_v28, %v2882_v27  ;;  %v427_v38 = vadd.f32 %v426_v11, %v425_v2  ;;  %v294_v39 = vmul.f32 1.442695, %v274_v17  ;;  %v276_v45 = vsub.f32 %v2858_v15, %v206_v20 }
  0xfa   :  { %v339_v34 = vsel %vm4583_vm1, %v2919_v60, 0.0  ;;  %v197_v40 = vmax.f32 %v195_v8, %v196_v29  ;;  %2292 = vpow2.f32 %v718_v33  ;;  %vm911_vm5 = vcmp.eq.f32.partialorder %v910_v19, 8.507059e+37 }
  0xfb   :  { %v428_v41 = vrot.slane %v427_v38, 1  ;;  %v340_v44 = vrot.slane %v339_v34, 4  ;;  %v913_v57 = vor.u32 1.1754944e-38, %v912_v12  ;;  %2294 = vpow2.f32 %v294_v39 }
  0xfc   :  { %v198_v0 = vrot.slane %v197_v40, 1  ;;  %2296 = vpow2.f32 %v746_v47  ;;  %v783_v49 = vsub.f32 1.0, %v782_v14  ;;  %v2947_v15 = vmul.f32 %v2774_v30, %v948_v22 }
  0xfd   :  { %v2940_v53 = vadd.f32 %v428_v41, %v427_v38  ;;  %v341_v55 = vadd.f32 %v340_v44, %v339_v34  ;;  %v2942_v58 = vpop.eup %2290  ;;  %v2954_v61 = vsel %vm911_vm5, %v913_v57, %v909_v26  ;;  %v298_v47 = vmul.f32 1.442695, %v276_v45 }
  0xfe   :  { %v199_v54 = vmax.f32 %v197_v40, %v198_v0  ;;  %v207_v63 = vsel %vm4583_vm1, %v2929_v42, -inf  ;;  %v2961_v51 = vmul.f32 %v2867_v24, %v2816_v7  ;;  %v332_v62 = vsel %vm4583_vm1, %v2942_v58, 0.0 }
  0xff   :  { %2298 = vrcp.f32 %v2940_v53  ;;  %v342_v10 = vrot.slane %v341_v55, 2  ;;  %v1209_v5 = vrot.slane %v2906_v9, 2  ;;  %v784_v48 = vmul.f32 %v2903_v28, %v783_v49 }
 0x100   :  { %v2293_v4 = vpop.eup %2292  ;;  %v333_v6 = vrot.slane %v332_v62, 4  ;;  %v1213_v8 = vsel %vm4583_vm1, %v2954_v61, 0.0  ;;  %v208_v16 = vrot.slane %v207_v63, 4  ;;  %2300 = vpow2.f32 %v298_v47 }
 0x101   :  { %v2969_v50 = vpop.eup %2294  ;;  %v2973_v13 = vadd.f32 1.0, %v2293_v4  ;;  %v343_v11 = vadd.f32 %v342_v10, %v341_v55  ;;  %v275_v29 = vsub.f32 %v2877_v21, %v199_v54  ;;  %vm787_vm7 = vweird.f32 %v2903_v28 }
 0x102   :  { %v2297_v59 = vpop.eup %2296  ;;  %v334_v17 = vadd.f32 %v333_v6, %v332_v62  ;;  %v346_v20 = vsel %vm4583_vm1, %v2969_v50, 0.0  ;;  %v790_v26 = vand.u32 2147483647, %v2882_v27  ;;  %v792_v14 = vand.u32 2147483648, %v2882_v27 }
 0x103   :  { %2302 = vrcp.f32 %v2973_v13  ;;  %v785_v38 = vadd.f32 %v2903_v28, %v784_v48  ;;  %v344_v34 = vrot.slane %v343_v11, 1  ;;  %v347_v40 = vrot.slane %v346_v20, 4 }
 0x104   :  { %v335_v39 = vrot.slane %v334_v17, 2  ;;  %v2983_v41 = vadd.f32 1.0, %v2297_v59  ;;  %vm786_vm8 = vweird.f32 %v2882_v27  ;;  %v209_v44 = vmax.f32 %v207_v63, %v208_v16 }
 0x105   :  { %v2299_v33 = vpop.eup %2298  ;;  %v2987_v45 = vadd.f32 %v344_v34, %v343_v11  ;;  %v348_v0 = vadd.f32 %v347_v40, %v346_v20  ;;  %v296_v49 = vmul.f32 1.442695, %v275_v29  ;;  %v1214_v55 = vrot.slane %v1213_v8, 4  ;;  %vm2991_vm9 = vmor %vm786_vm8, %vm787_vm7 }
 0x106   :  { %v656_v21 = vmul.f32 %v2299_v33, %v2940_v53  ;;  %v336_v57 = vadd.f32 %v335_v39, %v334_v17  ;;  %vm2995_vm10 = vcmp.eq.f32.partialorder %v790_v26, 8.507059e+37  ;;  %v793_v27 = vor.u32 1.1754944e-38, %v792_v14  ;;  %v2999_v62 = vpop.eup %2300 }
 0x107   :  { %v789_v63 = vsel %vm2991_vm9, %v2903_v28, %v785_v38  ;;  %v664_v4 = vand.u32 2147483647, %v2940_v53  ;;  %v666_v48 = vand.u32 2147483648, %v2940_v53  ;;  %2304 = vrcp.f32 %v2987_v45 }
 0x108   :  { %v657_v10 = vsub.f32 1.0, %v656_v21  ;;  %vm661_vm11 = vweird.f32 %v2299_v33  ;;  %v337_v16 = vrot.slane %v336_v57, 1  ;;  %v349_v59 = vrot.slane %v348_v0, 2 }
 0x109   :  { %v3007_v6 = vpop.eup %2302  ;;  %vm660_vm12 = vweird.f32 %v2940_v53  ;;  %2306 = vpow2.f32 %v296_v49  ;;  %v210_v20 = vrot.slane %v209_v44, 2  ;;  %v360_v14 = vsel %vm4583_vm1, %v2999_v62, 0.0 }
 0x10a   :  { %v658_v11 = vmul.f32 %v2299_v33, %v657_v10  ;;  %v767_v17 = vmul.f32 %v3007_v6, %v2973_v13  ;;  %v3012_v29 = vadd.f32 %v337_v16, %v336_v57  ;;  %v350_v26 = vadd.f32 %v349_v59, %v348_v0  ;;  %vm662_vm13 = vmor %vm660_vm12, %vm661_vm11 }
 0x10b   :  { %v3016_v38 = vadd.f32 %v1214_v55, %v1213_v8  ;;  %2308 = vrcp.f32 %v2983_v41  ;;  %v3021_v34 = vsel %vm2995_vm10, %v793_v27, %v789_v63  ;;  %v667_v39 = vor.u32 1.1754944e-38, %v666_v48 }
 0x10c   :  { %v659_v28 = vadd.f32 %v2299_v33, %v658_v11  ;;  %4615 = vst [vmem:[#allocation12_spill] sm:$0xff] %v3021_v34  ;;  %v768_v53 = vsub.f32 1.0, %v767_v17  ;;  %vm665_vm14 = vcmp.eq.f32.partialorder %v664_v4, 8.507059e+37  ;;  %2310 = vrcp.f32 %v3012_v29 }
 0x10d   :  { %v2305_v21 = vpop.eup %2304  ;;  %v351_v0 = vrot.slane %v350_v26, 1  ;;  %v361_v49 = vrot.slane %v360_v14, 4  ;;  %v211_v47 = vmax.f32 %v209_v44, %v210_v20  ;;  %vm771_vm15 = vweird.f32 %v2973_v13 }
 0x10e   :  { %v663_v40 = vsel %vm662_vm13, %v2299_v33, %v659_v28  ;;  %v775_v8 = vand.u32 2147483647, %v2973_v13  ;;  %v476_v54 = vmul.f32 %v2305_v21, %v2987_v45  ;;  %v777_v33 = vand.u32 2147483648, %v2973_v13 }
 0x10f   :  { %v668_v57 = vsel %vm665_vm14, %v667_v39, %v663_v40  ;;  %v3028_v27 = vpop.eup %2306  ;;  %v484_v10 = vand.u32 2147483647, %v2987_v45  ;;  %v486_v63 = vand.u32 2147483648, %v2987_v45  ;;  %v3033_v4 = vadd.f32 %v351_v0, %v350_v26 }
 0x110   :  { %v669_v55 = vmul.f32 %v2889_v43, %v668_v57  ;;  %v769_v44 = vmul.f32 %v3007_v6, %v768_v53  ;;  %v477_v11 = vsub.f32 1.0, %v476_v54  ;;  %vm480_vm2 = vweird.f32 %v2987_v45 }
 0x111   :  { %v3037_v16 = vpop.eup %2308  ;;  %v469_v43 = vand.u32 2147483647, %v3012_v29  ;;  %2312 = vrcp.f32 %v3033_v4  ;;  %v362_v59 = vadd.f32 %v361_v49, %v360_v14  ;;  %v212_v17 = vrot.slane %v211_v47, 1 }
 0x112   :  { %v2184_v48 = vadd.f32 -0.25, %v669_v55  ;;  %v2311_v20 = vpop.eup %2310  ;;  %v478_v39 = vmul.f32 %v2305_v21, %v477_v11  ;;  %vm481_vm3 = vweird.f32 %v2305_v21  ;;  %v353_v26 = vsel %vm4583_vm1, %v3028_v27, 0.0 }
 0x113   :  { %vm772_vm4 = vweird.f32 %v3007_v6  ;;  %vm3044_vm5 = vcmp.eq.f32.partialorder %v484_v10, 8.507059e+37  ;;  %v487_v40 = vor.u32 1.1754944e-38, %v486_v63  ;;  %v461_v57 = vmul.f32 %v2311_v20, %v3012_v29  ;;  %vm482_vm8 = vmor %vm480_vm2, %vm481_vm3 }
 0x114   :  { %v2200_v28 = vmul.f32 -10.0, %v2184_v48  ;;  %v770_v0 = vadd.f32 %v3007_v6, %v769_v44  ;;  %v479_v14 = vadd.f32 %v2305_v21, %v478_v39  ;;  %vm465_vm7 = vweird.f32 %v3012_v29  ;;  %vm3062_vm11 = vmor %vm771_vm15, %vm772_vm4 }
 0x115   :  { %v471_v49 = vand.u32 2147483648, %v3012_v29  ;;  %v462_v55 = vsub.f32 1.0, %v461_v57  ;;  %v363_v54 = vrot.slane %v362_v59, 2  ;;  %v354_v48 = vrot.slane %v353_v26, 4 }
 0x116   :  { %v213_v10 = vmax.f32 %v211_v47, %v212_v17  ;;  %v748_v11 = vmul.f32 1.442695, %v2200_v28  ;;  %v483_v12 = vsel %vm482_vm8, %v2305_v21, %v479_v14  ;;  %vm466_vm9 = vweird.f32 %v2311_v20 }
 0x117   :  { %vm3054_vm10 = vcmp.eq.f32.partialorder %v469_v43, 8.507059e+37  ;;  %v2313_v44 = vpop.eup %2312  ;;  %v488_v45 = vsel %vm3044_vm5, %v487_v40, %v483_v12  ;;  %v463_v47 = vmul.f32 %v2311_v20, %v462_v55  ;;  %v364_v17 = vadd.f32 %v363_v54, %v362_v59  ;;  %vm467_vm12 = vmor %vm465_vm7, %vm466_vm9 }
 0x118   :  { %v355_v21 = vadd.f32 %v354_v48, %v353_v26  ;;  %v774_v43 = vsel %vm3062_vm11, %v3007_v6, %v770_v0  ;;  %v489_v28 = vmul.f32 %v2919_v60, %v488_v45  ;;  %v472_v57 = vor.u32 1.1754944e-38, %v471_v49 }
 0x119   :  { %v491_v14 = vmul.f32 %v2313_v44, %v3033_v4  ;;  %v464_v19 = vadd.f32 %v2311_v20, %v463_v47  ;;  %v365_v22 = vrot.slane %v364_v17, 1  ;;  %v277_v25 = vsub.f32 %v2929_v42, %v213_v10 }
 0x11a   :  { %v356_v18 = vrot.slane %v355_v21, 2  ;;  %v2172_v2 = vadd.f32 -0.25, %v489_v28  ;;  %v499_v59 = vand.u32 2147483647, %v3033_v4  ;;  %v501_v6 = vand.u32 2147483648, %v3033_v4 }
 0x11b   :  { %v492_v12 = vsub.f32 1.0, %v491_v14  ;;  %2314 = vpow2.f32 %v748_v11  ;;  %v468_v60 = vsel %vm467_vm12, %v2311_v20, %v464_v19  ;;  %v3079_v26 = vadd.f32 %v365_v22, %v364_v17 }
 0x11c   :  { %v357_v53 = vadd.f32 %v356_v18, %v355_v21  ;;  %v2188_v40 = vmul.f32 -10.0, %v2172_v2  ;;  %v473_v0 = vsel %vm3054_vm10, %v472_v57, %v468_v60  ;;  %vm496_vm13 = vweird.f32 %v2313_v44 }
 0x11d   :  { %v493_v42 = vmul.f32 %v2313_v44, %v492_v12  ;;  %v778_v49 = vor.u32 1.1754944e-38, %v777_v33  ;;  %v474_v29 = vmul.f32 %v2942_v58, %v473_v0  ;;  %2316 = vrcp.f32 %v3079_v26 }
 0x11e   :  { %v300_v55 = vmul.f32 1.442695, %v277_v25  ;;  %v1216_v54 = vrot.slane %v3016_v38, 2  ;;  %vm776_vm14 = vcmp.eq.f32.partialorder %v775_v8, 8.507059e+37  ;;  %vm495_vm15 = vweird.f32 %v3033_v4 }
 0x11f   :  { %v494_v19 = vadd.f32 %v2313_v44, %v493_v42  ;;  %v3089_v18 = vsel %vm776_vm14, %v778_v49, %v774_v43  ;;  %v2171_v22 = vadd.f32 -0.25, %v474_v29  ;;  %vm497_vm2 = vmor %vm495_vm15, %vm496_vm13  ;;  %v502_v2 = vor.u32 1.1754944e-38, %v501_v6 }
 0x120   :  { %4622 = vst [vmem:[#allocation13_spill] sm:$0xff] %v3089_v18  ;;  %v358_v20 = vrot.slane %v357_v53, 1  ;;  %v1157_v58 = vsel %vm4583_vm1, %v3021_v34, 0.0  ;;  %v724_v33 = vmul.f32 1.442695, %v2188_v40  ;;  %vm500_vm3 = vcmp.eq.f32.partialorder %v499_v59, 8.507059e+37 }
 0x121   :  { %v498_v48 = vsel %vm497_vm2, %v2313_v44, %v494_v19  ;;  %v2315_v25 = vpop.eup %2314  ;;  %v2187_v10 = vmul.f32 -10.0, %v2171_v22  ;;  %2318 = vpow2.f32 %v300_v55  ;;  %v963_v8 = vsub.f32 1.0, %v2961_v51 }
 0x122   :  { %v503_v11 = vsel %vm500_vm3, %v502_v2, %v498_v48  ;;  %v3093_v13 = vadd.f32 %v358_v20, %v357_v53  ;;  %v942_v4 = vand.u32 2147483648, %v2845_v32  ;;  %v1150_v63 = vsel %vm4583_vm1, %v3089_v18, 0.0 }
 0x123   :  { %v504_v39 = vmul.f32 %v2969_v50, %v503_v11  ;;  %v2317_v45 = vpop.eup %2316  ;;  %v3103_v44 = vadd.f32 %v1209_v5, %v2906_v9  ;;  %v1158_v47 = vrot.slane %v1157_v58, 4  ;;  %v722_v17 = vmul.f32 1.442695, %v2187_v10 }
 0x124   :  { %2320 = vrcp.f32 %v3093_v13  ;;  %v4623_v21 = vsub.f32 1.0, %v2910_v1  ;;  %v521_v28 = vmul.f32 %v2317_v45, %v3079_v26  ;;  %v3111_v50 = vadd.f32 %v1216_v54, %v3016_v38 }
 0x125   :  { %2322 = vpow2.f32 %v724_v33  ;;  %v2173_v43 = vadd.f32 -0.25, %v504_v39  ;;  %v3115_v57 = vmul.f32 %v3037_v16, %v2983_v41  ;;  %v1151_v9 = vrot.slane %v1150_v63, 4 }
 0x126   :  { %v934_v51 = vmul.f32 %v2879_v56, %v4623_v21  ;;  %2324 = vpow2.f32 %v722_v17  ;;  %vm952_vm4 = vweird.f32 %v2774_v30  ;;  %v3119_v5 = vmul.f32 %v2867_v24, %v963_v8 }
 0x127   :  { %v3121_v1 = vor.u32 1.1754944e-38, %v942_v4  ;;  %v3123_v14 = vadd.f32 1.0, %v2315_v25  ;;  %v522_v12 = vsub.f32 1.0, %v521_v28  ;;  %v3125_v59 = vpop.eup %2318  ;;  %v1159_v6 = vadd.f32 %v1158_v47, %v1157_v58 }
 0x128   :  { %v2189_v60 = vmul.f32 -10.0, %v2173_v43  ;;  %v531_v53 = vand.u32 2147483648, %v3079_v26  ;;  %vm951_vm5 = vweird.f32 %v2739_v37  ;;  %vm526_vm7 = vweird.f32 %v2317_v45 }
 0x129   :  { %v523_v40 = vmul.f32 %v2317_v45, %v522_v12  ;;  %v529_v0 = vand.u32 2147483647, %v3079_v26  ;;  %v367_v42 = vsel %vm4583_vm1, %v3125_v59, 0.0  ;;  %v3136_v29 = vadd.f32 %v2879_v56, %v934_v51  ;;  %vm3181_vm3 = vmor %vm951_vm5, %vm952_vm4 }
 0x12a   :  { %v3133_v49 = vpop.eup %2320  ;;  %v978_v54 = vsub.f32 1.0, %v3115_v57  ;;  %v1152_v19 = vadd.f32 %v1151_v9, %v1150_v63  ;;  %vm937_vm8 = vweird.f32 %v2879_v56  ;;  %2326 = vrcp.f32 %v3123_v14 }
 0x12b   :  { %v2323_v22 = vpop.eup %2322  ;;  %v524_v2 = vadd.f32 %v2317_v45, %v523_v40  ;;  %vm525_vm9 = vweird.f32 %v3079_v26  ;;  %v506_v20 = vmul.f32 %v3133_v49, %v3093_v13  ;;  %v4624_v33 = vand.u32 2147483647, %v2743_v3 }
 0x12c   :  { %v2325_v58 = vpop.eup %2324  ;;  %v1160_v25 = vrot.slane %v1159_v6, 2  ;;  %v726_v10 = vmul.f32 1.442695, %v2189_v60  ;;  %vm527_vm11 = vmor %vm525_vm9, %vm526_vm7  ;;  %v532_v11 = vor.u32 1.1754944e-38, %v531_v53  ;;  %v368_v8 = vrot.slane %v367_v42, 4 }
 0x12d   :  { %vm3147_vm10 = vcmp.eq.f32.partialorder %v4624_v33, 8.507059e+37  ;;  %vm936_vm12 = vweird.f32 %v2845_v32  ;;  %v3153_v4 = vadd.f32 1.0, %v2325_v58  ;;  %v528_v26 = vsel %vm527_vm11, %v2317_v45, %v524_v2 }
 0x12e   :  { %vm530_vm13 = vcmp.eq.f32.partialorder %v529_v0, 8.507059e+37  ;;  %v507_v63 = vsub.f32 1.0, %v506_v20  ;;  %vm966_vm14 = vweird.f32 %v2816_v7  ;;  %v1153_v3 = vrot.slane %v1152_v19, 2 }
 0x12f   :  { %v533_v39 = vsel %vm530_vm13, %v532_v11, %v528_v26  ;;  %v369_v47 = vadd.f32 %v368_v8, %v367_v42  ;;  %v970_v17 = vand.u32 2147483647, %v2816_v7  ;;  %v3157_v21 = vadd.f32 1.0, %v2323_v22 }
 0x130   :  { %v514_v51 = vand.u32 2147483647, %v3093_v13  ;;  %v516_v43 = vand.u32 2147483648, %v3093_v13  ;;  %v950_v28 = vadd.f32 %v2774_v30, %v2947_v15  ;;  %2328 = vpow2.f32 %v726_v10  ;;  %v3165_v60 = vpop.eup %2326 }
 0x131   :  { %4627 = vst [vmem:[#allocation14_spill] sm:$0xff] %v3157_v21  ;;  %v534_v45 = vmul.f32 %v2999_v62, %v533_v39  ;;  %v508_v9 = vmul.f32 %v3133_v49, %v507_v63  ;;  %v370_v12 = vrot.slane %v369_v47, 2  ;;  %v3167_v53 = vadd.f32 %v1160_v25, %v1159_v6 }
 0x132   :  { %2330 = vrcp.f32 %v3153_v4  ;;  %vm511_vm15 = vweird.f32 %v3133_v49  ;;  %v4629_v40 = vand.u32 2147483647, %v2739_v37  ;;  %v4634_v62 = vand.u32 2147483647, %v2845_v32 }
 0x133   :  { %4628 = vst [vmem:[#allocation15_spill] sm:$0xff] %v3167_v53  ;;  %v3191_v42 = vadd.f32 %v1153_v3, %v1152_v19  ;;  %v2175_v22 = vadd.f32 -0.25, %v534_v45  ;;  %v509_v2 = vadd.f32 %v3133_v49, %v508_v9  ;;  %v371_v20 = vadd.f32 %v370_v12, %v369_v47 }
 0x134   :  { %vm3173_vm2 = vcmp.eq.f32.partialorder %v4629_v40, 8.507059e+37  ;;  %vm3187_vm7 = vcmp.eq.f32.partialorder %v4634_v62, 8.507059e+37  ;;  %2332 = vrcp.f32 %v3157_v21  ;;  %vm510_vm9 = vweird.f32 %v3093_v13 }
 0x135   :  { %4637 = vst [vmem:[#allocation16_spill] sm:$0xff] %v3191_v42  ;;  %v954_v37 = vsel %vm3181_vm3, %v2774_v30, %v950_v28  ;;  %vm967_vm4 = vweird.f32 %v2867_v24  ;;  %v992_v58 = vmul.f32 %v3165_v60, %v3123_v14  ;;  %vm512_vm5 = vmor %vm510_vm9, %vm511_vm15  ;;  %vm515_vm11 = vcmp.eq.f32.partialorder %v514_v51, 8.507059e+37 }
 0x136   :  { %v517_v19 = vor.u32 1.1754944e-38, %v516_v43  ;;  %v965_v33 = vadd.f32 %v2867_v24, %v3119_v5  ;;  %vm3204_vm13 = vcmp.eq.f32.partialorder %v970_v17, 8.507059e+37  ;;  %v2191_v13 = vmul.f32 -10.0, %v2175_v22  ;;  %v2329_v26 = vpop.eup %2328  ;;  %vm3223_vm15 = vmor %vm936_vm12, %vm937_vm8 }
 0x137   :  { %v513_v10 = vsel %vm512_vm5, %v3133_v49, %v509_v2  ;;  %v372_v11 = vrot.slane %v371_v20, 1  ;;  %v4640_v30 = vsel %vm2936_vm6, %v2779_v36, %v2861_v52  ;;  %v3230_v46 = vsel %vm3173_vm2, %v2766_v23, %v954_v37  ;;  %vm3246_vm6 = vmor %vm966_vm14, %vm967_vm4 }
 0x138   :  { %v3217_v8 = vsel %vm3147_vm10, %v2776_v31, %v4640_v30  ;;  %v518_v49 = vsel %vm515_vm11, %v517_v19, %v513_v10  ;;  %v4643_v36 = vand.u32 2147483648, %v2816_v7  ;;  %v979_v31 = vmul.f32 %v3037_v16, %v978_v54  ;;  %v3237_v48 = vpop.eup %2330 }
 0x139   :  { %v730_v32 = vmul.f32 1.442695, %v2191_v13  ;;  %v519_v63 = vmul.f32 %v3028_v27, %v518_v49  ;;  %v3240_v3 = vadd.f32 %v372_v11, %v371_v20  ;;  %vm981_vm8 = vweird.f32 %v2983_v41  ;;  %v3321_v13 = vld [vmem:[#allocation3 + $0x24] sm:$0xf]  ;;  %v3336_v49 = vld [vmem:[#allocation3 + $0x28] sm:$0xf] }
 0x13a   :  { %v973_v52 = vor.u32 1.1754944e-38, %v4643_v36  ;;  %v993_v57 = vsub.f32 1.0, %v992_v58  ;;  %v939_v54 = vsel %vm3223_vm15, %v2879_v56, %v3136_v29  ;;  %v969_v27 = vsel %vm3246_vm6, %v2867_v24, %v965_v33  ;;  %v3259_v39 = vpop.eup %2332 }
 0x13b   :  { %vm982_vm10 = vweird.f32 %v3037_v16  ;;  %4646 = vst [vmem:[#allocation17_spill] sm:$0xff] %v3259_v39  ;;  %v3261_v7 = vadd.f32 1.0, %v2329_v26  ;;  %2334 = vpow2.f32 %v730_v32  ;;  %v2174_v47 = vadd.f32 -0.25, %v519_v63  ;;  %v3349_v63 = vld [vmem:[#allocation3 + $0x2c] sm:$0xf] }
 0x13c   :  { %v985_v17 = vand.u32 2147483647, %v2983_v41  ;;  %v3266_v51 = vmul.f32 %v3237_v48, %v3153_v4  ;;  %2336 = vrcp.f32 %v3240_v3  ;;  %v980_v56 = vadd.f32 %v3037_v16, %v979_v31  ;;  %vm3295_vm12 = vmor %vm981_vm8, %vm982_vm10 }
 0x13d   :  { %4647 = vst [vmem:[#allocation18_spill] sm:$0xff] %v3261_v7  ;;  %v987_v24 = vand.u32 2147483648, %v2983_v41  ;;  %v822_v43 = vand.u32 2147483648, %v3157_v21  ;;  %v2190_v28 = vmul.f32 -10.0, %v2174_v47  ;;  %v3276_v45 = vsel %vm3187_vm7, %v3121_v1, %v939_v54  ;;  %v3311_v41 = vld [vmem:[#allocation3 + $0x20] sm:$0xf] }
 0x13e   :  { %v3280_v9 = vmul.f32 %v3259_v39, %v3157_v21  ;;  %v807_v12 = vand.u32 2147483648, %v3153_v4  ;;  %v546_v40 = vand.u32 2147483648, %v3240_v3  ;;  %v994_v0 = vmul.f32 %v3165_v60, %v993_v57  ;;  %v3353_v57 = vld [vmem:[#allocation3 + $0x30] sm:$0xf]  ;;  %v2017_v1 = vld [vmem:[#allocation6 + $0x18] sm:$0xff] }
 0x13f   :  { %2338 = vrcp.f32 %v3261_v7  ;;  %v728_v15 = vmul.f32 1.442695, %v2190_v28  ;;  %v544_v62 = vand.u32 2147483647, %v3240_v3  ;;  %v3289_v6 = vsel %vm3204_vm13, %v973_v52, %v969_v27  ;;  %2205 = vmatpush.msra.mxu2 %v2017_v1  ;;  %2209 = vmatpush.msra.mxu3 %v2017_v1 }
 0x140   :  { %v798_v22 = vsub.f32 1.0, %v3266_v51  ;;  %v984_v2 = vsel %vm3295_vm12, %v3037_v16, %v980_v56  ;;  %vm3303_vm14 = vcmp.eq.f32.partialorder %v985_v17, 8.507059e+37  ;;  %v988_v37 = vor.u32 1.1754944e-38, %v987_v24  ;;  %v3365_v56 = vld [vmem:[#allocation3 + $0x34] sm:$0xf]  ;;  %2076 = vmatpush.msra.mxu0 %v2017_v1  ;;  %2135 = vmatpush.msra.mxu1 %v2017_v1 }
 0x141   :  { %v2335_v58 = vpop.eup %2334  ;;  %2340 = vpow2.f32 %v728_v15  ;;  %v3308_v19 = vadd.f32 %v3165_v60, %v994_v0  ;;  %vm997_vm2 = vweird.f32 %v3165_v60  ;;  %v1030_v33 = vmul.f32 %v3311_v41, %v2851_v35 }
 0x142   :  { %v3315_v25 = vpop.eup %2336  ;;  %vm540_vm3 = vweird.f32 %v3240_v3  ;;  %v3318_v16 = vor.u32 1.1754944e-38, %v546_v40  ;;  %vm996_vm7 = vweird.f32 %v3123_v14  ;;  %v1031_v10 = vmul.f32 %v3321_v13, %v2954_v61 }
 0x143   :  { %v536_v11 = vmul.f32 %v3315_v25, %v3240_v3  ;;  %vm3327_vm9 = vcmp.eq.f32.partialorder %v544_v62, 8.507059e+37  ;;  %v3333_v26 = vsel %vm3303_vm14, %v988_v37, %v984_v2  ;;  %v1000_v5 = vand.u32 2147483647, %v3123_v14  ;;  %vm3344_vm4 = vmor %vm996_vm7, %vm997_vm2  ;;  %v2016_v2 = vld [vmem:[#allocation6 + $0x10] sm:$0xff] }
 0x144   :  { %v1032_v36 = vmul.f32 %v3336_v49, %v3217_v8  ;;  %v3340_v52 = vadd.f32 1.0, %v2335_v58  ;;  %v1002_v32 = vand.u32 2147483648, %v3123_v14  ;;  %v1033_v23 = vmul.f32 %v3349_v63, %v3276_v45  ;;  %2206 = vmatpush.msra.mxu2 %v2016_v2  ;;  %2210 = vmatpush.msra.mxu3 %v2016_v2 }
 0x145   :  { %v1034_v54 = vmul.f32 %v3353_v57, %v3230_v46  ;;  %v3357_v27 = vpop.eup %2338  ;;  %v537_v47 = vsub.f32 1.0, %v536_v11  ;;  %vm541_vm5 = vweird.f32 %v3315_v25  ;;  %v999_v14 = vsel %vm3344_vm4, %v3165_v60, %v3308_v19  ;;  %2077 = vmatpush.msra.mxu0 %v2016_v2  ;;  %2136 = vmatpush.msra.mxu1 %v2016_v2 }
 0x146   :  { %4654 = vst [vmem:[#allocation19_spill] sm:$0xff] %v3340_v52  ;;  %v1094_v17 = vsel %vm4586_vm0, %v1030_v33, 0.0  ;;  %v1035_v24 = vmul.f32 %v3365_v56, %v3289_v6  ;;  %v1101_v40 = vsel %vm4586_vm0, %v1031_v10, 0.0  ;;  %v1108_v0 = vsel %vm4586_vm0, %v1032_v36, 0.0  ;;  %v2015_v36 = vld [vmem:[#allocation6 + $0x8] sm:$0xff]  ;;  %vm3382_vm11 = vmor %vm540_vm3, %vm541_vm5 }
 0x147   :  { %4657 = vst [vmem:[#allocation20_spill] sm:$0xff] %v3357_v27  ;;  %v1095_v28 = vrot.slane %v1094_v17, 4  ;;  %v2341_v15 = vpop.eup %2340  ;;  %v538_v62 = vmul.f32 %v3315_v25, %v537_v47  ;;  %v1102_v20 = vrot.slane %v1101_v40, 4  ;;  %v1109_v37 = vrot.slane %v1108_v0, 4  ;;  %2207 = vmatpush.msra.mxu2 %v2015_v36  ;;  %2211 = vmatpush.msra.mxu3 %v2015_v36 }
 0x148   :  { %v1115_v60 = vsel %vm4586_vm0, %v1033_v23, 0.0  ;;  %v3373_v58 = vadd.f32 1.0, %v2341_v15  ;;  %v1122_v11 = vsel %vm4586_vm0, %v1034_v54, 0.0  ;;  %v1003_v31 = vor.u32 1.1754944e-38, %v1002_v32  ;;  %2078 = vmatpush.msra.mxu0 %v2015_v36  ;;  %2137 = vmatpush.msra.mxu1 %v2015_v36 }
 0x149   :  { %v1096_v19 = vadd.f32 %v1095_v28, %v1094_v17  ;;  %v1116_v33 = vrot.slane %v1115_v60, 4  ;;  %v539_v10 = vadd.f32 %v3315_v25, %v538_v62  ;;  %v1103_v29 = vadd.f32 %v1102_v20, %v1101_v40  ;;  %v2014_v28 = vld [vmem:[#allocation6] sm:$0xff] }
 0x14a   :  { %4658 = vst [vmem:[#allocation21_spill] sm:$0xff] %v3373_v58  ;;  %v1110_v47 = vadd.f32 %v1109_v37, %v1108_v0  ;;  %2342 = vrcp.f32 %v3340_v52  ;;  %vm1001_vm13 = vcmp.eq.f32.partialorder %v1000_v5, 8.507059e+37  ;;  %v1123_v17 = vrot.slane %v1122_v11, 4  ;;  %v3391_v0 = vld [vmem:[#allocation3 + $0x38] sm:$0xf]  ;;  %2208 = vmatpush.msra.mxu2 %v2014_v28  ;;  %2212 = vmatpush.msra.mxu3 %v2014_v28 }
 0x14b   :  { %v1097_v54 = vrot.slane %v1096_v19, 2  ;;  %v543_v32 = vsel %vm3382_vm11, %v3315_v25, %v539_v10  ;;  %v3389_v40 = vsel %vm1001_vm13, %v1003_v31, %v999_v14  ;;  %v1036_v3 = vmul.f32 %v3391_v0, %v3333_v26  ;;  %2079 = vmatpush.msra.mxu0 %v2014_v28  ;;  %2138 = vmatpush.msra.mxu1 %v2014_v28 }
 0x14c   :  { %v1104_v15 = vrot.slane %v1103_v29, 2  ;;  %2344 = vrcp.f32 %v3373_v58  ;;  %v548_v5 = vsel %vm3327_vm9, %v3318_v16, %v543_v32  ;;  %v1111_v25 = vrot.slane %v1110_v47, 2 }
 0x14d   :  { %v1117_v62 = vadd.f32 %v1116_v33, %v1115_v60  ;;  %v549_v14 = vmul.f32 %v3125_v59, %v548_v5  ;;  %v1098_v1 = vadd.f32 %v1097_v54, %v1096_v19  ;;  %v1129_v37 = vsel %vm4586_vm0, %v1035_v24, 0.0  ;;  %v3410_v24 = vld [vmem:[#allocation3 + $0x3c] sm:$0xf] }
 0x14e   :  { %v1105_v20 = vadd.f32 %v1104_v15, %v1103_v29  ;;  %v3403_v2 = vor.u32 1.1754944e-38, %v822_v43  ;;  %v1124_v30 = vadd.f32 %v1123_v17, %v1122_v11  ;;  %v813_v60 = vsub.f32 1.0, %v3280_v9 }
 0x14f   :  { %v1118_v16 = vrot.slane %v1117_v62, 2  ;;  %v799_v59 = vmul.f32 %v3237_v48, %v798_v22  ;;  %v2176_v29 = vadd.f32 -0.25, %v549_v14  ;;  %v1037_v19 = vmul.f32 %v3410_v24, %v3389_v40 }
 0x150   :  { %4661 = vst [vmem:[#allocation22_spill] sm:$0xff] %v3403_v2  ;;  %v3414_v43 = vpop.eup %2342  ;;  %v3418_v33 = vmul.f32 %v3357_v27, %v3261_v7  ;;  %v3420_v11 = vadd.f32 %v1111_v25, %v1110_v47  ;;  %v1130_v9 = vrot.slane %v1129_v37, 4  ;;  %v1136_v51 = vsel %vm4586_vm0, %v1036_v3, 0.0 }
 0x151   :  { %4662 = vst [vmem:[#allocation23_spill] sm:$0xff] %v3414_v43  ;;  %v3425_v22 = vor.u32 1.1754944e-38, %v807_v12  ;;  %v1099_v31 = vrot.slane %v1098_v1, 1  ;;  %v1106_v23 = vrot.slane %v1105_v20, 1  ;;  %v2192_v32 = vmul.f32 -10.0, %v2176_v29 }
 0x152   :  { %4663 = vst [vmem:[#allocation24_spill] sm:$0xff] %v3418_v33  ;;  %v3428_v54 = vpop.eup %2344  ;;  %v3431_v28 = vadd.f32 %v1118_v16, %v1117_v62  ;;  %v1125_v47 = vrot.slane %v1124_v30, 2  ;;  %v3434_v15 = vmul.f32 %v3259_v39, %v813_v60  ;;  %v3437_v3 = vadd.f32 %v3237_v48, %v799_v59 }
 0x153   :  { %4664 = vst [vmem:[#allocation25_spill] sm:$0xff] %v3425_v22  ;;  %v1137_v12 = vrot.slane %v1136_v51, 4  ;;  %v1143_v5 = vsel %vm4586_vm0, %v1037_v19, 0.0  ;;  %v3443_v14 = vmul.f32 %v3414_v43, %v3340_v52  ;;  %v1131_v62 = vadd.f32 %v1130_v9, %v1129_v37 }
 0x154   :  { %4665 = vst [vmem:[#allocation26_spill] sm:$0xff] %v3428_v54  ;;  %v3448_v16 = vmul.f32 %v3428_v54, %v3373_v58  ;;  %v3450_v60 = vadd.f32 %v1099_v31, %v1098_v1  ;;  %v3452_v59 = vadd.f32 %v1106_v23, %v1105_v20  ;;  %v1144_v36 = vrot.slane %v1143_v5, 4 }
 0x155   :  { %4666 = vst [vmem:[#allocation27_spill] sm:$0xff] %v3434_v15  ;;  %v732_v10 = vmul.f32 1.442695, %v2192_v32  ;;  %v1120_v19 = vrot.slane %v3431_v28, 1  ;;  %v1126_v25 = vadd.f32 %v1125_v47, %v1124_v30  ;;  %v1220_v17 = vsel %vm4583_vm1, %v3217_v8, 0.0 }
 0x156   :  { %4667 = vst [vmem:[#allocation28_spill] sm:$0xff] %v3437_v3  ;;  %v1138_v55 = vadd.f32 %v1137_v12, %v1136_v51  ;;  %v1221_v38 = vrot.slane %v1220_v17, 4  ;;  %v1227_v37 = vsel %vm4583_vm1, %v3276_v45, 0.0  ;;  %v1234_v9 = vsel %vm4583_vm1, %v3230_v46, 0.0 }
 0x157   :  { %4668 = vst [vmem:[#allocation29_spill] sm:$0xff] %v3443_v14  ;;  %v1132_v1 = vrot.slane %v1131_v62, 2  ;;  %v4669_v20 = vrot.slane %v3103_v44, 1  ;;  %v1228_v23 = vrot.slane %v1227_v37, 4  ;;  %v1235_v32 = vrot.slane %v1234_v9, 4 }
 0x158   :  { %v1145_v29 = vadd.f32 %v1144_v36, %v1143_v5  ;;  %v1222_v30 = vadd.f32 %v1221_v38, %v1220_v17  ;;  %v1241_v47 = vsel %vm4583_vm1, %v3289_v6, 0.0  ;;  %v1248_v51 = vsel %vm4583_vm1, %v3333_v26, 0.0 }
 0x159   :  { %v1212_v31 = vadd.f32 %v4669_v20, %v3103_v44  ;;  %2346 = vpow2.f32 %v732_v10  ;;  %v1229_v12 = vadd.f32 %v1228_v23, %v1227_v37  ;;  %v1236_v53 = vadd.f32 %v1235_v32, %v1234_v9 }
 0x15a   :  { %v1242_v42 = vrot.slane %v1241_v47, 4  ;;  %v1139_v34 = vrot.slane %v1138_v55, 2  ;;  %v1223_v18 = vrot.slane %v1222_v30, 2  ;;  %v1249_v52 = vrot.slane %v1248_v51, 4 }
 0x15b   :  { %v1255_v44 = vsel %vm4583_vm1, %v3389_v40, 0.0  ;;  %v1127_v20 = vrot.slane %v1126_v25, 1  ;;  %v1133_v43 = vadd.f32 %v1132_v1, %v1131_v62  ;;  %v1230_v36 = vrot.slane %v1229_v12, 2 }
 0x15c   :  { %v1237_v38 = vrot.slane %v1236_v53, 2  ;;  %v1146_v17 = vrot.slane %v1145_v29, 2  ;;  %v1224_v5 = vadd.f32 %v1223_v18, %v1222_v30  ;;  %v1243_v2 = vadd.f32 %v1242_v42, %v1241_v47 }
 0x15d   :  { %v1250_v22 = vadd.f32 %v1249_v52, %v1248_v51  ;;  %v4670_v10 = vrot.slane %v3111_v50, 1  ;;  %v1231_v9 = vadd.f32 %v1230_v36, %v1229_v12  ;;  %v1256_v32 = vrot.slane %v1255_v44, 4 }
 0x15e   :  { %v1238_v23 = vadd.f32 %v1237_v38, %v1236_v53  ;;  %v1140_v21 = vadd.f32 %v1139_v34, %v1138_v55  ;;  %v1225_v58 = vrot.slane %v1224_v5, 1  ;;  %v1244_v54 = vrot.slane %v1243_v2, 2 }
 0x15f   :  { %v1219_v37 = vadd.f32 %v4670_v10, %v3111_v50  ;;  %v1251_v14 = vrot.slane %v1250_v22, 2  ;;  %v2347_v27 = vpop.eup %2346  ;;  %v1232_v33 = vrot.slane %v1231_v9, 1  ;;  %v1257_v1 = vadd.f32 %v1256_v32, %v1255_v44 }
 0x160   :  { %v1239_v62 = vrot.slane %v1238_v23, 1  ;;  %v3473_v3 = vadd.f32 1e-08, %v1212_v31  ;;  %v1147_v18 = vadd.f32 %v1146_v17, %v1145_v29  ;;  %v1226_v42 = vadd.f32 %v1225_v58, %v1224_v5 }
 0x161   :  { %v1245_v52 = vadd.f32 %v1244_v54, %v1243_v2  ;;  %v1252_v30 = vadd.f32 %v1251_v14, %v1250_v22  ;;  %v1134_v47 = vrot.slane %v1133_v43, 1  ;;  %v1258_v51 = vrot.slane %v1257_v1, 2 }
 0x162   :  { %v3475_v50 = vadd.f32 1e-08, %v1219_v37  ;;  %2348 = vrcp.f32 %v3473_v3  ;;  %v3478_v34 = vadd.f32 1.0, %v2347_v27  ;;  %v1233_v55 = vadd.f32 %v1232_v33, %v1231_v9 }
 0x163   :  { %v1246_v53 = vrot.slane %v1245_v52, 1  ;;  %v1253_v12 = vrot.slane %v1252_v30, 1  ;;  %v1141_v36 = vrot.slane %v1140_v21, 1  ;;  %v1240_v38 = vadd.f32 %v1239_v62, %v1238_v23 }
 0x164   :  { %v1259_v44 = vadd.f32 %v1258_v51, %v1257_v1  ;;  %v3480_v31 = vadd.f32 1e-08, %v1226_v42  ;;  %v4671_v58 = vrot.slane %v3420_v11, 1  ;;  %v3488_v22 = vadd.f32 %v1120_v19, %v3431_v28 }
 0x165   :  { %v3490_v54 = vadd.f32 %v1127_v20, %v1126_v25  ;;  %v1148_v27 = vrot.slane %v1147_v18, 1  ;;  %v1247_v14 = vadd.f32 %v1246_v53, %v1245_v52  ;;  %v1407_v29 = vand.u32 2147483647, %v3473_v3 }
 0x166   :  { %v3485_v2 = vadd.f32 %v4671_v58, %v3420_v11  ;;  %v1260_v33 = vrot.slane %v1259_v44, 1  ;;  %2350 = vrcp.f32 %v3475_v50  ;;  %v1254_v17 = vadd.f32 %v1253_v12, %v1252_v30 }
 0x167   :  { %2352 = vrcp.f32 %v3478_v34  ;;  %v3495_v5 = vadd.f32 1e-08, %v1233_v55  ;;  %v1409_v11 = vand.u32 2147483648, %v3473_v3  ;;  %v3498_v37 = vadd.f32 %v1134_v47, %v1133_v43 }
 0x168   :  { %v2349_v10 = vpop.eup %2348  ;;  %v3500_v28 = vadd.f32 %v1141_v36, %v1140_v21  ;;  %v3502_v25 = vadd.f32 1e-08, %v1240_v38  ;;  %2354 = vrcp.f32 %v3480_v31  ;;  %v3505_v19 = vadd.f32 %v1148_v27, %v1147_v18 }
 0x169   :  { %v1261_v20 = vadd.f32 %v1260_v33, %v1259_v44  ;;  %v1399_v9 = vmul.f32 %v2349_v10, %v3473_v3  ;;  %vm1403_vm15 = vweird.f32 %v3473_v3  ;;  %v3509_v23 = vadd.f32 1e-08, %v1247_v14 }
 0x16a   :  { %vm3511_vm6 = vcmp.eq.f32.partialorder %v1407_v29, 8.507059e+37  ;;  %v1422_v21 = vand.u32 2147483647, %v3475_v50  ;;  %v1424_v43 = vand.u32 2147483648, %v3475_v50  ;;  %v3517_v62 = vadd.f32 1e-08, %v1254_v17 }
 0x16b   :  { %v1400_v1 = vsub.f32 1.0, %v1399_v9  ;;  %v1410_v18 = vor.u32 1.1754944e-38, %v1409_v11  ;;  %vm1418_vm8 = vweird.f32 %v3475_v50  ;;  %2356 = vrcp.f32 %v3495_v5 }
 0x16c   :  { %v2351_v42 = vpop.eup %2350  ;;  %vm1404_vm10 = vweird.f32 %v2349_v10  ;;  %v1437_v52 = vand.u32 2147483647, %v3480_v31  ;;  %v1439_v30 = vand.u32 2147483648, %v3480_v31  ;;  %2358 = vrcp.f32 %v3502_v25 }
 0x16d   :  { %v3524_v47 = vpop.eup %2352  ;;  %v3526_v51 = vadd.f32 1e-08, %v1261_v20  ;;  %v1401_v55 = vmul.f32 %v2349_v10, %v1400_v1  ;;  %v1414_v53 = vmul.f32 %v2351_v42, %v3475_v50  ;;  %vm1433_vm12 = vweird.f32 %v3480_v31  ;;  %vm3541_vm2 = vmor %vm1403_vm15, %vm1404_vm10 }
 0x16e   :  { %v2355_v12 = vpop.eup %2354  ;;  %vm3530_vm14 = vcmp.eq.f32.partialorder %v1422_v21, 8.507059e+37  ;;  %v1425_v38 = vor.u32 1.1754944e-38, %v1424_v43  ;;  %v1452_v44 = vand.u32 2147483647, %v3495_v5  ;;  %v1454_v58 = vand.u32 2147483648, %v3495_v5 }
 0x16f   :  { %v1402_v27 = vadd.f32 %v2349_v10, %v1401_v55  ;;  %v1415_v14 = vsub.f32 1.0, %v1414_v53  ;;  %v1429_v33 = vmul.f32 %v2355_v12, %v3480_v31  ;;  %v1467_v29 = vand.u32 2147483647, %v3502_v25 }
 0x170   :  { %vm1419_vm3 = vweird.f32 %v2351_v42  ;;  %vm3545_vm7 = vcmp.eq.f32.partialorder %v1437_v52, 8.507059e+37  ;;  %v1440_v20 = vor.u32 1.1754944e-38, %v1439_v30  ;;  %vm1448_vm9 = vweird.f32 %v3495_v5 }
 0x171   :  { %v1469_v9 = vand.u32 2147483648, %v3502_v25  ;;  %2360 = vrcp.f32 %v3509_v23  ;;  %v2357_v21 = vpop.eup %2356  ;;  %v1406_v3 = vsel %vm3541_vm2, %v2349_v10, %v1402_v27  ;;  %v1416_v43 = vmul.f32 %v2351_v42, %v1415_v14  ;;  %vm3570_vm15 = vmor %vm1418_vm8, %vm1419_vm3 }
 0x172   :  { %v1430_v1 = vsub.f32 1.0, %v1429_v33  ;;  %vm1463_vm4 = vweird.f32 %v3502_v25  ;;  %v2359_v55 = vpop.eup %2358  ;;  %vm1434_vm5 = vweird.f32 %v2355_v12  ;;  %v1444_v52 = vmul.f32 %v2357_v21, %v3495_v5 }
 0x173   :  { %vm3556_vm11 = vcmp.eq.f32.partialorder %v1452_v44, 8.507059e+37  ;;  %v1455_v53 = vor.u32 1.1754944e-38, %v1454_v58  ;;  %v1411_v7 = vsel %vm3511_vm6, %v1410_v18, %v1406_v3  ;;  %v1417_v39 = vadd.f32 %v2351_v42, %v1416_v43  ;;  %vm1435_vm8 = vmor %vm1433_vm12, %vm1434_vm5 }
 0x174   :  { %v1431_v15 = vmul.f32 %v2355_v12, %v1430_v1  ;;  %v1459_v10 = vmul.f32 %v2359_v55, %v3502_v25  ;;  %vm3563_vm13 = vcmp.eq.f32.partialorder %v1467_v29, 8.507059e+37  ;;  %v1445_v14 = vsub.f32 1.0, %v1444_v52 }
 0x175   :  { %v1470_v58 = vor.u32 1.1754944e-38, %v1469_v9  ;;  %v1482_v32 = vand.u32 2147483647, %v3509_v23  ;;  %v1484_v18 = vand.u32 2147483648, %v3509_v23  ;;  %v1421_v33 = vsel %vm3570_vm15, %v2351_v42, %v1417_v39 }
 0x176   :  { %v1432_v29 = vadd.f32 %v2355_v12, %v1431_v15  ;;  %v1460_v17 = vsub.f32 1.0, %v1459_v10  ;;  %vm1478_vm6 = vweird.f32 %v3509_v23  ;;  %2362 = vrcp.f32 %v3517_v62 }
 0x177   :  { %v2361_v50 = vpop.eup %2360  ;;  %v1412_v3 = vmul.f32 %v1411_v7, %v3450_v60  ;;  %v1446_v9 = vmul.f32 %v2357_v21, %v1445_v14  ;;  %vm1449_vm10 = vweird.f32 %v2357_v21  ;;  %vm1464_vm2 = vweird.f32 %v2359_v55 }
 0x178   :  { %v1426_v43 = vsel %vm3530_vm14, %v1425_v38, %v1421_v33  ;;  %v1436_v39 = vsel %vm1435_vm8, %v2355_v12, %v1432_v29  ;;  %v1461_v15 = vmul.f32 %v2359_v55, %v1460_v17  ;;  %v1474_v42 = vmul.f32 %v2361_v50, %v3509_v23  ;;  %vm1450_vm12 = vmor %vm1448_vm9, %vm1449_vm10 }
 0x179   :  { %v1447_v1 = vadd.f32 %v2357_v21, %v1446_v9  ;;  %vm3587_vm3 = vcmp.eq.f32.partialorder %v1482_v32, 8.507059e+37  ;;  %v1485_v7 = vor.u32 1.1754944e-38, %v1484_v18  ;;  %v1497_v60 = vand.u32 2147483647, %v3517_v62  ;;  %vm1465_vm14 = vmor %vm1463_vm4, %vm1464_vm2 }
 0x17a   :  { %v1441_v31 = vsel %vm3545_vm7, %v1440_v20, %v1436_v39  ;;  %v1462_v36 = vadd.f32 %v2359_v55, %v1461_v15  ;;  %v1475_v38 = vsub.f32 1.0, %v1474_v42  ;;  %v1499_v12 = vand.u32 2147483648, %v3517_v62 }
 0x17b   :  { %v1427_v10 = vmul.f32 %v1426_v43, %v3452_v59  ;;  %v1451_v44 = vsel %vm1450_vm12, %v2357_v21, %v1447_v1  ;;  %vm1493_vm5 = vweird.f32 %v3517_v62  ;;  %2364 = vrcp.f32 %v3526_v51 }
 0x17c   :  { %v2363_v11 = vpop.eup %2362  ;;  %v1456_v5 = vsel %vm3556_vm11, %v1455_v53, %v1451_v44  ;;  %v1466_v20 = vsel %vm1465_vm14, %v2359_v55, %v1462_v36  ;;  %v1476_v14 = vmul.f32 %v2361_v50, %v1475_v38  ;;  %vm1479_vm7 = vweird.f32 %v2361_v50 }
 0x17d   :  { %v1442_v32 = vmul.f32 %v1441_v31, %v3485_v2  ;;  %v1471_v59 = vsel %vm3563_vm13, %v1470_v58, %v1466_v20  ;;  %v1489_v21 = vmul.f32 %v2363_v11, %v3517_v62  ;;  %vm3609_vm9 = vcmp.eq.f32.partialorder %v1497_v60, 8.507059e+37  ;;  %vm1480_vm4 = vmor %vm1478_vm6, %vm1479_vm7 }
 0x17e   :  { %v1512_v18 = vand.u32 2147483647, %v3526_v51  ;;  %v1457_v33 = vmul.f32 %v1456_v5, %v3488_v22  ;;  %v1477_v30 = vadd.f32 %v2361_v50, %v1476_v14  ;;  %v1500_v53 = vor.u32 1.1754944e-38, %v1499_v12 }
 0x17f   :  { %v1514_v55 = vand.u32 2147483648, %v3526_v51  ;;  %v1472_v29 = vmul.f32 %v1471_v59, %v3490_v54  ;;  %v1490_v2 = vsub.f32 1.0, %v1489_v21  ;;  %vm1494_vm11 = vweird.f32 %v2363_v11 }
 0x180   :  { %vm4592_vm13 = vcmask 1041409   ;;  %v1481_v27 = vsel %vm1480_vm4, %v2361_v50, %v1477_v30  ;;  %vm1508_vm15 = vweird.f32 %v3526_v51  ;;  %vm4591_vm8 = vcmask 1042434  }
 0x181   :  { %v1515_v58 = vor.u32 1.1754944e-38, %v1514_v55  ;;  %vm4590_vm10 = vcmask 1043459   ;;  %v2365_v17 = vpop.eup %2364  ;;  %v1486_v22 = vsel %vm3587_vm3, %v1485_v7, %v1481_v27  ;;  %v1491_v9 = vmul.f32 %v2363_v11, %v1490_v2  ;;  %vm1495_vm3 = vmor %vm1493_vm5, %vm1494_vm11 }
 0x182   :  { %vm4589_vm2 = vcmask 1044484   ;;  %vm4588_vm12 = vcmask 1045509   ;;  %v1487_v54 = vmul.f32 %v1486_v22, %v3498_v37  ;;  %v1504_v23 = vmul.f32 %v2365_v17, %v3526_v51 }
 0x183   :  { %vm3624_vm6 = vcmp.eq.f32.partialorder %v1512_v18, 8.507059e+37  ;;  %vm4587_vm14 = vcmask 1046534   ;;  %v2052_v50 = vsel %vm4592_vm13, %v1427_v10, %v1412_v3  ;;  %v1492_v39 = vadd.f32 %v2363_v11, %v1491_v9 }
 0x184   :  { %vm1509_vm7 = vweird.f32 %v2365_v17  ;;  %vm4585_vm4 = vcmask 1047559   ;;  %v2053_v15 = vsel %vm4591_vm8, %v1442_v32, %v2052_v50  ;;  %v1014_v42 = vsub.f32 1.0, %v2851_v35 }
 0x185   :  { %v1505_v37 = vsub.f32 1.0, %v1504_v23  ;;  %v2054_v1 = vsel %vm4590_vm10, %v1457_v33, %v2053_v15  ;;  %vm4584_vm1 = vcmask 261120   ;;  %v1015_v52 = vsub.f32 1.0, %v2954_v61 }
 0x186   :  { %v1016_v7 = vsub.f32 1.0, %v3217_v8  ;;  %v1496_v3 = vsel %vm1495_vm3, %v2363_v11, %v1492_v39  ;;  %v2055_v60 = vsel %vm4589_vm2, %v1472_v29, %v2054_v1  ;;  %v1017_v31 = vsub.f32 1.0, %v3276_v45 }
 0x187   :  { %v1018_v36 = vsub.f32 1.0, %v3230_v46  ;;  %v1501_v38 = vsel %vm3609_vm9, %v1500_v53, %v1496_v3  ;;  %v1506_v62 = vmul.f32 %v2365_v17, %v1505_v37  ;;  %v2056_v12 = vsel %vm4588_vm12, %v1487_v54, %v2055_v60  ;;  %vm1510_vm9 = vmor %vm1508_vm15, %vm1509_vm7 }
 0x188   :  { %v1019_v10 = vsub.f32 1.0, %v3289_v6  ;;  %v1502_v44 = vmul.f32 %v1501_v38, %v3500_v28  ;;  %v1020_v5 = vsub.f32 1.0, %v3333_v26  ;;  %v1021_v11 = vsub.f32 1.0, %v3389_v40 }
 0x189   :  { %v1526_v20 = vmul.f32 %v3311_v41, %v1014_v42  ;;  %vm802_vm5 = vweird.f32 %v3237_v48  ;;  %v1507_v14 = vadd.f32 %v2365_v17, %v1506_v62  ;;  %v1527_v32 = vmul.f32 %v3321_v13, %v1015_v52 }
 0x18a   :  { %v1528_v59 = vmul.f32 %v3336_v49, %v1016_v7  ;;  %v1529_v28 = vmul.f32 %v3349_v63, %v1017_v31  ;;  %v2057_v41 = vsel %vm4587_vm14, %v1502_v44, %v2056_v12  ;;  %v1530_v21 = vmul.f32 %v3353_v57, %v1018_v36 }
 0x18b   :  { %v1531_v13 = vmul.f32 %v3365_v56, %v1019_v10  ;;  %v1532_v49 = vmul.f32 %v3391_v0, %v1020_v5  ;;  %vm801_vm11 = vweird.f32 %v3153_v4  ;;  %v1511_v63 = vsel %vm1510_vm9, %v2365_v17, %v1507_v14 }
 0x18c   :  { %v1533_v51 = vmul.f32 %v3410_v24, %v1021_v11  ;;  %v1590_v25 = vsel %vm4586_vm0, %v1526_v20, 0.0  ;;  %v1597_v18 = vsel %vm4586_vm0, %v1527_v32, 0.0  ;;  %v1516_v57 = vsel %vm3624_vm6, %v1515_v58, %v1511_v63  ;;  %v4692_v32 = vld [vmem:[#allocation27_spill] sm:$0xff]  ;;  %vm3703_vm15 = vmor %vm801_vm11, %vm802_vm5 }
 0x18d   :  { %v1591_v33 = vrot.slane %v1590_v25, 4  ;;  %v1598_v56 = vrot.slane %v1597_v18, 4  ;;  %v1604_v30 = vsel %vm4586_vm0, %v1528_v59, 0.0  ;;  %v1517_v0 = vmul.f32 %v1516_v57, %v3505_v19  ;;  %v4693_v59 = vld [vmem:[#allocation17_spill] sm:$0xff] }
 0x18e   :  { %v1605_v53 = vrot.slane %v1604_v30, 4  ;;  %v1611_v55 = vsel %vm4586_vm0, %v1529_v28, 0.0  ;;  %v1618_v29 = vsel %vm4586_vm0, %v1530_v21, 0.0  ;;  %v1625_v58 = vsel %vm4586_vm0, %v1531_v13, 0.0 }
 0x18f   :  { %v1592_v2 = vadd.f32 %v1591_v33, %v1590_v25  ;;  %v1599_v24 = vadd.f32 %v1598_v56, %v1597_v18  ;;  %v1612_v27 = vrot.slane %v1611_v55, 4  ;;  %v1619_v17 = vrot.slane %v1618_v29, 4  ;;  %v4699_v56 = vld [vmem:[#allocation24_spill] sm:$0xff] }
 0x190   :  { %v2058_v22 = vsel %vm4585_vm4, %v1517_v0, %v2057_v41  ;;  %v1606_v9 = vadd.f32 %v1605_v53, %v1604_v30  ;;  %v1632_v54 = vsel %vm4586_vm0, %v1532_v49, 0.0  ;;  %v1626_v15 = vrot.slane %v1625_v58, 4  ;;  %v4696_v41 = vld [vmem:[#allocation18_spill] sm:$0xff]  ;;  %v4701_v0 = vld [vmem:[#allocation20_spill] sm:$0xff] }
 0x191   :  { %2202 = vmatmul.msk.f32.vlgmr.msra.gmra.mxu2 %vm4584_vm1, %v2058_v22  ;;  %v1593_v23 = vrot.slane %v1592_v2, 2  ;;  %v1600_v19 = vrot.slane %v1599_v24, 2  ;;  %v1613_v43 = vadd.f32 %v1612_v27, %v1611_v55  ;;  %v1620_v50 = vadd.f32 %v1619_v17, %v1618_v29  ;;  %v4702_v55 = vld [vmem:[#allocation29_spill] sm:$0xff] }
 0x192   :  { %v1607_v39 = vrot.slane %v1606_v9, 2  ;;  %v1633_v37 = vrot.slane %v1632_v54, 4  ;;  %v1639_v1 = vsel %vm4586_vm0, %v1533_v51, 0.0  ;;  %v843_v3 = vsub.f32 1.0, %v3448_v16  ;;  %v4698_v51 = vld [vmem:[#allocation28_spill] sm:$0xff]  ;;  %v4704_v27 = vld [vmem:[#allocation21_spill] sm:$0xff] }
 0x193   :  { %v3693_v60 = vmul.f32 %v3524_v47, %v3478_v34  ;;  %v1594_v38 = vadd.f32 %v1593_v23, %v1592_v2  ;;  %v1614_v62 = vrot.slane %v1613_v43, 2  ;;  %v1621_v12 = vrot.slane %v1620_v50, 2  ;;  %v4703_v2 = vld [vmem:[#allocation26_spill] sm:$0xff] }
 0x194   :  { %v1627_v44 = vadd.f32 %v1626_v15, %v1625_v58  ;;  %v1634_v20 = vadd.f32 %v1633_v37, %v1632_v54  ;;  %v1640_v14 = vrot.slane %v1639_v1, 4  ;;  %v3697_v28 = vadd.f32 %v4693_v59, %v4692_v32 }
 0x195   :  { %v4697_v21 = vand.u32 2147483648, %v4696_v41  ;;  %v3711_v49 = vadd.f32 %v1600_v19, %v1599_v24  ;;  %v3713_v63 = vadd.f32 %v1607_v39, %v1606_v9  ;;  %v804_v25 = vsel %vm3703_vm15, %v3237_v48, %v4698_v51  ;;  %v4743_v48 = vld [vmem:[#allocation22_spill] sm:$0xff] }
 0x196   :  { %v1595_v18 = vrot.slane %v1594_v38, 1  ;;  %v3719_v57 = vadd.f32 %v1614_v62, %v1613_v43  ;;  %v1641_v33 = vadd.f32 %v1640_v14, %v1639_v1  ;;  %v4700_v30 = vsub.f32 1.0, %v4699_v56 }
 0x197   :  { %v3709_v13 = vor.u32 1.1754944e-38, %v4697_v21  ;;  %v3728_v24 = vmul.f32 %v4703_v2, %v843_v3  ;;  %v852_v17 = vand.u32 2147483648, %v4704_v27  ;;  %v3732_v9 = vadd.f32 %v1621_v12, %v1620_v50 }
 0x198   :  { %v3724_v53 = vmul.f32 %v4701_v0, %v4700_v30  ;;  %v1628_v58 = vrot.slane %v1627_v44, 2  ;;  %v1635_v54 = vrot.slane %v1634_v20, 2  ;;  %v1602_v23 = vrot.slane %v3711_v49, 1 }
 0x199   :  { %v1609_v19 = vrot.slane %v3713_v63, 1  ;;  %vm4705_vm6 = vcmask 1043456   ;;  %v3742_v15 = vadd.f32 %v1595_v18, %v1594_v38  ;;  %v1616_v37 = vrot.slane %v3719_v57, 1 }
 0x19a   :  { %v1702_v43 = vsel %vm4705_vm6, %v1014_v42, 0.0  ;;  %vm4706_vm7 = vmmov %vm4705_vm6  ;;  %v1642_v50 = vrot.slane %v1641_v33, 2  ;;  %v1623_v42 = vrot.slane %v3732_v9, 1  ;;  %v3757_v38 = vadd.f32 %v1635_v54, %v1634_v20 }
 0x19b   :  { %v1709_v39 = vsel %vm4706_vm7, %v1015_v52, 0.0  ;;  %v1703_v1 = vrot.slane %v1702_v43, 4  ;;  %vm4707_vm3 = vmmov %vm4705_vm6  ;;  %v3755_v52 = vadd.f32 %v1628_v58, %v1627_v44 }
 0x19c   :  { %v1710_v3 = vrot.slane %v1709_v39, 4  ;;  %v1716_v62 = vsel %vm4707_vm3, %v1016_v7, 0.0  ;;  %vm4708_vm5 = vmmov %vm4707_vm3  ;;  %v3759_v7 = vadd.f32 %v1642_v50, %v1641_v33 }
 0x19d   :  { %v1723_v35 = vsel %vm4708_vm5, %v1017_v31, 0.0  ;;  %vm4709_vm9 = vmmov %vm4707_vm3  ;;  %v1704_v12 = vadd.f32 %v1703_v1, %v1702_v43  ;;  %v1717_v32 = vrot.slane %v1716_v62, 4 }
 0x19e   :  { %v1730_v61 = vsel %vm4709_vm9, %v1018_v36, 0.0  ;;  %v1711_v14 = vadd.f32 %v1710_v3, %v1709_v39  ;;  %v1724_v8 = vrot.slane %v1723_v35, 4  ;;  %vm4710_vm11 = vmmov %vm4707_vm3 }
 0x19f   :  { %v1731_v21 = vrot.slane %v1730_v61, 4  ;;  %v1705_v45 = vrot.slane %v1704_v12, 2  ;;  %v1737_v46 = vsel %vm4710_vm11, %v1019_v10, 0.0  ;;  %vm4711_vm6 = vmmov %vm4707_vm3  ;;  %v1718_v44 = vadd.f32 %v1717_v32, %v1716_v62 }
 0x1a0   :  { %v1744_v31 = vsel %vm4711_vm6, %v1020_v5, 0.0  ;;  %v1712_v36 = vrot.slane %v1711_v14, 2  ;;  %v1725_v20 = vadd.f32 %v1724_v8, %v1723_v35  ;;  %v1738_v30 = vrot.slane %v1737_v46, 4  ;;  %vm4712_vm7 = vmmov %vm4707_vm3 }
 0x1a1   :  { %v1732_v18 = vadd.f32 %v1731_v21, %v1730_v61  ;;  %v1706_v56 = vadd.f32 %v1705_v45, %v1704_v12  ;;  %v1745_v58 = vrot.slane %v1744_v31, 4  ;;  %v1751_v33 = vsel %vm4712_vm7, %v1021_v11, 0.0 }
 0x1a2   :  { %v1713_v54 = vadd.f32 %v1712_v36, %v1711_v14  ;;  %v1719_v43 = vrot.slane %v1718_v44, 2  ;;  %v1726_v6 = vrot.slane %v1725_v20, 2  ;;  %v1739_v50 = vadd.f32 %v1738_v30, %v1737_v46 }
 0x1a3   :  { %v1733_v39 = vrot.slane %v1732_v18, 2  ;;  %v1707_v10 = vrot.slane %v1706_v56, 1  ;;  %v1746_v26 = vadd.f32 %v1745_v58, %v1744_v31  ;;  %v1752_v1 = vrot.slane %v1751_v33, 4 }
 0x1a4   :  { %v1714_v5 = vrot.slane %v1713_v54, 1  ;;  %v1720_v3 = vadd.f32 %v1719_v43, %v1718_v44  ;;  %v1727_v62 = vadd.f32 %v1726_v6, %v1725_v20  ;;  %v1740_v12 = vrot.slane %v1739_v50, 2 }
 0x1a5   :  { %v1734_v35 = vadd.f32 %v1733_v39, %v1732_v18  ;;  %v1708_v61 = vadd.f32 %v1707_v10, %v1706_v56  ;;  %v1747_v32 = vrot.slane %v1746_v26, 2  ;;  %v1753_v8 = vadd.f32 %v1752_v1, %v1751_v33 }
 0x1a6   :  { %v1715_v21 = vadd.f32 %v1714_v5, %v1713_v54  ;;  %v1721_v40 = vrot.slane %v1720_v3, 1  ;;  %v1728_v45 = vrot.slane %v1727_v62, 1  ;;  %v1741_v14 = vadd.f32 %v1740_v12, %v1739_v50 }
 0x1a7   :  { %v1735_v11 = vrot.slane %v1734_v35, 1  ;;  %v1748_v36 = vadd.f32 %v1747_v32, %v1746_v26  ;;  %v1754_v22 = vrot.slane %v1753_v8, 2  ;;  %v3770_v29 = vadd.f32 1e-08, %v1708_v61 }
 0x1a8   :  { %v1630_v46 = vrot.slane %v3755_v52, 1  ;;  %v1722_v31 = vadd.f32 %v1721_v40, %v1720_v3  ;;  %v1729_v30 = vadd.f32 %v1728_v45, %v1727_v62  ;;  %v3773_v44 = vadd.f32 1e-08, %v1715_v21 }
 0x1a9   :  { %v1742_v20 = vrot.slane %v1741_v14, 1  ;;  %v1749_v18 = vrot.slane %v1748_v36, 1  ;;  %v1755_v56 = vadd.f32 %v1754_v22, %v1753_v8  ;;  %2366 = vrcp.f32 %v3770_v29 }
 0x1aa   :  { %v3779_v58 = vadd.f32 %v1602_v23, %v3711_v49  ;;  %v1637_v33 = vrot.slane %v3757_v38, 1  ;;  %v1736_v54 = vadd.f32 %v1735_v11, %v1734_v35  ;;  %v3782_v43 = vadd.f32 1e-08, %v1722_v31 }
 0x1ab   :  { %v3787_v6 = vadd.f32 %v1609_v19, %v3713_v63  ;;  %v3792_v22 = vadd.f32 %v1616_v37, %v3719_v57  ;;  %v1644_v39 = vrot.slane %v3759_v7, 1  ;;  %v1756_v10 = vrot.slane %v1755_v56, 1 }
 0x1ac   :  { %v3796_v49 = vadd.f32 %v1623_v42, %v3732_v9  ;;  %v1743_v23 = vadd.f32 %v1742_v20, %v1741_v14  ;;  %v3798_v50 = vadd.f32 1e-08, %v1729_v30  ;;  %2368 = vrcp.f32 %v3773_v44 }
 0x1ad   :  { %v3802_v26 = vadd.f32 %v1630_v46, %v3755_v52  ;;  %v1750_v63 = vadd.f32 %v1749_v18, %v1748_v36  ;;  %v1903_v19 = vand.u32 2147483647, %v3770_v29  ;;  %v1905_v57 = vand.u32 2147483648, %v3770_v29 }
 0x1ae   :  { %v3807_v37 = vadd.f32 %v1637_v33, %v3757_v38  ;;  %v1757_v1 = vadd.f32 %v1756_v10, %v1755_v56  ;;  %v3809_v5 = vadd.f32 1e-08, %v1736_v54  ;;  %2370 = vrcp.f32 %v3782_v43 }
 0x1af   :  { %v2367_v9 = vpop.eup %2366  ;;  %v3813_v42 = vadd.f32 %v1644_v39, %v3759_v7  ;;  %vm1899_vm3 = vweird.f32 %v3770_v29  ;;  %v1918_v52 = vand.u32 2147483647, %v3773_v44  ;;  %v1920_v3 = vand.u32 2147483648, %v3773_v44 }
 0x1b0   :  { %v3818_v62 = vadd.f32 1e-08, %v1743_v23  ;;  %v1895_v38 = vmul.f32 %v2367_v9, %v3770_v29  ;;  %v1935_v35 = vand.u32 2147483648, %v3782_v43  ;;  %2372 = vrcp.f32 %v3798_v50 }
 0x1b1   :  { %v3823_v61 = vadd.f32 1e-08, %v1750_v63  ;;  %vm3825_vm5 = vcmp.eq.f32.partialorder %v1903_v19, 8.507059e+37  ;;  %v1906_v7 = vor.u32 1.1754944e-38, %v1905_v57  ;;  %vm1914_vm9 = vweird.f32 %v3773_v44 }
 0x1b2   :  { %v1933_v32 = vand.u32 2147483647, %v3782_v43  ;;  %v2369_v8 = vpop.eup %2368  ;;  %v3831_v21 = vadd.f32 1e-08, %v1757_v1  ;;  %v1896_v40 = vsub.f32 1.0, %v1895_v38  ;;  %v1950_v45 = vand.u32 2147483648, %v3798_v50 }
 0x1b3   :  { %2374 = vrcp.f32 %v3809_v5  ;;  %vm1900_vm11 = vweird.f32 %v2367_v9  ;;  %v1910_v11 = vmul.f32 %v2369_v8, %v3773_v44  ;;  %vm3836_vm6 = vcmp.eq.f32.partialorder %v1918_v52, 8.507059e+37  ;;  %v4725_v44 = vld [vmem:[#allocation14_spill] sm:$0xff] }
 0x1b4   :  { %v1921_v36 = vor.u32 1.1754944e-38, %v1920_v3  ;;  %vm1929_vm7 = vweird.f32 %v3782_v43  ;;  %v1948_v46 = vand.u32 2147483647, %v3798_v50  ;;  %v2371_v31 = vpop.eup %2370  ;;  %v1897_v30 = vmul.f32 %v2367_v9, %v1896_v40  ;;  %vm1901_vm12 = vmor %vm1899_vm3, %vm1900_vm11 }
 0x1b5   :  { %v1936_v20 = vor.u32 1.1754944e-38, %v1935_v35  ;;  %v1965_v18 = vand.u32 2147483648, %v3809_v5  ;;  %2376 = vrcp.f32 %v3818_v62  ;;  %v1911_v56 = vsub.f32 1.0, %v1910_v11 }
 0x1b6   :  { %vm1915_vm1 = vweird.f32 %v2369_v8  ;;  %v1925_v33 = vmul.f32 %v2371_v31, %v3782_v43  ;;  %vm3845_vm4 = vcmp.eq.f32.partialorder %v1933_v32, 8.507059e+37  ;;  %vm1944_vm0 = vweird.f32 %v3798_v50  ;;  %v2373_v39 = vpop.eup %2372 }
 0x1b7   :  { %v1898_v10 = vadd.f32 %v2367_v9, %v1897_v30  ;;  %vm1930_vm14 = vweird.f32 %v2371_v31  ;;  %v1951_v23 = vor.u32 1.1754944e-38, %v1950_v45  ;;  %v1963_v63 = vand.u32 2147483647, %v3809_v5 }
 0x1b8   :  { %v1912_v19 = vmul.f32 %v2369_v8, %v1911_v56  ;;  %v1926_v57 = vsub.f32 1.0, %v1925_v33  ;;  %v1940_v1 = vmul.f32 %v2373_v39, %v3798_v50  ;;  %vm3855_vm2 = vcmp.eq.f32.partialorder %v1948_v46, 8.507059e+37  ;;  %vm1931_vm13 = vmor %vm1929_vm7, %vm1930_vm14 }
 0x1b9   :  { %v1978_v3 = vand.u32 2147483647, %v3818_v62  ;;  %v3860_v38 = vpop.eup %2374  ;;  %v1902_v35 = vsel %vm1901_vm12, %v2367_v9, %v1898_v10  ;;  %vm1959_vm10 = vweird.f32 %v3809_v5  ;;  %v1966_v32 = vor.u32 1.1754944e-38, %v1965_v18  ;;  %vm1916_vm12 = vmor %vm1914_vm9, %vm1915_vm1 }
 0x1ba   :  { %v1980_v40 = vand.u32 2147483648, %v3818_v62  ;;  %2378 = vrcp.f32 %v3823_v61  ;;  %v1907_v29 = vsel %vm3825_vm5, %v1906_v7, %v1902_v35  ;;  %v1913_v45 = vadd.f32 %v2369_v8, %v1912_v19 }
 0x1bb   :  { %v1927_v11 = vmul.f32 %v2371_v31, %v1926_v57  ;;  %v1941_v46 = vsub.f32 1.0, %v1940_v1  ;;  %v2377_v30 = vpop.eup %2376  ;;  %v1908_v56 = vmul.f32 %v1907_v29, %v3742_v15  ;;  %vm1945_vm11 = vweird.f32 %v2373_v39 }
 0x1bc   :  { %v1955_v9 = vmul.f32 %v3860_v38, %v3809_v5  ;;  %vm3874_vm8 = vcmp.eq.f32.partialorder %v1963_v63, 8.507059e+37  ;;  %v1917_v12 = vsel %vm1916_vm12, %v2369_v8, %v1913_v45  ;;  %v1970_v10 = vmul.f32 %v2377_v30, %v3818_v62  ;;  %vm1946_vm7 = vmor %vm1944_vm0, %vm1945_vm11 }
 0x1bd   :  { %v1928_v7 = vadd.f32 %v2371_v31, %v1927_v11  ;;  %v1942_v33 = vmul.f32 %v2373_v39, %v1941_v46  ;;  %vm3880_vm3 = vcmp.eq.f32.partialorder %v1978_v3, 8.507059e+37  ;;  %vm816_vm1 = vweird.f32 %v4725_v44 }
 0x1be   :  { %v1922_v63 = vsel %vm3836_vm6, %v1921_v36, %v1917_v12  ;;  %v1956_v8 = vsub.f32 1.0, %v1955_v9  ;;  %vm1960_vm12 = vweird.f32 %v3860_v38  ;;  %v1981_v19 = vor.u32 1.1754944e-38, %v1980_v40 }
 0x1bf   :  { %v4726_v57 = vand.u32 2147483647, %v3153_v4  ;;  %v1932_v3 = vsel %vm1931_vm13, %v2371_v31, %v1928_v7  ;;  %v1943_v35 = vadd.f32 %v2373_v39, %v1942_v33  ;;  %v1971_v29 = vsub.f32 1.0, %v1970_v10  ;;  %vm1961_vm0 = vmor %vm1959_vm10, %vm1960_vm12 }
 0x1c0   :  { %vm1975_vm9 = vweird.f32 %v2377_v30  ;;  %v2379_v14 = vpop.eup %2378  ;;  %v4729_v36 = vand.u32 2147483647, %v4725_v44  ;;  %v1937_v4 = vsel %vm3845_vm4, %v1936_v20, %v1932_v3  ;;  %v1957_v31 = vmul.f32 %v3860_v38, %v1956_v8 }
 0x1c1   :  { %vm3894_vm5 = vcmp.eq.f32.partialorder %v4726_v57, 8.507059e+37  ;;  %v1993_v40 = vand.u32 2147483647, %v3823_v61  ;;  %v1995_v45 = vand.u32 2147483648, %v3823_v61  ;;  %v1947_v11 = vsel %vm1946_vm7, %v2373_v39, %v1943_v35 }
 0x1c2   :  { %vm3900_vm6 = vcmp.eq.f32.partialorder %v4729_v36, 8.507059e+37  ;;  %v1972_v46 = vmul.f32 %v2377_v30, %v1971_v29  ;;  %v1985_v9 = vmul.f32 %v2379_v14, %v3823_v61  ;;  %vm1989_vm13 = vweird.f32 %v3823_v61 }
 0x1c3   :  { %v1923_v12 = vmul.f32 %v1922_v63, %v3779_v58  ;;  %v1938_v20 = vmul.f32 %v1937_v4, %v3787_v6  ;;  %v1952_v50 = vsel %vm3855_vm2, %v1951_v23, %v1947_v11  ;;  %v1958_v54 = vadd.f32 %v3860_v38, %v1957_v31  ;;  %v4751_v31 = vld [vmem:[#allocation19_spill] sm:$0xff] }
 0x1c4   :  { %v1973_v39 = vadd.f32 %v2377_v30, %v1972_v46  ;;  %v1986_v7 = vsub.f32 1.0, %v1985_v9  ;;  %vm1990_vm4 = vweird.f32 %v2379_v14  ;;  %vm3924_vm11 = vcmp.eq.f32.partialorder %v1993_v40, 8.507059e+37 }
 0x1c5   :  { %vm846_vm7 = vweird.f32 %v4704_v27  ;;  %v1953_v58 = vmul.f32 %v1952_v50, %v3792_v22  ;;  %v1962_v6 = vsel %vm1961_vm0, %v3860_v38, %v1958_v54  ;;  %vm4734_vm2 = vweird.f32 %v3818_v62 }
 0x1c6   :  { %vm1976_vm14 = vmor %vm4734_vm2, %vm1975_vm9  ;;  %v1996_v23 = vor.u32 1.1754944e-38, %v1995_v45  ;;  %2380 = vrcp.f32 %v3831_v21  ;;  %v1967_v5 = vsel %vm3874_vm8, %v1966_v32, %v1962_v6  ;;  %v1987_v10 = vmul.f32 %v2379_v14, %v1986_v7  ;;  %v4761_v6 = vld [vmem:[#allocation13_spill] sm:$0xff] }
 0x1c7   :  { %v1977_v52 = vsel %vm1976_vm14, %v2377_v30, %v1973_v39  ;;  %v2010_v63 = vand.u32 2147483648, %v3831_v21  ;;  %v1968_v8 = vmul.f32 %v1967_v5, %v3796_v49  ;;  %v2008_v38 = vand.u32 2147483647, %v3831_v21  ;;  %v4762_v5 = vld [vmem:[#allocation12_spill] sm:$0xff] }
 0x1c8   :  { %v1982_v22 = vsel %vm3880_vm3, %v1981_v19, %v1977_v52  ;;  %vm4735_vm10 = vcmask 1041409   ;;  %vm4736_vm9 = vweird.f32 %v4693_v59  ;;  %v1988_v30 = vadd.f32 %v2379_v14, %v1987_v10  ;;  %vm1991_vm3 = vmor %vm1989_vm13, %vm1990_vm4  ;;  %v4053_v10 = vld [vmem:[#allocation3 + $0x8] sm:$0xf] }
 0x1c9   :  { %v2112_v62 = vsel %vm4735_vm10, %v1923_v12, %v1908_v56  ;;  %vm818_vm12 = vmor %vm816_vm1, %vm4736_vm9  ;;  %v1983_v32 = vmul.f32 %v1982_v22, %v3802_v26  ;;  %v3948_v18 = vor.u32 1.1754944e-38, %v2010_v63  ;;  %vm4737_vm8 = vcmask 1042434   ;;  %v4739_v56 = vld [vmem:[#allocation25_spill] sm:$0xff] }
 0x1ca   :  { %v2113_v57 = vsel %vm4737_vm8, %v1938_v20, %v2112_v62  ;;  %vm2004_vm14 = vweird.f32 %v3831_v21  ;;  %vm4738_vm0 = vcmask 1043459   ;;  %v3964_v26 = vsel %vm3894_vm5, %v4739_v56, %v804_v25 }
 0x1cb   :  { %v2114_v49 = vsel %vm4738_vm0, %v1953_v58, %v2113_v57  ;;  %v819_v15 = vsel %vm818_vm12, %v4693_v59, %v3697_v28  ;;  %v830_v61 = vadd.f32 %v4701_v0, %v3724_v53  ;;  %vm4740_vm1 = vweird.f32 %v4701_v0  ;;  %v4045_v58 = vld [vmem:[#allocation3] sm:$0xf]  ;;  %v4073_v57 = vld [vmem:[#allocation3 + $0x10] sm:$0xf] }
 0x1cc   :  { %vm4741_vm13 = vweird.f32 %v4696_v41  ;;  %v1992_v16 = vsel %vm1991_vm3, %v2379_v14, %v1988_v30  ;;  %vm4742_vm2 = vcmask 1044484   ;;  %v3978_v51 = vsel %vm3900_vm6, %v4743_v48, %v819_v15  ;;  %v2381_v59 = vpop.eup %2380  ;;  %v4078_v15 = vld [vmem:[#allocation3 + $0x14] sm:$0xf] }
 0x1cd   :  { %vm833_vm4 = vmor %vm4741_vm13, %vm4740_vm1  ;;  %v2115_v44 = vsel %vm4742_vm2, %v1968_v8, %v2114_v49  ;;  %v4744_v25 = vand.u32 2147483647, %v4696_v41  ;;  %v1997_v28 = vsel %vm3924_vm11, %v1996_v23, %v1992_v16  ;;  %vm4745_vm5 = vcmask 1045509   ;;  %v4049_v23 = vld [vmem:[#allocation3 + $0x4] sm:$0xf] }
 0x1ce   :  { %v2116_v53 = vsel %vm4745_vm5, %v1983_v32, %v2115_v44  ;;  %v834_v19 = vsel %vm833_vm4, %v4701_v0, %v830_v61  ;;  %v845_v1 = vadd.f32 %v4703_v2, %v3728_v24  ;;  %v1998_v3 = vmul.f32 %v1997_v28, %v3807_v37  ;;  %v4749_v37 = vld [vmem:[#allocation23_spill] sm:$0xff]  ;;  %v4069_v32 = vld [vmem:[#allocation3 + $0xc] sm:$0xf] }
 0x1cf   :  { %vm836_vm15 = vcmp.eq.f32.partialorder %v4744_v25, 8.507059e+37  ;;  %v2000_v35 = vmul.f32 %v2381_v59, %v3831_v21  ;;  %vm2005_vm6 = vweird.f32 %v2381_v59  ;;  %vm3990_vm10 = vcmp.eq.f32.partialorder %v2008_v38, 8.507059e+37  ;;  %v4082_v61 = vld [vmem:[#allocation3 + $0x18] sm:$0xf]  ;;  %v4092_v28 = vld [vmem:[#allocation3 + $0x1c] sm:$0xf] }
 0x1d0   :  { %v3995_v41 = vsel %vm836_vm15, %v3709_v13, %v834_v19  ;;  %vm847_vm11 = vweird.f32 %v4703_v2  ;;  %v850_v14 = vand.u32 2147483647, %v4704_v27  ;;  %v853_v0 = vor.u32 1.1754944e-38, %v852_v17  ;;  %vm4034_vm2 = vmor %vm2004_vm14, %vm2005_vm6 }
 0x1d1   :  { %v4748_v24 = vsub.f32 1.0, %v4702_v55  ;;  %v2001_v43 = vsub.f32 1.0, %v2000_v35  ;;  %vm4750_vm9 = vcmask 1046534   ;;  %vm848_vm12 = vmor %vm846_vm7, %vm847_vm11  ;;  %vm861_vm8 = vweird.f32 %v4751_v31 }
 0x1d2   :  { %v2117_v4 = vsel %vm4750_vm9, %v1998_v3, %v2116_v53  ;;  %vm862_vm3 = vweird.f32 %v4749_v37  ;;  %v849_v13 = vsel %vm848_vm12, %v4703_v2, %v845_v1  ;;  %vm851_vm0 = vcmp.eq.f32.partialorder %v850_v14, 8.507059e+37 }
 0x1d3   :  { %v859_v36 = vmul.f32 %v4749_v37, %v4748_v24  ;;  %v865_v17 = vand.u32 2147483647, %v4751_v31  ;;  %v2002_v55 = vmul.f32 %v2381_v59, %v2001_v43  ;;  %v4012_v45 = vsel %vm851_vm0, %v853_v0, %v849_v13  ;;  %vm4014_vm1 = vmor %vm861_vm8, %vm862_vm3 }
 0x1d4   :  { %v867_v27 = vand.u32 2147483648, %v4751_v31  ;;  %v4754_v46 = vsub.f32 1.0, %v3693_v60  ;;  %vm876_vm13 = vweird.f32 %v3478_v34  ;;  %vm877_vm4 = vweird.f32 %v3524_v47 }
 0x1d5   :  { %v860_v40 = vadd.f32 %v4749_v37, %v859_v36  ;;  %vm4025_vm7 = vcmp.eq.f32.partialorder %v865_v17, 8.507059e+37  ;;  %v2003_v20 = vadd.f32 %v2381_v59, %v2002_v55  ;;  %v880_v39 = vand.u32 2147483647, %v3478_v34  ;;  %vm4040_vm15 = vmor %vm876_vm13, %vm877_vm4 }
 0x1d6   :  { %v874_v9 = vmul.f32 %v3524_v47, %v4754_v46  ;;  %v868_v50 = vor.u32 1.1754944e-38, %v867_v27  ;;  %v882_v33 = vand.u32 2147483648, %v3478_v34  ;;  %v1022_v21 = vmul.f32 %v4045_v58, %v4761_v6 }
 0x1d7   :  { %v864_v2 = vsel %vm4014_vm1, %v4749_v37, %v860_v40  ;;  %v1023_v52 = vmul.f32 %v4049_v23, %v4762_v5  ;;  %v1024_v63 = vmul.f32 %v4053_v10, %v3964_v26  ;;  %v2007_v8 = vsel %vm4034_vm2, %v2381_v59, %v2003_v20 }
 0x1d8   :  { %v875_v54 = vadd.f32 %v3524_v47, %v874_v9  ;;  %v4061_v34 = vsel %vm4025_vm7, %v868_v50, %v864_v2  ;;  %vm881_vm14 = vcmp.eq.f32.partialorder %v880_v39, 8.507059e+37  ;;  %v2012_v38 = vsel %vm3990_vm10, %v3948_v18, %v2007_v8  ;;  %v4773_v8 = vld [vmem:[#allocation16_spill] sm:$0xff] }
 0x1d9   :  { %v883_v62 = vor.u32 1.1754944e-38, %v882_v33  ;;  %v1025_v30 = vmul.f32 %v4069_v32, %v3978_v51  ;;  %v1026_v49 = vmul.f32 %v4073_v57, %v3995_v41  ;;  %v2013_v56 = vmul.f32 %v2012_v38, %v3813_v42 }
 0x1da   :  { %v879_v22 = vsel %vm4040_vm15, %v3524_v47, %v875_v54  ;;  %v1027_v47 = vmul.f32 %v4078_v15, %v4012_v45  ;;  %v1028_v18 = vmul.f32 %v4082_v61, %v4061_v34  ;;  %vm4763_vm5 = vcmask 257024  }
 0x1db   :  { %v1038_v16 = vsel %vm4763_vm5, %v1022_v21, 0.0  ;;  %v4087_v44 = vsel %vm881_vm14, %v883_v62, %v879_v22  ;;  %vm4764_vm6 = vmmov %vm4763_vm5  ;;  %vm4766_vm11 = vcmask 1047559   ;;  %vm4767_vm9 = vcmask 261120  }
 0x1dc   :  { %v1039_v48 = vrot.slane %v1038_v16, 4  ;;  %v1045_v25 = vsel %vm4764_vm6, %v1023_v52, 0.0  ;;  %vm4765_vm10 = vmmov %vm4763_vm5  ;;  %v2118_v42 = vsel %vm4766_vm11, %v2013_v56, %v2117_v4  ;;  %v1029_v53 = vmul.f32 %v4092_v28, %v4087_v44 }
 0x1dd   :  { %v1052_v59 = vsel %vm4765_vm10, %v1024_v63, 0.0  ;;  %v1046_v19 = vrot.slane %v1045_v25, 4  ;;  %2204 = vmatmul.msk.f32.vlgmr.msra.gmra.mxu3 %vm4767_vm9, %v2118_v42  ;;  %vm4768_vm12 = vmmov %vm4763_vm5  ;;  %v1155_v22 = vrot.slane %v4773_v8, 1  ;;  %vm4775_vm7 = vcmask 1043456  }
 0x1de   :  { %v1053_v1 = vrot.slane %v1052_v59, 4  ;;  %v1040_v3 = vadd.f32 %v1039_v48, %v1038_v16  ;;  %v1059_v35 = vsel %vm4768_vm12, %v1025_v30, 0.0  ;;  %vm4769_vm8 = vmmov %vm4763_vm5  ;;  %v4774_v30 = vld [vmem:[#allocation15_spill] sm:$0xff] }
 0x1df   :  { %v1066_v29 = vsel %vm4769_vm8, %v1026_v49, 0.0  ;;  %vm4770_vm3 = vmmov %vm4763_vm5  ;;  %v1047_v0 = vadd.f32 %v1046_v19, %v1045_v25  ;;  %v1060_v37 = vrot.slane %v1059_v35, 4  ;;  %v1162_v49 = vrot.slane %v4774_v30, 1 }
 0x1e0   :  { %v1073_v14 = vsel %vm4770_vm3, %v1027_v47, 0.0  ;;  %v1054_v24 = vadd.f32 %v1053_v1, %v1052_v59  ;;  %v1067_v36 = vrot.slane %v1066_v29, 4  ;;  %v1041_v43 = vrot.slane %v1040_v3, 2  ;;  %vm4771_vm0 = vmmov %vm4770_vm3 }
 0x1e1   :  { %v1074_v4 = vrot.slane %v1073_v14, 4  ;;  %v1080_v31 = vsel %vm4771_vm0, %v1028_v18, 0.0  ;;  %vm4772_vm1 = vmmov %vm4771_vm0  ;;  %v1048_v40 = vrot.slane %v1047_v0, 2  ;;  %v1061_v55 = vadd.f32 %v1060_v37, %v1059_v35 }
 0x1e2   :  { %v1087_v13 = vsel %vm4772_vm1, %v1029_v53, 0.0  ;;  %v1055_v17 = vrot.slane %v1054_v24, 2  ;;  %v1068_v11 = vadd.f32 %v1067_v36, %v1066_v29  ;;  %v1042_v27 = vadd.f32 %v1041_v43, %v1040_v3  ;;  %vm4776_vm13 = vmmov %vm4775_vm7 }
 0x1e3   :  { %v1075_v46 = vadd.f32 %v1074_v4, %v1073_v14  ;;  %v1081_v9 = vrot.slane %v1080_v31, 4  ;;  %v1088_v2 = vrot.slane %v1087_v13, 4  ;;  %v1049_v12 = vadd.f32 %v1048_v40, %v1047_v0  ;;  %vm4777_vm4 = vmmov %vm4775_vm7 }
 0x1e4   :  { %v1056_v20 = vadd.f32 %v1055_v17, %v1054_v24  ;;  %v1062_v60 = vrot.slane %v1061_v55, 2  ;;  %v1069_v50 = vrot.slane %v1068_v11, 2  ;;  %v1043_v54 = vrot.slane %v1042_v27, 1  ;;  %vm4778_vm2 = vmmov %vm4777_vm4 }
 0x1e5   :  { %v1076_v39 = vrot.slane %v1075_v46, 2  ;;  %v1082_v7 = vadd.f32 %v1081_v9, %v1080_v31  ;;  %v1089_v33 = vadd.f32 %v1088_v2, %v1087_v13  ;;  %v1050_v21 = vrot.slane %v1049_v12, 1  ;;  %vm4779_vm15 = vmmov %vm4778_vm2 }
 0x1e6   :  { %v1057_v52 = vrot.slane %v1056_v20, 1  ;;  %v1063_v63 = vadd.f32 %v1062_v60, %v1061_v55  ;;  %v4103_v38 = vadd.f32 %v1069_v50, %v1068_v11  ;;  %v4108_v56 = vadd.f32 %v1043_v54, %v1042_v27  ;;  %vm4780_vm14 = vmmov %vm4778_vm2 }
 0x1e7   :  { %v4105_v62 = vadd.f32 %v1076_v39, %v1075_v46  ;;  %v1083_v47 = vrot.slane %v1082_v7, 2  ;;  %v1090_v18 = vrot.slane %v1089_v33, 2  ;;  %v4110_v16 = vadd.f32 %v1050_v21, %v1049_v12 }
 0x1e8   :  { %v4112_v48 = vadd.f32 %v1057_v52, %v1056_v20  ;;  %v1064_v25 = vrot.slane %v1063_v63, 1  ;;  %v1164_v59 = vsel %vm4775_vm7, %v3964_v26, 0.0  ;;  %v1071_v42 = vrot.slane %v4103_v38, 1 }
 0x1e9   :  { %v1078_v53 = vrot.slane %v4105_v62, 1  ;;  %v1156_v19 = vadd.f32 %v1155_v22, %v4773_v8  ;;  %v1165_v1 = vrot.slane %v1164_v59, 4  ;;  %v1171_v3 = vsel %vm4776_vm13, %v3978_v51, 0.0 }
 0x1ea   :  { %v1178_v35 = vsel %vm4777_vm4, %v3995_v41, 0.0  ;;  %v1185_v29 = vsel %vm4778_vm2, %v4012_v45, 0.0  ;;  %v1192_v14 = vsel %vm4779_vm15, %v4061_v34, 0.0  ;;  %v1084_v0 = vadd.f32 %v1083_v47, %v1082_v7 }
 0x1eb   :  { %v1163_v24 = vadd.f32 %v1162_v49, %v4774_v30  ;;  %v1166_v37 = vadd.f32 %v1165_v1, %v1164_v59  ;;  %v1172_v36 = vrot.slane %v1171_v3, 4  ;;  %v1179_v43 = vrot.slane %v1178_v35, 4 }
 0x1ec   :  { %v1186_v4 = vrot.slane %v1185_v29, 4  ;;  %v1193_v31 = vrot.slane %v1192_v14, 4  ;;  %v1199_v13 = vsel %vm4780_vm14, %v4087_v44, 0.0  ;;  %v4130_v11 = vadd.f32 1e-08, %v1156_v19 }
 0x1ed   :  { %v1167_v40 = vrot.slane %v1166_v37, 2  ;;  %v1173_v17 = vadd.f32 %v1172_v36, %v1171_v3  ;;  %v1200_v55 = vrot.slane %v1199_v13, 4  ;;  %v1091_v27 = vadd.f32 %v1090_v18, %v1089_v33 }
 0x1ee   :  { %v1180_v46 = vadd.f32 %v1179_v43, %v1178_v35  ;;  %v1187_v9 = vadd.f32 %v1186_v4, %v1185_v29  ;;  %v1194_v2 = vadd.f32 %v1193_v31, %v1192_v14  ;;  %2382 = vrcp.f32 %v4130_v11 }
 0x1ef   :  { %v1168_v12 = vadd.f32 %v1167_v40, %v1166_v37  ;;  %v1174_v20 = vrot.slane %v1173_v17, 2  ;;  %v1201_v60 = vadd.f32 %v1200_v55, %v1199_v13  ;;  %v4133_v50 = vadd.f32 %v1064_v25, %v1063_v63 }
 0x1f0   :  { %v1181_v54 = vrot.slane %v1180_v46, 2  ;;  %v1188_v39 = vrot.slane %v1187_v9, 2  ;;  %v1195_v7 = vrot.slane %v1194_v2, 2  ;;  %v4135_v22 = vadd.f32 1e-08, %v1163_v24 }
 0x1f1   :  { %v1169_v21 = vrot.slane %v1168_v12, 1  ;;  %v1175_v52 = vadd.f32 %v1174_v20, %v1173_v17  ;;  %v1202_v8 = vrot.slane %v1201_v60, 2  ;;  %v1085_v30 = vrot.slane %v1084_v0, 1 }
 0x1f2   :  { %v1182_v33 = vadd.f32 %v1181_v54, %v1180_v46  ;;  %v1189_v49 = vadd.f32 %v1188_v39, %v1187_v9  ;;  %v1196_v47 = vadd.f32 %v1195_v7, %v1194_v2  ;;  %v1092_v18 = vrot.slane %v1091_v27, 1 }
 0x1f3   :  { %v1170_v59 = vadd.f32 %v1169_v21, %v1168_v12  ;;  %v1176_v19 = vrot.slane %v1175_v52, 1  ;;  %v1203_v1 = vadd.f32 %v1202_v8, %v1201_v60  ;;  %v1287_v25 = vand.u32 2147483647, %v4130_v11 }
 0x1f4   :  { %v1183_v3 = vrot.slane %v1182_v33, 1  ;;  %v1190_v35 = vrot.slane %v1189_v49, 1  ;;  %v1197_v63 = vrot.slane %v1196_v47, 1  ;;  %v2383_v29 = vpop.eup %2382  ;;  %2384 = vrcp.f32 %v4135_v22 }
 0x1f5   :  { %v1177_v14 = vadd.f32 %v1176_v19, %v1175_v52  ;;  %v1204_v37 = vrot.slane %v1203_v1, 1  ;;  %v4138_v36 = vadd.f32 1e-08, %v1170_v59  ;;  %v4142_v24 = vadd.f32 %v1071_v42, %v4103_v38 }
 0x1f6   :  { %v1184_v43 = vadd.f32 %v1183_v3, %v1182_v33  ;;  %v1279_v4 = vmul.f32 %v2383_v29, %v4130_v11  ;;  %v1289_v31 = vand.u32 2147483648, %v4130_v11  ;;  %v4147_v13 = vadd.f32 %v1078_v53, %v4105_v62 }
 0x1f7   :  { %v4149_v40 = vadd.f32 %v1085_v30, %v1084_v0  ;;  %v1191_v17 = vadd.f32 %v1190_v35, %v1189_v49  ;;  %v4151_v55 = vadd.f32 1e-08, %v1177_v14  ;;  %v4153_v46 = vadd.f32 %v1092_v18, %v1091_v27 }
 0x1f8   :  { %v1198_v9 = vadd.f32 %v1197_v63, %v1196_v47  ;;  %vm1283_vm5 = vweird.f32 %v4130_v11  ;;  %2386 = vrcp.f32 %v4138_v36  ;;  %v1205_v38 = vadd.f32 %v1204_v37, %v1203_v1 }
 0x1f9   :  { %v4157_v42 = vadd.f32 1e-08, %v1184_v43  ;;  %v1280_v2 = vsub.f32 1.0, %v1279_v4  ;;  %vm4159_vm6 = vcmp.eq.f32.partialorder %v1287_v25, 8.507059e+37  ;;  %v1290_v62 = vor.u32 1.1754944e-38, %v1289_v31 }
 0x1fa   :  { %v1302_v53 = vand.u32 2147483647, %v4135_v22  ;;  %v1304_v0 = vand.u32 2147483648, %v4135_v22  ;;  %2388 = vrcp.f32 %v4151_v55  ;;  %v2385_v27 = vpop.eup %2384  ;;  %v4166_v20 = vadd.f32 1e-08, %v1191_v17 }
 0x1fb   :  { %v1281_v60 = vmul.f32 %v2383_v29, %v1280_v2  ;;  %vm1284_vm10 = vweird.f32 %v2383_v29  ;;  %vm1298_vm11 = vweird.f32 %v4135_v22  ;;  %v4169_v54 = vadd.f32 1e-08, %v1198_v9 }
 0x1fc   :  { %v1294_v39 = vmul.f32 %v2385_v27, %v4135_v22  ;;  %v1317_v7 = vand.u32 2147483647, %v4138_v36  ;;  %v1319_v21 = vand.u32 2147483648, %v4138_v36  ;;  %v4174_v52 = vadd.f32 1e-08, %v1205_v38  ;;  %vm4180_vm12 = vmor %vm1283_vm5, %vm1284_vm10 }
 0x1fd   :  { %v1282_v8 = vadd.f32 %v2383_v29, %v1281_v60  ;;  %vm1313_vm9 = vweird.f32 %v4138_v36  ;;  %2390 = vrcp.f32 %v4157_v42  ;;  %vm4184_vm8 = vcmp.eq.f32.partialorder %v1302_v53, 8.507059e+37 }
 0x1fe   :  { %v2387_v30 = vpop.eup %2386  ;;  %v1295_v49 = vsub.f32 1.0, %v1294_v39  ;;  %v1305_v18 = vor.u32 1.1754944e-38, %v1304_v0  ;;  %v1332_v59 = vand.u32 2147483647, %v4151_v55  ;;  %vm1299_vm3 = vweird.f32 %v2385_v27 }
 0x1ff   :  { %v1286_v19 = vsel %vm4180_vm12, %v2383_v29, %v1282_v8  ;;  %v1309_v1 = vmul.f32 %v2387_v30, %v4138_v36  ;;  %vm1328_vm0 = vweird.f32 %v4151_v55  ;;  %v1334_v11 = vand.u32 2147483648, %v4151_v55  ;;  %vm1300_vm2 = vmor %vm1298_vm11, %vm1299_vm3 }
 0x200   :  { %v2389_v3 = vpop.eup %2388  ;;  %v1296_v35 = vmul.f32 %v2385_v27, %v1295_v49  ;;  %vm4194_vm1 = vcmp.eq.f32.partialorder %v1317_v7, 8.507059e+37  ;;  %v1320_v25 = vor.u32 1.1754944e-38, %v1319_v21  ;;  %v1347_v14 = vand.u32 2147483647, %v4157_v42 }
 0x201   :  { %v1310_v37 = vsub.f32 1.0, %v1309_v1  ;;  %vm1314_vm7 = vweird.f32 %v2387_v30  ;;  %v1324_v29 = vmul.f32 %v2389_v3, %v4151_v55  ;;  %v1349_v43 = vand.u32 2147483648, %v4157_v42 }
 0x202   :  { %v1291_v4 = vsel %vm4159_vm6, %v1290_v62, %v1286_v19  ;;  %v1297_v31 = vadd.f32 %v2385_v27, %v1296_v35  ;;  %vm4203_vm13 = vcmp.eq.f32.partialorder %v1332_v59, 8.507059e+37  ;;  %vm1343_vm4 = vweird.f32 %v4157_v42  ;;  %vm1315_vm5 = vmor %vm1313_vm9, %vm1314_vm7 }
 0x203   :  { %2392 = vrcp.f32 %v4166_v20  ;;  %v2391_v9 = vpop.eup %2390  ;;  %v1311_v38 = vmul.f32 %v2387_v30, %v1310_v37  ;;  %v1325_v2 = vsub.f32 1.0, %v1324_v29  ;;  %vm1329_vm15 = vweird.f32 %v2389_v3 }
 0x204   :  { %v1335_v53 = vor.u32 1.1754944e-38, %v1334_v11  ;;  %v1301_v12 = vsel %vm1300_vm2, %v2385_v27, %v1297_v31  ;;  %v1339_v62 = vmul.f32 %v2391_v9, %v4157_v42  ;;  %vm4213_vm14 = vcmp.eq.f32.partialorder %v1347_v14, 8.507059e+37  ;;  %vm1330_vm11 = vmor %vm1328_vm0, %vm1329_vm15 }
 0x205   :  { %v1364_v60 = vand.u32 2147483648, %v4166_v20  ;;  %2394 = vrcp.f32 %v4169_v54  ;;  %v1306_v39 = vsel %vm4184_vm8, %v1305_v18, %v1301_v12  ;;  %v1312_v22 = vadd.f32 %v2387_v30, %v1311_v38 }
 0x206   :  { %v1326_v7 = vmul.f32 %v2389_v3, %v1325_v2  ;;  %v1362_v21 = vand.u32 2147483647, %v4166_v20  ;;  %v1292_v8 = vmul.f32 %v1291_v4, %v4108_v56  ;;  %v1340_v27 = vsub.f32 1.0, %v1339_v62 }
 0x207   :  { %vm1344_vm6 = vweird.f32 %v2391_v9  ;;  %v1350_v33 = vor.u32 1.1754944e-38, %v1349_v43  ;;  %v1307_v49 = vmul.f32 %v1306_v39, %v4110_v16  ;;  %v1316_v59 = vsel %vm1315_vm5, %v2387_v30, %v1312_v22 }
 0x208   :  { %v1327_v19 = vadd.f32 %v2389_v3, %v1326_v7  ;;  %vm1358_vm10 = vweird.f32 %v4166_v20  ;;  %v1377_v47 = vand.u32 2147483647, %v4169_v54  ;;  %v1321_v1 = vsel %vm4194_vm1, %v1320_v25, %v1316_v59  ;;  %vm1345_vm3 = vmor %vm1343_vm4, %vm1344_vm6 }
 0x209   :  { %v2393_v18 = vpop.eup %2392  ;;  %v1341_v56 = vmul.f32 %v2391_v9, %v1340_v27  ;;  %v1365_v36 = vor.u32 1.1754944e-38, %v1364_v60  ;;  %2396 = vrcp.f32 %v4174_v52  ;;  %v1322_v16 = vmul.f32 %v1321_v1, %v4112_v48 }
 0x20a   :  { %v1331_v30 = vsel %vm1330_vm11, %v2389_v3, %v1327_v19  ;;  %v1354_v11 = vmul.f32 %v2393_v18, %v4166_v20  ;;  %vm4237_vm9 = vcmp.eq.f32.partialorder %v1362_v21, 8.507059e+37  ;;  %vm1373_vm12 = vweird.f32 %v4169_v54 }
 0x20b   :  { %v2395_v63 = vpop.eup %2394  ;;  %v1336_v55 = vsel %vm4203_vm13, %v1335_v53, %v1331_v30  ;;  %v1342_v25 = vadd.f32 %v2391_v9, %v1341_v56  ;;  %vm1359_vm8 = vweird.f32 %v2393_v18  ;;  %v1379_v14 = vand.u32 2147483648, %v4169_v54 }
 0x20c   :  { %v1337_v37 = vmul.f32 %v1336_v55, %v4133_v50  ;;  %v1355_v48 = vsub.f32 1.0, %v1354_v11  ;;  %v1369_v3 = vmul.f32 %v2395_v63, %v4169_v54  ;;  %vm4250_vm0 = vcmp.eq.f32.partialorder %v1377_v47, 8.507059e+37 }
 0x20d   :  { %v1346_v43 = vsel %vm1345_vm3, %v2391_v9, %v1342_v25  ;;  %v1392_v4 = vand.u32 2147483647, %v4174_v52  ;;  %v1394_v31 = vand.u32 2147483648, %v4174_v52  ;;  %vm4797_vm1 = vcmask 1041409  }
 0x20e   :  { %v2039_v17 = vsel %vm4797_vm1, %v1307_v49, %v1292_v8  ;;  %v1351_v50 = vsel %vm4213_vm14, %v1350_v33, %v1346_v43  ;;  %v1356_v38 = vmul.f32 %v2393_v18, %v1355_v48  ;;  %v1370_v42 = vsub.f32 1.0, %v1369_v3  ;;  %vm1360_vm14 = vmor %vm1358_vm10, %vm1359_vm8 }
 0x20f   :  { %vm1388_vm7 = vweird.f32 %v4174_v52  ;;  %vm4798_vm13 = vcmask 1042434   ;;  %v2397_v53 = vpop.eup %2396  ;;  %v1352_v12 = vmul.f32 %v1351_v50, %v4142_v24  ;;  %vm1374_vm4 = vweird.f32 %v2395_v63 }
 0x210   :  { %v2041_v2 = vsel %vm4798_vm13, %v1322_v16, %v2039_v17  ;;  %v1380_v9 = vor.u32 1.1754944e-38, %v1379_v14  ;;  %v1395_v62 = vor.u32 1.1754944e-38, %v1394_v31  ;;  %v1357_v60 = vadd.f32 %v2393_v18, %v1356_v38  ;;  %vm1375_vm6 = vmor %vm1373_vm12, %vm1374_vm4 }
 0x211   :  { %v1371_v39 = vmul.f32 %v2395_v63, %v1370_v42  ;;  %v1384_v22 = vmul.f32 %v2397_v53, %v4174_v52  ;;  %vm4263_vm2 = vcmp.eq.f32.partialorder %v1392_v4, 8.507059e+37  ;;  %vm4801_vm15 = vcmask 1043459  }
 0x212   :  { %v2043_v0 = vsel %vm4801_vm15, %v1337_v37, %v2041_v2  ;;  %vm4802_vm5 = vcmask 1044484   ;;  %v1006_v24 = vsub.f32 1.0, %v4761_v6  ;;  %v1007_v8 = vsub.f32 1.0, %v4762_v5 }
 0x213   :  { %v2045_v21 = vsel %vm4802_vm5, %v1352_v12, %v2043_v0  ;;  %v1008_v27 = vsub.f32 1.0, %v3964_v26  ;;  %v1361_v33 = vsel %vm1360_vm14, %v2393_v18, %v1357_v60  ;;  %v1372_v49 = vadd.f32 %v2395_v63, %v1371_v39 }
 0x214   :  { %v1385_v59 = vsub.f32 1.0, %v1384_v22  ;;  %v1009_v19 = vsub.f32 1.0, %v3978_v51  ;;  %v1366_v47 = vsel %vm4237_vm9, %v1365_v36, %v1361_v33  ;;  %v1010_v20 = vsub.f32 1.0, %v3995_v41 }
 0x215   :  { %v1011_v1 = vsub.f32 1.0, %v4012_v45  ;;  %v1012_v56 = vsub.f32 1.0, %v4061_v34  ;;  %v1367_v16 = vmul.f32 %v1366_v47, %v4147_v13  ;;  %v1376_v18 = vsel %vm1375_vm6, %v2395_v63, %v1372_v49 }
 0x216   :  { %v1386_v30 = vmul.f32 %v2397_v53, %v1385_v59  ;;  %vm1389_vm10 = vweird.f32 %v2397_v53  ;;  %v1381_v11 = vsel %vm4250_vm0, %v1380_v9, %v1376_v18  ;;  %v1518_v36 = vmul.f32 %v4045_v58, %v1006_v24 }
 0x217   :  { %v1519_v54 = vmul.f32 %v4049_v23, %v1007_v8  ;;  %v1520_v35 = vmul.f32 %v4053_v10, %v1008_v27  ;;  %v1382_v13 = vmul.f32 %v1381_v11, %v4149_v40  ;;  %vm4803_vm11 = vcmask 1045509   ;;  %vm1390_vm9 = vmor %vm1388_vm7, %vm1389_vm10 }
 0x218   :  { %v1387_v63 = vadd.f32 %v2397_v53, %v1386_v30  ;;  %v2047_v55 = vsel %vm4803_vm11, %v1367_v16, %v2045_v21  ;;  %v1521_v25 = vmul.f32 %v4069_v32, %v1009_v19  ;;  %v1013_v58 = vsub.f32 1.0, %v4087_v44 }
 0x219   :  { %v1522_v23 = vmul.f32 %v4073_v57, %v1010_v20  ;;  %v1523_v10 = vmul.f32 %v4078_v15, %v1011_v1  ;;  %v1524_v40 = vmul.f32 %v4082_v61, %v1012_v56  ;;  %vm4804_vm12 = vcmask 1046534  }
 0x21a   :  { %v1391_v14 = vsel %vm1390_vm9, %v2397_v53, %v1387_v63  ;;  %v2049_v32 = vsel %vm4804_vm12, %v1382_v13, %v2047_v55  ;;  %vm4805_vm8 = vcmask 257024   ;;  %vm4810_vm13 = vcmask 1047559  }
 0x21b   :  { %v1534_v52 = vsel %vm4805_vm8, %v1518_v36, 0.0  ;;  %vm4806_vm3 = vmmov %vm4805_vm8  ;;  %v1396_v48 = vsel %vm4263_vm2, %v1395_v62, %v1391_v14  ;;  %vm4812_vm2 = vcmask 261120   ;;  %v1525_v62 = vmul.f32 %v4092_v28, %v1013_v58 }
 0x21c   :  { %v1541_v37 = vsel %vm4806_vm3, %v1519_v54, 0.0  ;;  %v1535_v3 = vrot.slane %v1534_v52, 4  ;;  %vm4807_vm0 = vmmov %vm4806_vm3  ;;  %v1397_v15 = vmul.f32 %v1396_v48, %v4153_v46  ;;  %vm4815_vm5 = vcmask 1043456  }
 0x21d   :  { %v1542_v57 = vrot.slane %v1541_v37, 4  ;;  %v1548_v29 = vsel %vm4807_vm0, %v1520_v35, 0.0  ;;  %vm4808_vm1 = vmmov %vm4807_vm0  ;;  %v1646_v54 = vsel %vm4815_vm5, %v1006_v24, 0.0 }
 0x21e   :  { %v1549_v43 = vrot.slane %v1548_v29, 4  ;;  %v1555_v4 = vsel %vm4808_vm1, %v1521_v25, 0.0  ;;  %vm4809_vm7 = vmmov %vm4807_vm0  ;;  %v1536_v31 = vadd.f32 %v1535_v3, %v1534_v52  ;;  %v2051_v42 = vsel %vm4810_vm13, %v1397_v15, %v2049_v32 }
 0x21f   :  { %v1562_v61 = vsel %vm4809_vm7, %v1522_v23, 0.0  ;;  %v1543_v17 = vadd.f32 %v1542_v57, %v1541_v37  ;;  %v1556_v50 = vrot.slane %v1555_v4, 4  ;;  %vm4811_vm4 = vmmov %vm4807_vm0  ;;  %2201 = vmatmul.msk.f32.vlgmr.msra.gmra.mxu0 %vm4812_vm2, %v2051_v42  ;;  %v1647_v25 = vrot.slane %v1646_v54, 4 }
 0x220   :  { %v1563_v38 = vrot.slane %v1562_v61, 4  ;;  %v1550_v2 = vadd.f32 %v1549_v43, %v1548_v29  ;;  %v1569_v53 = vsel %vm4811_vm4, %v1523_v10, 0.0  ;;  %v1537_v12 = vrot.slane %v1536_v31, 2  ;;  %vm4813_vm15 = vmmov %vm4807_vm0 }
 0x221   :  { %v1557_v9 = vadd.f32 %v1556_v50, %v1555_v4  ;;  %v1576_v46 = vsel %vm4813_vm15, %v1524_v40, 0.0  ;;  %v1544_v60 = vrot.slane %v1543_v17, 2  ;;  %v1570_v22 = vrot.slane %v1569_v53, 4  ;;  %vm4814_vm14 = vmmov %vm4807_vm0 }
 0x222   :  { %v1564_v39 = vadd.f32 %v1563_v38, %v1562_v61  ;;  %v1551_v7 = vrot.slane %v1550_v2, 2  ;;  %v1577_v21 = vrot.slane %v1576_v46, 4  ;;  %v4329_v33 = vadd.f32 %v1537_v12, %v1536_v31  ;;  %vm4816_vm6 = vmmov %vm4815_vm5 }
 0x223   :  { %v1558_v0 = vrot.slane %v1557_v9, 2  ;;  %v4331_v49 = vadd.f32 %v1544_v60, %v1543_v17  ;;  %v1571_v47 = vadd.f32 %v1570_v22, %v1569_v53  ;;  %v4334_v16 = vsel %vm4814_vm14, %v1525_v62, 0.0  ;;  %vm4817_vm10 = vmmov %vm4815_vm5 }
 0x224   :  { %v1565_v59 = vrot.slane %v1564_v39, 2  ;;  %v4336_v18 = vadd.f32 %v1551_v7, %v1550_v2  ;;  %v4340_v28 = vadd.f32 %v1577_v21, %v1576_v46  ;;  %v1539_v11 = vrot.slane %v4329_v33, 1  ;;  %vm4818_vm11 = vmmov %vm4815_vm5 }
 0x225   :  { %v4338_v30 = vadd.f32 %v1558_v0, %v1557_v9  ;;  %v1584_v36 = vrot.slane %v4334_v16, 4  ;;  %v1653_v35 = vsel %vm4816_vm6, %v1007_v8, 0.0  ;;  %v1546_v13 = vrot.slane %v4331_v49, 1  ;;  %vm4819_vm9 = vmmov %vm4815_vm5 }
 0x226   :  { %v4351_v63 = vadd.f32 %v1565_v59, %v1564_v39  ;;  %v1572_v55 = vrot.slane %v1571_v47, 2  ;;  %v1654_v23 = vrot.slane %v1653_v35, 4  ;;  %v1660_v10 = vsel %vm4817_vm10, %v1008_v27, 0.0  ;;  %vm4820_vm12 = vmmov %vm4815_vm5 }
 0x227   :  { %v1667_v6 = vsel %vm4818_vm11, %v1009_v19, 0.0  ;;  %v1674_v5 = vsel %vm4819_vm9, %v1010_v20, 0.0  ;;  %v1553_v24 = vrot.slane %v4336_v18, 1  ;;  %v1560_v8 = vrot.slane %v4338_v30, 1  ;;  %vm4821_vm8 = vmmov %vm4815_vm5 }
 0x228   :  { %v1579_v40 = vrot.slane %v4340_v28, 2  ;;  %v1648_v14 = vadd.f32 %v1647_v25, %v1646_v54  ;;  %v1655_v32 = vadd.f32 %v1654_v23, %v1653_v35  ;;  %v1661_v52 = vrot.slane %v1660_v10, 4  ;;  %vm4822_vm3 = vmmov %vm4815_vm5 }
 0x229   :  { %v1668_v26 = vrot.slane %v1667_v6, 4  ;;  %v1675_v37 = vrot.slane %v1674_v5, 4  ;;  %v4365_v27 = vadd.f32 %v1572_v55, %v1571_v47  ;;  %v1681_v41 = vsel %vm4820_vm12, %v1011_v1, 0.0 }
 0x22a   :  { %v1649_v51 = vrot.slane %v1648_v14, 2  ;;  %v1688_v19 = vsel %vm4821_vm8, %v1012_v56, 0.0  ;;  %v1656_v20 = vrot.slane %v1655_v32, 2  ;;  %v1662_v48 = vadd.f32 %v1661_v52, %v1660_v10 }
 0x22b   :  { %v1669_v3 = vadd.f32 %v1668_v26, %v1667_v6  ;;  %v1676_v57 = vadd.f32 %v1675_v37, %v1674_v5  ;;  %v1682_v15 = vrot.slane %v1681_v41, 4  ;;  %v1689_v43 = vrot.slane %v1688_v19, 4 }
 0x22c   :  { %v1650_v29 = vadd.f32 %v1649_v51, %v1648_v14  ;;  %v1695_v4 = vsel %vm4822_vm3, %v1013_v58, 0.0  ;;  %v1657_v61 = vadd.f32 %v1656_v20, %v1655_v32  ;;  %v1663_v31 = vrot.slane %v1662_v48, 2 }
 0x22d   :  { %v1670_v45 = vrot.slane %v1669_v3, 2  ;;  %v1677_v17 = vrot.slane %v1676_v57, 2  ;;  %v1683_v50 = vadd.f32 %v1682_v15, %v1681_v41  ;;  %v1690_v34 = vadd.f32 %v1689_v43, %v1688_v19 }
 0x22e   :  { %v1651_v1 = vrot.slane %v1650_v29, 1  ;;  %v1696_v38 = vrot.slane %v1695_v4, 4  ;;  %v1658_v56 = vrot.slane %v1657_v61, 1  ;;  %v1664_v42 = vadd.f32 %v1663_v31, %v1662_v48 }
 0x22f   :  { %v1671_v2 = vadd.f32 %v1670_v45, %v1669_v3  ;;  %v1678_v53 = vadd.f32 %v1677_v17, %v1676_v57  ;;  %v1684_v9 = vrot.slane %v1683_v50, 2  ;;  %v1691_v46 = vrot.slane %v1690_v34, 2 }
 0x230   :  { %v1652_v12 = vadd.f32 %v1651_v1, %v1650_v29  ;;  %v1697_v62 = vadd.f32 %v1696_v38, %v1695_v4  ;;  %v1659_v60 = vadd.f32 %v1658_v56, %v1657_v61  ;;  %v1665_v44 = vrot.slane %v1664_v42, 1 }
 0x231   :  { %v1672_v39 = vrot.slane %v1671_v2, 1  ;;  %v1679_v58 = vrot.slane %v1678_v53, 1  ;;  %v1685_v22 = vadd.f32 %v1684_v9, %v1683_v50  ;;  %v1692_v7 = vadd.f32 %v1691_v46, %v1690_v34 }
 0x232   :  { %v1698_v0 = vrot.slane %v1697_v62, 2  ;;  %v4376_v21 = vadd.f32 1e-08, %v1652_v12  ;;  %v1567_v59 = vrot.slane %v4351_v63, 1  ;;  %v1666_v47 = vadd.f32 %v1665_v44, %v1664_v42 }
 0x233   :  { %v1673_v54 = vadd.f32 %v1672_v39, %v1671_v2  ;;  %v4379_v35 = vadd.f32 1e-08, %v1659_v60  ;;  %v1686_v55 = vrot.slane %v1685_v22, 1  ;;  %v1693_v25 = vrot.slane %v1692_v7, 1 }
 0x234   :  { %v1699_v23 = vadd.f32 %v1698_v0, %v1697_v62  ;;  %2398 = vrcp.f32 %v4376_v21  ;;  %v4385_v10 = vadd.f32 %v1539_v11, %v4329_v33  ;;  %v4390_v6 = vadd.f32 %v1584_v36, %v4334_v16 }
 0x235   :  { %v1680_v5 = vadd.f32 %v1679_v58, %v1678_v53  ;;  %v4392_v14 = vadd.f32 1e-08, %v1666_v47  ;;  %v4397_v32 = vadd.f32 %v1546_v13, %v4331_v49  ;;  %v1574_v52 = vrot.slane %v4365_v27, 1 }
 0x236   :  { %v4401_v26 = vadd.f32 %v1579_v40, %v4340_v28  ;;  %v1700_v33 = vrot.slane %v1699_v23, 1  ;;  %v4404_v11 = vadd.f32 %v1553_v24, %v4336_v18  ;;  %v1687_v37 = vadd.f32 %v1686_v55, %v1685_v22 }
 0x237   :  { %v4406_v16 = vadd.f32 1e-08, %v1673_v54  ;;  %2400 = vrcp.f32 %v4379_v35  ;;  %v4412_v36 = vadd.f32 %v1560_v8, %v4338_v30  ;;  %v4415_v49 = vadd.f32 %v1567_v59, %v4351_v63 }
 0x238   :  { %v1694_v13 = vadd.f32 %v1693_v25, %v1692_v7  ;;  %v1783_v28 = vand.u32 2147483647, %v4376_v21  ;;  %v1701_v40 = vadd.f32 %v1700_v33, %v1699_v23  ;;  %v4418_v51 = vadd.f32 1e-08, %v1680_v5 }
 0x239   :  { %v1785_v18 = vand.u32 2147483648, %v4376_v21  ;;  %2402 = vrcp.f32 %v4392_v14  ;;  %v4423_v41 = vadd.f32 %v1574_v52, %v4365_v27  ;;  %v1581_v30 = vrot.slane %v4401_v26, 1 }
 0x23a   :  { %v2399_v24 = vpop.eup %2398  ;;  %vm1779_vm0 = vweird.f32 %v4376_v21  ;;  %v1798_v63 = vand.u32 2147483647, %v4379_v35  ;;  %v4428_v8 = vadd.f32 1e-08, %v1687_v37  ;;  %v1800_v20 = vand.u32 2147483648, %v4379_v35 }
 0x23b   :  { %v1775_v19 = vmul.f32 %v2399_v24, %v4376_v21  ;;  %2404 = vrcp.f32 %v4406_v16  ;;  %v4433_v48 = vadd.f32 1e-08, %v1694_v13  ;;  %vm4435_vm1 = vcmp.eq.f32.partialorder %v1783_v28, 8.507059e+37 }
 0x23c   :  { %vm1794_vm7 = vweird.f32 %v4379_v35  ;;  %v1813_v27 = vand.u32 2147483647, %v4392_v14  ;;  %v1815_v57 = vand.u32 2147483648, %v4392_v14  ;;  %v4442_v15 = vadd.f32 1e-08, %v1701_v40 }
 0x23d   :  { %v2401_v29 = vpop.eup %2400  ;;  %v1776_v43 = vsub.f32 1.0, %v1775_v19  ;;  %v1786_v4 = vor.u32 1.1754944e-38, %v1785_v18  ;;  %2406 = vrcp.f32 %v4418_v51  ;;  %vm1780_vm13 = vweird.f32 %v2399_v24 }
 0x23e   :  { %v1790_v61 = vmul.f32 %v2401_v29, %v4379_v35  ;;  %vm1809_vm4 = vweird.f32 %v4392_v14  ;;  %v1828_v31 = vand.u32 2147483647, %v4406_v16  ;;  %vm4448_vm2 = vcmp.eq.f32.partialorder %v1798_v63, 8.507059e+37  ;;  %vm4465_vm6 = vmor %vm1779_vm0, %vm1780_vm13 }
 0x23f   :  { %v2403_v45 = vpop.eup %2402  ;;  %v1777_v17 = vmul.f32 %v2399_v24, %v1776_v43  ;;  %v1801_v50 = vor.u32 1.1754944e-38, %v1800_v20  ;;  %v1830_v34 = vand.u32 2147483648, %v4406_v16  ;;  %2408 = vrcp.f32 %v4428_v8 }
 0x240   :  { %v1791_v38 = vsub.f32 1.0, %v1790_v61  ;;  %v1805_v56 = vmul.f32 %v2403_v45, %v4392_v14  ;;  %vm4455_vm15 = vcmp.eq.f32.partialorder %v1813_v27, 8.507059e+37  ;;  %v1816_v2 = vor.u32 1.1754944e-38, %v1815_v57 }
 0x241   :  { %vm1824_vm14 = vweird.f32 %v4406_v16  ;;  %v2405_v53 = vpop.eup %2404  ;;  %v1778_v12 = vadd.f32 %v2399_v24, %v1777_v17  ;;  %vm1795_vm5 = vweird.f32 %v2401_v29  ;;  %v1843_v9 = vand.u32 2147483647, %v4418_v51 }
 0x242   :  { %v1845_v46 = vand.u32 2147483648, %v4418_v51  ;;  %v1792_v60 = vmul.f32 %v2401_v29, %v1791_v38  ;;  %v1806_v44 = vsub.f32 1.0, %v1805_v56  ;;  %v1820_v39 = vmul.f32 %v2405_v53, %v4406_v16  ;;  %vm1796_vm12 = vmor %vm1794_vm7, %vm1795_vm5 }
 0x243   :  { %vm4470_vm10 = vcmp.eq.f32.partialorder %v1828_v31, 8.507059e+37  ;;  %v2407_v22 = vpop.eup %2406  ;;  %v1782_v7 = vsel %vm4465_vm6, %v2399_v24, %v1778_v12  ;;  %v1831_v0 = vor.u32 1.1754944e-38, %v1830_v34  ;;  %vm1839_vm11 = vweird.f32 %v4418_v51 }
 0x244   :  { %v1858_v21 = vand.u32 2147483647, %v4428_v8  ;;  %2410 = vrcp.f32 %v4433_v48  ;;  %v1793_v59 = vadd.f32 %v2401_v29, %v1792_v60  ;;  %v1807_v47 = vmul.f32 %v2403_v45, %v1806_v44 }
 0x245   :  { %vm1810_vm9 = vweird.f32 %v2403_v45  ;;  %v1821_v54 = vsub.f32 1.0, %v1820_v39  ;;  %v2409_v55 = vpop.eup %2408  ;;  %v1787_v25 = vsel %vm4435_vm1, %v1786_v4, %v1782_v7  ;;  %vm1825_vm8 = vweird.f32 %v2405_v53 }
 0x246   :  { %v1835_v23 = vmul.f32 %v2407_v22, %v4418_v51  ;;  %vm4485_vm3 = vcmp.eq.f32.partialorder %v1843_v9, 8.507059e+37  ;;  %v1846_v52 = vor.u32 1.1754944e-38, %v1845_v46  ;;  %v1797_v33 = vsel %vm1796_vm12, %v2401_v29, %v1793_v59  ;;  %vm1811_vm0 = vmor %vm1809_vm4, %vm1810_vm9 }
 0x247   :  { %v1808_v37 = vadd.f32 %v2403_v45, %v1807_v47  ;;  %v1822_v13 = vmul.f32 %v2405_v53, %v1821_v54  ;;  %v1850_v28 = vmul.f32 %v2409_v55, %v4428_v8  ;;  %vm1854_vm1 = vweird.f32 %v4428_v8  ;;  %vm1826_vm13 = vmor %vm1824_vm14, %vm1825_vm8 }
 0x248   :  { %v1836_v40 = vsub.f32 1.0, %v1835_v23  ;;  %vm4493_vm7 = vcmp.eq.f32.partialorder %v1858_v21, 8.507059e+37  ;;  %v1860_v18 = vand.u32 2147483648, %v4428_v8  ;;  %v1802_v24 = vsel %vm4448_vm2, %v1801_v50, %v1797_v33 }
 0x249   :  { %v1812_v63 = vsel %vm1811_vm0, %v2403_v45, %v1808_v37  ;;  %v1823_v19 = vadd.f32 %v2405_v53, %v1822_v13  ;;  %v1851_v20 = vsub.f32 1.0, %v1850_v28  ;;  %v1788_v27 = vmul.f32 %v1787_v25, %v4385_v10 }
 0x24a   :  { %v2411_v3 = vpop.eup %2410  ;;  %v1817_v14 = vsel %vm4455_vm15, %v1816_v2, %v1812_v63  ;;  %v1837_v57 = vmul.f32 %v2407_v22, %v1836_v40  ;;  %vm1840_vm4 = vweird.f32 %v2407_v22  ;;  %vm1855_vm5 = vweird.f32 %v2409_v55  ;;  %v2084_v2 = vpop.f32.mrf.mxu2 }
 0x24b   :  { %v1827_v29 = vsel %vm1826_vm13, %v2405_v53, %v1823_v19  ;;  %v1852_v43 = vmul.f32 %v2409_v55, %v1851_v20  ;;  %v1865_v4 = vmul.f32 %v2411_v3, %v4433_v48  ;;  %v1803_v61 = vmul.f32 %v1802_v24, %v4397_v32  ;;  %vm1841_vm2 = vmor %vm1839_vm11, %vm1840_vm4 }
 0x24c   :  { %v1832_v31 = vsel %vm4470_vm10, %v1831_v0, %v1827_v29  ;;  %v1838_v10 = vadd.f32 %v2407_v22, %v1837_v57  ;;  %v1861_v45 = vor.u32 1.1754944e-38, %v1860_v18  ;;  %v1818_v17 = vmul.f32 %v1817_v14, %v4404_v11  ;;  %vm1856_vm15 = vmor %vm1854_vm1, %vm1855_vm5  ;;  %v2221_v11 = vld [vmem:[%s4556_s4] ss:$0 sm:$0xff]  ;;  %s2514_s4 = smov [#allocation8]  }
 0x24d   :  { %v1853_v16 = vadd.f32 %v2409_v55, %v1852_v43  ;;  %v1866_v1 = vsub.f32 1.0, %v1865_v4  ;;  %v1873_v50 = vand.u32 2147483647, %v4433_v48  ;;  %v1833_v34 = vmul.f32 %v1832_v31, %v4412_v36  ;;  %s2153_s9 = sshll.u32 %s2514_s4, 4  ;;  %s2154_s9 = int_to_ptr.vmem [resolvable:$true] %s2153_s9 }
 0x24e   :  { %v1842_v38 = vsel %vm1841_vm2, %v2407_v22, %v1838_v10  ;;  %v1875_v32 = vand.u32 2147483648, %v4433_v48  ;;  %2412 = vrcp.f32 %v4442_v15  ;;  %vm1870_vm14 = vweird.f32 %v2411_v3 }
 0x24f   :  { %v1847_v51 = vsel %vm4485_vm3, %v1846_v52, %v1842_v38  ;;  %v1857_v56 = vsel %vm1856_vm15, %v2409_v55, %v1853_v16  ;;  %v1867_v42 = vmul.f32 %v2411_v3, %v1866_v1  ;;  %v1586_v36 = vrot.slane %v4390_v6, 2 }
 0x250   :  { %v1848_v8 = vmul.f32 %v1847_v51, %v4415_v49  ;;  %v1862_v53 = vsel %vm4493_vm7, %v1861_v45, %v1857_v56  ;;  %vm4837_vm6 = vcmask 1041409   ;;  %vm1869_vm10 = vweird.f32 %v4433_v48 }
 0x251   :  { %v2105_v12 = vsel %vm4837_vm6, %v1803_v61, %v1788_v27  ;;  %v1863_v9 = vmul.f32 %v1862_v53, %v4423_v41  ;;  %v1868_v46 = vadd.f32 %v2411_v3, %v1867_v42  ;;  %vm4838_vm11 = vcmask 1042434   ;;  %vm1871_vm9 = vmor %vm1869_vm10, %vm1870_vm14 }
 0x252   :  { %v2106_v62 = vsel %vm4838_vm11, %v1818_v17, %v2105_v12  ;;  %v1876_v60 = vor.u32 1.1754944e-38, %v1875_v32  ;;  %vm4839_vm12 = vcmask 1043459   ;;  %v2085_v39 = vadd.f32 %v2221_v11, %v2084_v2 }
 0x253   :  { %v2107_v44 = vsel %vm4839_vm12, %v1833_v34, %v2106_v62  ;;  %v1582_v49 = vadd.f32 %v1581_v30, %v4401_v26  ;;  %v1872_v58 = vsel %vm1871_vm9, %v2411_v3, %v1868_v46  ;;  %vm1874_vm8 = vcmp.eq.f32.partialorder %v1873_v50, 8.507059e+37 }
 0x254   :  { %vm4840_vm3 = vcmask 1044484   ;;  %v2413_v7 = vpop.eup %2412  ;;  %v1877_v41 = vsel %vm1874_vm8, %v1876_v60, %v1872_v58  ;;  %vm4841_vm0 = vcmask 1045509   ;;  %2088 = vst [vmem:[#allocation8 + $0x8] sm:$0xff] %v2085_v39  ;;  %v1587_v48 = vadd.f32 %v1586_v36, %v4390_v6 }
 0x255   :  { %v2108_v22 = vsel %vm4840_vm3, %v1848_v8, %v2107_v44  ;;  %v1878_v21 = vmul.f32 %v1877_v41, %v1582_v49  ;;  %v1880_v59 = vmul.f32 %v2413_v7, %v4442_v15  ;;  %vm4842_vm1 = vcmask 1046534  }
 0x256   :  { %v2109_v0 = vsel %vm4841_vm0, %v1863_v9, %v2108_v22  ;;  %v1890_v55 = vand.u32 2147483648, %v4442_v15  ;;  %v1588_v26 = vrot.slane %v1587_v48, 1  ;;  %vm1885_vm7 = vweird.f32 %v2413_v7 }
 0x257   :  { %v1881_v47 = vsub.f32 1.0, %v1880_v59  ;;  %v2110_v54 = vsel %vm4842_vm1, %v1878_v21, %v2109_v0  ;;  %v1888_v25 = vand.u32 2147483647, %v4442_v15  ;;  %vm1884_vm13 = vweird.f32 %v4442_v15 }
 0x258   :  { %vm1886_vm4 = vmor %vm1884_vm13, %vm1885_vm7  ;;  %v1891_v5 = vor.u32 1.1754944e-38, %v1890_v55  ;;  %v1589_v52 = vadd.f32 %v1588_v26, %v1587_v48  ;;  %vm4843_vm2 = vcmask 1047559   ;;  %vm4844_vm15 = vcmask 261120  }
 0x259   :  { %v1882_v30 = vmul.f32 %v2413_v7, %v1881_v47  ;;  %vm1889_vm5 = vcmp.eq.f32.partialorder %v1888_v25, 8.507059e+37 }
 0x25b   :  { %v1883_v23 = vadd.f32 %v2413_v7, %v1882_v30 }
 0x25d   :  { %v1887_v6 = vsel %vm1886_vm4, %v2413_v7, %v1883_v23 }
 0x25e   :  { %v1892_v33 = vsel %vm1889_vm5, %v1891_v5, %v1887_v6 }
 0x25f   :  { %v1893_v37 = vmul.f32 %v1892_v33, %v1589_v52 }
 0x260   :  { %v2143_v28 = vpop.f32.mrf.mxu3 }
 0x261   :  { %v2111_v13 = vsel %vm4843_vm2, %v1893_v37, %v2110_v54  ;;  %v2144_v40 = vadd.f32 %v2221_v11, %v2143_v28 }
 0x262   :  { %2203 = vmatmul.msk.f32.vlgmr.msra.gmra.mxu1 %vm4844_vm15, %v2111_v13 }
 0x263   :  { %2148 = vst [vmem:[#allocation8 + $0x18] sm:$0xff] %v2144_v40 }
 0x29c   :  { %v2081_v35 = vpop.f32.mrf.mxu0 }
 0x29d   :  { %v2082_v18 = vadd.f32 %v2221_v11, %v2081_v35 }
 0x29f   :  { %2087 = vst [vmem:[#allocation8] sm:$0xff] %v2082_v18 }
 0x2df   :  { %v2140_v15 = vpop.f32.mrf.mxu1 }
 0x2e0   :  { %v2141_v24 = vadd.f32 %v2221_v11, %v2140_v15 }
 0x2e2   :  { %2147 = vst [vmem:[#allocation8 + $0x10] sm:$0xff] %v2141_v24 }
 0x2e3   :  { %2161 = dma.vmem_to_hbm [thread:$0]  %s2154_s9, 512, %s2156_s12, [#allocation5], %s2512_s30, %s2512_s30, %s2513_s6  }
 0x2e4   :  { %2506 = dma.done.wait [#allocation5], 512  }
 0x2e5   :  { %2507 = vsyncadd [#allocation5], 4294966784 }
 0x2e6   :  { %2166 = vsyncpa [#allocation4], 1 }
 0x2e7   :  { %2167 = vsyncpa [#allocation7], 1 }
 0x2e8   :  { %2168 = vsyncpa [#allocation5], 1 }

</bundles_post_ra>
